<compile_context>
chip_gen: v6e
topology: v6e:2x2x1
jax: 0.10.0
libtpu: 0.0.40
codegen_flags: <defaults>
</compile_context>

<pallas_src>
import jax
import jax.numpy as jnp
from jax.experimental import pallas as pl
from jax.experimental.pallas import tpu as pltpu


# ------------------------- synthetic CroCo config --------------------------

B = 2                              # batch
C = 3                              # image channels
IMG = 16                           # image height = width
PATCH = 8                          # patch size
NH = IMG // PATCH                  # patches per side
N = NH * NH                        # tokens per image (4)
F_IN = PATCH * PATCH * C           # patchified feature dim (192)
D = 32                             # embed dim
HEADS = 2
HEAD_DIM = D // HEADS              # 16
MLP_HID = 4 * D                    # 128
DEPTH = 2
GAUSS_DIM = 8                      # per-token gaussian params
PRED_DIM = F_IN                    # per-token rgb prediction (192)
LN_EPS = 1e-6


# ----------------------------- fused kernel --------------------------------

def _croco_kernel(tok1_ref, tok2_ref, pos_ref,
                  patch_w_ref, patch_b_ref,
                  ln1_g_ref, ln1_b_ref, qkv_w_ref, qkv_b_ref,
                  proj_w_ref, proj_b_ref,
                  ln2_g_ref, ln2_b_ref, fc1_w_ref, fc1_b_ref,
                  fc2_w_ref, fc2_b_ref,
                  norm_g_ref, norm_b_ref,
                  pred_w_ref, pred_b_ref, gauss_w_ref, gauss_b_ref,
                  pred_ref, gauss_ref):
    scale = 1.0 / float(HEAD_DIM) ** 0.5

    def layer_norm(x, g, b):
        # f32 statistics
        mu = jnp.mean(x, axis=-1, keepdims=True)
        var = jnp.mean((x - mu) ** 2, axis=-1, keepdims=True)
        return (x - mu) * jax.lax.rsqrt(var + LN_EPS) * g + b

    def mm(x, w):
        # bf16 MXU operands, f32 accumulation
        return jnp.dot(x.astype(jnp.bfloat16), w.astype(jnp.bfloat16),
                       preferred_element_type=jnp.float32)

    def encode_one(tok):
        # tok: (N, F_IN) bf16 -> (N, D) f32
        x = mm(tok, patch_w_ref[...]) + patch_b_ref[...]
        x = x + pos_ref[...]
        for L in range(DEPTH):
            # ---- attention ----
            h = layer_norm(x, ln1_g_ref[L], ln1_b_ref[L])
            qkv = mm(h, qkv_w_ref[L]) + qkv_b_ref[L]          # (N, 3D) f32
            heads = []
            for hh in range(HEADS):
                q = qkv[:, hh * HEAD_DIM:(hh + 1) * HEAD_DIM]
                k = qkv[:, D + hh * HEAD_DIM:D + (hh + 1) * HEAD_DIM]
                v = qkv[:, 2 * D + hh * HEAD_DIM:2 * D + (hh + 1) * HEAD_DIM]
                # q @ k^T without materializing a transpose
                s = jax.lax.dot_general(
                    q.astype(jnp.bfloat16), k.astype(jnp.bfloat16),
                    (((1,), (1,)), ((), ())),
                    preferred_element_type=jnp.float32) * scale
                m = jnp.max(s, axis=-1, keepdims=True)
                p = jnp.exp(s - m)
                l = jnp.sum(p, axis=-1, keepdims=True)
                heads.append(mm(p, v) * pl.reciprocal(l, approx=True))
            attn = jnp.concatenate(heads, axis=-1)            # (N, D)
            x = x + mm(attn, proj_w_ref[L]) + proj_b_ref[L]   # residual folded

            # ---- MLP ----
            h = layer_norm(x, ln2_g_ref[L], ln2_b_ref[L])
            h = mm(h, fc1_w_ref[L]) + fc1_b_ref[L]
            # TODO(synk): PyTorch nn.GELU defaults to the exact erf GELU; the
            # tanh approximation is used here.
            h = jax.nn.gelu(h, approximate=True)
            x = x + mm(h, fc2_w_ref[L]) + fc2_b_ref[L]        # residual folded
        return layer_norm(x, norm_g_ref[...], norm_b_ref[...])

    f1 = encode_one(tok1_ref[0])
    f2 = encode_one(tok2_ref[0])
    feat = jnp.concatenate([f1, f2], axis=-1)                 # (N, 2D)
    pred_ref[0] = (mm(feat, pred_w_ref[...]) + pred_b_ref[...]).astype(pred_ref.dtype)
    gauss_ref[0] = (mm(feat, gauss_w_ref[...]) + gauss_b_ref[...]).astype(gauss_ref.dtype)


# ------------------------------ wrapper glue --------------------------------

_PARAM_ORDER = ("pos", "patch_w", "patch_b",
                "ln1_g", "ln1_b", "qkv_w", "qkv_b", "proj_w", "proj_b",
                "ln2_g", "ln2_b", "fc1_w", "fc1_b", "fc2_w", "fc2_b",
                "norm_g", "norm_b",
                "head_pred_w", "head_pred_b", "head_gauss_w", "head_gauss_b")


def _const_spec(shape):
    nd = len(shape)
    return pl.BlockSpec(shape, lambda b, nd=nd: (0,) * nd)


def croco_pallas(tok1, tok2, params):
    weights = [params[k] for k in _PARAM_ORDER]
    tok_spec = pl.BlockSpec((1, N, F_IN), lambda b: (b, 0, 0))
    in_specs = [tok_spec, tok_spec] + [_const_spec(w.shape) for w in weights]
    out_specs = (pl.BlockSpec((1, N, PRED_DIM), lambda b: (b, 0, 0)),
                 pl.BlockSpec((1, N, GAUSS_DIM), lambda b: (b, 0, 0)))
    out_shape = (jax.ShapeDtypeStruct((B, N, PRED_DIM), jnp.float32),
                 jax.ShapeDtypeStruct((B, N, GAUSS_DIM), jnp.float32))
    return pl.pallas_call(
        _croco_kernel,
        out_shape=out_shape,
        grid=(B,),
        in_specs=in_specs,
        out_specs=out_specs,
        compiler_params=pltpu.CompilerParams(
            dimension_semantics=("parallel",)),
    )(tok1, tok2, *weights)


def patchify(img):
    # img: [B, C, H, W] -> tokens [B, N, PATCH*PATCH*C]
    b = img.shape[0]
    x = img.reshape(b, C, NH, PATCH, NH, PATCH)
    x = x.transpose(0, 2, 4, 3, 5, 1)
    return x.reshape(b, N, F_IN)


def unpatchify(tok):
    # tok: [B, N, PATCH*PATCH*C] -> image [B, C, H, W]
    b = tok.shape[0]
    x = tok.reshape(b, NH, NH, PATCH, PATCH, C)
    x = x.transpose(0, 5, 1, 3, 2, 4)
    return x.reshape(b, C, IMG, IMG)


def sincos_pos_embed(n, d):
    pos = jnp.arange(n, dtype=jnp.float32)[:, None]
    dim = jnp.arange(d, dtype=jnp.float32)[None, :]
    angle = pos / jnp.power(10000.0, (2.0 * jnp.floor(dim / 2.0)) / d)
    return jnp.where(jnp.arange(d)[None, :] % 2 == 0, jnp.sin(angle), jnp.cos(angle))


def init_params(key):
    def dense(k, fi, fo):
        return (0.02 * jax.random.normal(k, (fi, fo), jnp.float32)).astype(jnp.bfloat16)

    def dense_stack(k, fi, fo):
        return (0.02 * jax.random.normal(k, (DEPTH, fi, fo), jnp.float32)).astype(jnp.bfloat16)

    keys = iter(jax.random.split(key, 16))
    return {
        "pos": sincos_pos_embed(N, D),                             # f32 (N, D)
        "patch_w": dense(next(keys), F_IN, D),                     # bf16
        "patch_b": jnp.zeros((1, D), jnp.float32),
        "ln1_g": jnp.ones((DEPTH, 1, D), jnp.float32),
        "ln1_b": jnp.zeros((DEPTH, 1, D), jnp.float32),
        "qkv_w": dense_stack(next(keys), D, 3 * D),
        "qkv_b": jnp.zeros((DEPTH, 1, 3 * D), jnp.float32),
        "proj_w": dense_stack(next(keys), D, D),
        "proj_b": jnp.zeros((DEPTH, 1, D), jnp.float32),
        "ln2_g": jnp.ones((DEPTH, 1, D), jnp.float32),
        "ln2_b": jnp.zeros((DEPTH, 1, D), jnp.float32),
        "fc1_w": dense_stack(next(keys), D, MLP_HID),
        "fc1_b": jnp.zeros((DEPTH, 1, MLP_HID), jnp.float32),
        "fc2_w": dense_stack(next(keys), MLP_HID, D),
        "fc2_b": jnp.zeros((DEPTH, 1, D), jnp.float32),
        "norm_g": jnp.ones((1, D), jnp.float32),
        "norm_b": jnp.zeros((1, D), jnp.float32),
        "head_pred_w": dense(next(keys), 2 * D, PRED_DIM),
        "head_pred_b": jnp.zeros((1, PRED_DIM), jnp.float32),
        "head_gauss_w": dense(next(keys), 2 * D, GAUSS_DIM),
        "head_gauss_b": jnp.zeros((1, GAUSS_DIM), jnp.float32),
    }


@jax.jit
def croco_forward(params, img1, img2):
    # TODO(synk): the original module loads a CroCo checkpoint, interpolates the
    # pos-embed and runs CroCoDownstreamBinocular; the same forward structure
    # (shared ViT encoder on both views + downstream prediction / gaussian
    # heads) is reproduced here with synthetic weights.
    tok1 = patchify(img1).astype(jnp.bfloat16)
    tok2 = patchify(img2).astype(jnp.bfloat16)
    pred_tok, gauss = croco_pallas(tok1, tok2, params)
    prediction = unpatchify(pred_tok)                          # [B, 3, H, W]
    return prediction, gauss                                   # gauss: [B, N, 8]


# --------------------------------- driver ----------------------------------

if __name__ == "__main__":
    key = jax.random.PRNGKey(0)
    k1, k2, kp = jax.random.split(key, 3)
    img1 = jax.random.normal(k1, (B, C, IMG, IMG), jnp.float32)
    img2 = jax.random.normal(k2, (B, C, IMG, IMG), jnp.float32)

    params = init_params(kp)

    prediction, gauss = croco_forward(params, img1, img2)
    jax.block_until_ready(prediction)
    jax.block_until_ready(gauss)

    assert prediction.shape == (B, C, IMG, IMG)
    assert gauss.shape == (B, N, GAUSS_DIM)
    assert jnp.all(jnp.isfinite(prediction)) and jnp.all(jnp.isfinite(gauss))
    print("KERNEL_OK")
</pallas_src>

<mosaic_0001>
module attributes {stable_mosaic.version = 11 : i64} {
  func.func @_croco_kernel(%arg0: i32, %arg1: memref<1x4x192xbf16, #tpu.memory_space<vmem>>, %arg2: memref<1x4x192xbf16, #tpu.memory_space<vmem>>, %arg3: memref<4x32xf32, #tpu.memory_space<vmem>>, %arg4: memref<192x32xbf16, #tpu.memory_space<vmem>>, %arg5: memref<1x32xf32, #tpu.memory_space<vmem>>, %arg6: memref<2x1x32xf32, #tpu.memory_space<vmem>>, %arg7: memref<2x1x32xf32, #tpu.memory_space<vmem>>, %arg8: memref<2x32x96xbf16, #tpu.memory_space<vmem>>, %arg9: memref<2x1x96xf32, #tpu.memory_space<vmem>>, %arg10: memref<2x32x32xbf16, #tpu.memory_space<vmem>>, %arg11: memref<2x1x32xf32, #tpu.memory_space<vmem>>, %arg12: memref<2x1x32xf32, #tpu.memory_space<vmem>>, %arg13: memref<2x1x32xf32, #tpu.memory_space<vmem>>, %arg14: memref<2x32x128xbf16, #tpu.memory_space<vmem>>, %arg15: memref<2x1x128xf32, #tpu.memory_space<vmem>>, %arg16: memref<2x128x32xbf16, #tpu.memory_space<vmem>>, %arg17: memref<2x1x32xf32, #tpu.memory_space<vmem>>, %arg18: memref<1x32xf32, #tpu.memory_space<vmem>>, %arg19: memref<1x32xf32, #tpu.memory_space<vmem>>, %arg20: memref<64x192xbf16, #tpu.memory_space<vmem>>, %arg21: memref<1x192xf32, #tpu.memory_space<vmem>>, %arg22: memref<64x8xbf16, #tpu.memory_space<vmem>>, %arg23: memref<1x8xf32, #tpu.memory_space<vmem>>, %arg24: memref<1x4x192xf32, #tpu.memory_space<vmem>>, %arg25: memref<1x4x8xf32, #tpu.memory_space<vmem>>) attributes {dimension_semantics = [#tpu.dimension_semantics<parallel>], iteration_bounds = array<i64: 2>, scalar_prefetch = 0 : i64, scratch_operands = 0 : i64, tpu.core_type = #tpu.core_type<tc>, window_params = [{transform_indices = @transform_0, window_bounds = array<i64: 1, 4, 192>}, {transform_indices = @transform_1, window_bounds = array<i64: 1, 4, 192>}, {pipeline_mode = #tpu.pipeline_mode<synchronous>, transform_indices = @transform_2, window_bounds = array<i64: 4, 32>}, {pipeline_mode = #tpu.pipeline_mode<synchronous>, transform_indices = @transform_3, window_bounds = array<i64: 192, 32>}, {pipeline_mode = #tpu.pipeline_mode<synchronous>, transform_indices = @transform_4, window_bounds = array<i64: 1, 32>}, {pipeline_mode = #tpu.pipeline_mode<synchronous>, transform_indices = @transform_5, window_bounds = array<i64: 2, 1, 32>}, {pipeline_mode = #tpu.pipeline_mode<synchronous>, transform_indices = @transform_6, window_bounds = array<i64: 2, 1, 32>}, {pipeline_mode = #tpu.pipeline_mode<synchronous>, transform_indices = @transform_7, window_bounds = array<i64: 2, 32, 96>}, {pipeline_mode = #tpu.pipeline_mode<synchronous>, transform_indices = @transform_8, window_bounds = array<i64: 2, 1, 96>}, {pipeline_mode = #tpu.pipeline_mode<synchronous>, transform_indices = @transform_9, window_bounds = array<i64: 2, 32, 32>}, {pipeline_mode = #tpu.pipeline_mode<synchronous>, transform_indices = @transform_10, window_bounds = array<i64: 2, 1, 32>}, {pipeline_mode = #tpu.pipeline_mode<synchronous>, transform_indices = @transform_11, window_bounds = array<i64: 2, 1, 32>}, {pipeline_mode = #tpu.pipeline_mode<synchronous>, transform_indices = @transform_12, window_bounds = array<i64: 2, 1, 32>}, {pipeline_mode = #tpu.pipeline_mode<synchronous>, transform_indices = @transform_13, window_bounds = array<i64: 2, 32, 128>}, {pipeline_mode = #tpu.pipeline_mode<synchronous>, transform_indices = @transform_14, window_bounds = array<i64: 2, 1, 128>}, {pipeline_mode = #tpu.pipeline_mode<synchronous>, transform_indices = @transform_15, window_bounds = array<i64: 2, 128, 32>}, {pipeline_mode = #tpu.pipeline_mode<synchronous>, transform_indices = @transform_16, window_bounds = array<i64: 2, 1, 32>}, {pipeline_mode = #tpu.pipeline_mode<synchronous>, transform_indices = @transform_17, window_bounds = array<i64: 1, 32>}, {pipeline_mode = #tpu.pipeline_mode<synchronous>, transform_indices = @transform_18, window_bounds = array<i64: 1, 32>}, {pipeline_mode = #tpu.pipeline_mode<synchronous>, transform_indices = @transform_19, window_bounds = array<i64: 64, 192>}, {pipeline_mode = #tpu.pipeline_mode<synchronous>, transform_indices = @transform_20, window_bounds = array<i64: 1, 192>}, {pipeline_mode = #tpu.pipeline_mode<synchronous>, transform_indices = @transform_21, window_bounds = array<i64: 64, 8>}, {pipeline_mode = #tpu.pipeline_mode<synchronous>, transform_indices = @transform_22, window_bounds = array<i64: 1, 8>}, {transform_indices = @transform_23, window_bounds = array<i64: 1, 4, 192>}, {transform_indices = @transform_24, window_bounds = array<i64: 1, 4, 8>}]} {
    %c0 = arith.constant 0 : index
    %c0_0 = arith.constant 0 : index
    %c0_1 = arith.constant 0 : index
    %0 = vector.load %arg1[%c0, %c0_0, %c0_1] : memref<1x4x192xbf16, #tpu.memory_space<vmem>>, vector<1x4x192xbf16>
    %1 = vector.shape_cast %0 : vector<1x4x192xbf16> to vector<4x192xbf16>
    %c0_2 = arith.constant 0 : index
    %c0_3 = arith.constant 0 : index
    %2 = vector.load %arg4[%c0_2, %c0_3] : memref<192x32xbf16, #tpu.memory_space<vmem>>, vector<192x32xbf16>
    %cst = arith.constant dense<0.000000e+00> : vector<4x32xf32>
    %3 = tpu.matmul %1, %2, %cst {dimension_numbers = #tpu.dot_dimension_numbers<[1], [0], [0], [1], [0, 0, 1, 1], [], []>} : vector<4x192xbf16>, vector<192x32xbf16>, vector<4x32xf32> -> vector<4x32xf32>
    %c0_4 = arith.constant 0 : index
    %c0_5 = arith.constant 0 : index
    %4 = vector.load %arg5[%c0_4, %c0_5] : memref<1x32xf32, #tpu.memory_space<vmem>>, vector<1x32xf32>
    %5 = vector.broadcast %4 : vector<1x32xf32> to vector<4x32xf32>
    %6 = arith.addf %3, %5 : vector<4x32xf32>
    %c0_6 = arith.constant 0 : index
    %c0_7 = arith.constant 0 : index
    %7 = vector.load %arg3[%c0_6, %c0_7] : memref<4x32xf32, #tpu.memory_space<vmem>>, vector<4x32xf32>
    %8 = arith.addf %6, %7 : vector<4x32xf32>
    %c0_8 = arith.constant 0 : index
    %c0_9 = arith.constant 0 : index
    %c0_10 = arith.constant 0 : index
    %9 = vector.load %arg6[%c0_8, %c0_9, %c0_10] : memref<2x1x32xf32, #tpu.memory_space<vmem>>, vector<1x1x32xf32>
    %10 = vector.shape_cast %9 : vector<1x1x32xf32> to vector<1x32xf32>
    %c0_11 = arith.constant 0 : index
    %c0_12 = arith.constant 0 : index
    %c0_13 = arith.constant 0 : index
    %11 = vector.load %arg7[%c0_11, %c0_12, %c0_13] : memref<2x1x32xf32, #tpu.memory_space<vmem>>, vector<1x1x32xf32>
    %12 = vector.shape_cast %11 : vector<1x1x32xf32> to vector<1x32xf32>
    %cst_14 = arith.constant dense<0.000000e+00> : vector<4xf32>
    %13 = vector.multi_reduction <add>, %8, %cst_14 [1] : vector<4x32xf32> to vector<4xf32>
    %14 = vector.shape_cast %13 : vector<4xf32> to vector<4x1xf32>
    %cst_15 = arith.constant 3.200000e+01 : f32
    %15 = vector.broadcast %cst_15 : f32 to vector<4x1xf32>
    %16 = arith.divf %14, %15 : vector<4x1xf32>
    %17 = vector.broadcast %16 : vector<4x1xf32> to vector<4x32xf32>
    %18 = arith.subf %8, %17 : vector<4x32xf32>
    %19 = arith.mulf %18, %18 : vector<4x32xf32>
    %cst_16 = arith.constant dense<0.000000e+00> : vector<4xf32>
    %20 = vector.multi_reduction <add>, %19, %cst_16 [1] : vector<4x32xf32> to vector<4xf32>
    %21 = vector.shape_cast %20 : vector<4xf32> to vector<4x1xf32>
    %cst_17 = arith.constant 3.200000e+01 : f32
    %22 = vector.broadcast %cst_17 : f32 to vector<4x1xf32>
    %23 = arith.divf %21, %22 : vector<4x1xf32>
    %24 = vector.broadcast %16 : vector<4x1xf32> to vector<4x32xf32>
    %25 = arith.subf %8, %24 : vector<4x32xf32>
    %cst_18 = arith.constant 9.99999997E-7 : f32
    %26 = vector.broadcast %cst_18 : f32 to vector<4x1xf32>
    %27 = arith.addf %23, %26 : vector<4x1xf32>
    %28 = math.rsqrt %27 : vector<4x1xf32>
    %29 = vector.broadcast %28 : vector<4x1xf32> to vector<4x32xf32>
    %30 = arith.mulf %25, %29 : vector<4x32xf32>
    %31 = vector.broadcast %10 : vector<1x32xf32> to vector<4x32xf32>
    %32 = arith.mulf %30, %31 : vector<4x32xf32>
    %33 = vector.broadcast %12 : vector<1x32xf32> to vector<4x32xf32>
    %34 = arith.addf %32, %33 : vector<4x32xf32>
    %c0_19 = arith.constant 0 : index
    %c0_20 = arith.constant 0 : index
    %c0_21 = arith.constant 0 : index
    %35 = vector.load %arg8[%c0_19, %c0_20, %c0_21] : memref<2x32x96xbf16, #tpu.memory_space<vmem>>, vector<1x32x96xbf16>
    %36 = vector.shape_cast %35 : vector<1x32x96xbf16> to vector<32x96xbf16>
    %37 = arith.truncf %34 : vector<4x32xf32> to vector<4x32xbf16>
    %cst_22 = arith.constant dense<0.000000e+00> : vector<4x96xf32>
    %38 = tpu.matmul %37, %36, %cst_22 {dimension_numbers = #tpu.dot_dimension_numbers<[1], [0], [0], [1], [0, 0, 1, 1], [], []>} : vector<4x32xbf16>, vector<32x96xbf16>, vector<4x96xf32> -> vector<4x96xf32>
    %c0_23 = arith.constant 0 : index
    %c0_24 = arith.constant 0 : index
    %c0_25 = arith.constant 0 : index
    %39 = vector.load %arg9[%c0_23, %c0_24, %c0_25] : memref<2x1x96xf32, #tpu.memory_space<vmem>>, vector<1x1x96xf32>
    %40 = vector.shape_cast %39 : vector<1x1x96xf32> to vector<1x96xf32>
    %41 = vector.broadcast %40 : vector<1x96xf32> to vector<4x96xf32>
    %42 = arith.addf %38, %41 : vector<4x96xf32>
    %43 = vector.extract_strided_slice %42 {offsets = [0, 0], sizes = [4, 16], strides = [1, 1]} : vector<4x96xf32> to vector<4x16xf32>
    %44 = vector.extract_strided_slice %42 {offsets = [0, 32], sizes = [4, 16], strides = [1, 1]} : vector<4x96xf32> to vector<4x16xf32>
    %45 = vector.extract_strided_slice %42 {offsets = [0, 64], sizes = [4, 16], strides = [1, 1]} : vector<4x96xf32> to vector<4x16xf32>
    %46 = arith.truncf %43 : vector<4x16xf32> to vector<4x16xbf16>
    %47 = arith.truncf %44 : vector<4x16xf32> to vector<4x16xbf16>
    %cst_26 = arith.constant dense<0.000000e+00> : vector<4x4xf32>
    %48 = tpu.matmul %46, %47, %cst_26 {dimension_numbers = #tpu.dot_dimension_numbers<[1], [1], [0], [0], [0, 0, 1, 0], [], []>} : vector<4x16xbf16>, vector<4x16xbf16>, vector<4x4xf32> -> vector<4x4xf32>
    %cst_27 = arith.constant 2.500000e-01 : f32
    %49 = vector.broadcast %cst_27 : f32 to vector<4x4xf32>
    %50 = arith.mulf %48, %49 : vector<4x4xf32>
    %cst_28 = arith.constant dense<0xFF800000> : vector<4xf32>
    %51 = vector.multi_reduction <maximumf>, %50, %cst_28 [1] : vector<4x4xf32> to vector<4xf32>
    %52 = vector.shape_cast %51 : vector<4xf32> to vector<4x1xf32>
    %53 = vector.broadcast %52 : vector<4x1xf32> to vector<4x4xf32>
    %54 = arith.subf %50, %53 : vector<4x4xf32>
    %55 = math.exp %54 : vector<4x4xf32>
    %cst_29 = arith.constant dense<0.000000e+00> : vector<4xf32>
    %56 = vector.multi_reduction <add>, %55, %cst_29 [1] : vector<4x4xf32> to vector<4xf32>
    %57 = vector.shape_cast %56 : vector<4xf32> to vector<4x1xf32>
    %58 = arith.truncf %55 : vector<4x4xf32> to vector<4x4xbf16>
    %59 = arith.truncf %45 : vector<4x16xf32> to vector<4x16xbf16>
    %cst_30 = arith.constant dense<0.000000e+00> : vector<4x16xf32>
    %60 = tpu.matmul %58, %59, %cst_30 {dimension_numbers = #tpu.dot_dimension_numbers<[1], [0], [0], [1], [0, 0, 1, 1], [], []>} : vector<4x4xbf16>, vector<4x16xbf16>, vector<4x16xf32> -> vector<4x16xf32>
    %61 = tpu.reciprocal %57 {approx = true} : vector<4x1xf32> -> vector<4x1xf32>
    %62 = vector.broadcast %61 : vector<4x1xf32> to vector<4x16xf32>
    %63 = arith.mulf %60, %62 : vector<4x16xf32>
    %64 = vector.extract_strided_slice %42 {offsets = [0, 16], sizes = [4, 16], strides = [1, 1]} : vector<4x96xf32> to vector<4x16xf32>
    %65 = vector.extract_strided_slice %42 {offsets = [0, 48], sizes = [4, 16], strides = [1, 1]} : vector<4x96xf32> to vector<4x16xf32>
    %66 = vector.extract_strided_slice %42 {offsets = [0, 80], sizes = [4, 16], strides = [1, 1]} : vector<4x96xf32> to vector<4x16xf32>
    %67 = arith.truncf %64 : vector<4x16xf32> to vector<4x16xbf16>
    %68 = arith.truncf %65 : vector<4x16xf32> to vector<4x16xbf16>
    %cst_31 = arith.constant dense<0.000000e+00> : vector<4x4xf32>
    %69 = tpu.matmul %67, %68, %cst_31 {dimension_numbers = #tpu.dot_dimension_numbers<[1], [1], [0], [0], [0, 0, 1, 0], [], []>} : vector<4x16xbf16>, vector<4x16xbf16>, vector<4x4xf32> -> vector<4x4xf32>
    %cst_32 = arith.constant 2.500000e-01 : f32
    %70 = vector.broadcast %cst_32 : f32 to vector<4x4xf32>
    %71 = arith.mulf %69, %70 : vector<4x4xf32>
    %cst_33 = arith.constant dense<0xFF800000> : vector<4xf32>
    %72 = vector.multi_reduction <maximumf>, %71, %cst_33 [1] : vector<4x4xf32> to vector<4xf32>
    %73 = vector.shape_cast %72 : vector<4xf32> to vector<4x1xf32>
    %74 = vector.broadcast %73 : vector<4x1xf32> to vector<4x4xf32>
    %75 = arith.subf %71, %74 : vector<4x4xf32>
    %76 = math.exp %75 : vector<4x4xf32>
    %cst_34 = arith.constant dense<0.000000e+00> : vector<4xf32>
    %77 = vector.multi_reduction <add>, %76, %cst_34 [1] : vector<4x4xf32> to vector<4xf32>
    %78 = vector.shape_cast %77 : vector<4xf32> to vector<4x1xf32>
    %79 = arith.truncf %76 : vector<4x4xf32> to vector<4x4xbf16>
    %80 = arith.truncf %66 : vector<4x16xf32> to vector<4x16xbf16>
    %cst_35 = arith.constant dense<0.000000e+00> : vector<4x16xf32>
    %81 = tpu.matmul %79, %80, %cst_35 {dimension_numbers = #tpu.dot_dimension_numbers<[1], [0], [0], [1], [0, 0, 1, 1], [], []>} : vector<4x4xbf16>, vector<4x16xbf16>, vector<4x16xf32> -> vector<4x16xf32>
    %82 = tpu.reciprocal %78 {approx = true} : vector<4x1xf32> -> vector<4x1xf32>
    %83 = vector.broadcast %82 : vector<4x1xf32> to vector<4x16xf32>
    %84 = arith.mulf %81, %83 : vector<4x16xf32>
    %85 = tpu.concatenate %63, %84 in 1 : vector<4x16xf32>, vector<4x16xf32> -> vector<4x32xf32>
    %c0_36 = arith.constant 0 : index
    %c0_37 = arith.constant 0 : index
    %c0_38 = arith.constant 0 : index
    %86 = vector.load %arg10[%c0_36, %c0_37, %c0_38] : memref<2x32x32xbf16, #tpu.memory_space<vmem>>, vector<1x32x32xbf16>
    %87 = vector.shape_cast %86 : vector<1x32x32xbf16> to vector<32x32xbf16>
    %88 = arith.truncf %85 : vector<4x32xf32> to vector<4x32xbf16>
    %cst_39 = arith.constant dense<0.000000e+00> : vector<4x32xf32>
    %89 = tpu.matmul %88, %87, %cst_39 {dimension_numbers = #tpu.dot_dimension_numbers<[1], [0], [0], [1], [0, 0, 1, 1], [], []>} : vector<4x32xbf16>, vector<32x32xbf16>, vector<4x32xf32> -> vector<4x32xf32>
    %90 = arith.addf %8, %89 : vector<4x32xf32>
    %c0_40 = arith.constant 0 : index
    %c0_41 = arith.constant 0 : index
    %c0_42 = arith.constant 0 : index
    %91 = vector.load %arg11[%c0_40, %c0_41, %c0_42] : memref<2x1x32xf32, #tpu.memory_space<vmem>>, vector<1x1x32xf32>
    %92 = vector.shape_cast %91 : vector<1x1x32xf32> to vector<1x32xf32>
    %93 = vector.broadcast %92 : vector<1x32xf32> to vector<4x32xf32>
    %94 = arith.addf %90, %93 : vector<4x32xf32>
    %c0_43 = arith.constant 0 : index
    %c0_44 = arith.constant 0 : index
    %c0_45 = arith.constant 0 : index
    %95 = vector.load %arg12[%c0_43, %c0_44, %c0_45] : memref<2x1x32xf32, #tpu.memory_space<vmem>>, vector<1x1x32xf32>
    %96 = vector.shape_cast %95 : vector<1x1x32xf32> to vector<1x32xf32>
    %c0_46 = arith.constant 0 : index
    %c0_47 = arith.constant 0 : index
    %c0_48 = arith.constant 0 : index
    %97 = vector.load %arg13[%c0_46, %c0_47, %c0_48] : memref<2x1x32xf32, #tpu.memory_space<vmem>>, vector<1x1x32xf32>
    %98 = vector.shape_cast %97 : vector<1x1x32xf32> to vector<1x32xf32>
    %cst_49 = arith.constant dense<0.000000e+00> : vector<4xf32>
    %99 = vector.multi_reduction <add>, %94, %cst_49 [1] : vector<4x32xf32> to vector<4xf32>
    %100 = vector.shape_cast %99 : vector<4xf32> to vector<4x1xf32>
    %cst_50 = arith.constant 3.200000e+01 : f32
    %101 = vector.broadcast %cst_50 : f32 to vector<4x1xf32>
    %102 = arith.divf %100, %101 : vector<4x1xf32>
    %103 = vector.broadcast %102 : vector<4x1xf32> to vector<4x32xf32>
    %104 = arith.subf %94, %103 : vector<4x32xf32>
    %105 = arith.mulf %104, %104 : vector<4x32xf32>
    %cst_51 = arith.constant dense<0.000000e+00> : vector<4xf32>
    %106 = vector.multi_reduction <add>, %105, %cst_51 [1] : vector<4x32xf32> to vector<4xf32>
    %107 = vector.shape_cast %106 : vector<4xf32> to vector<4x1xf32>
    %cst_52 = arith.constant 3.200000e+01 : f32
    %108 = vector.broadcast %cst_52 : f32 to vector<4x1xf32>
    %109 = arith.divf %107, %108 : vector<4x1xf32>
    %110 = vector.broadcast %102 : vector<4x1xf32> to vector<4x32xf32>
    %111 = arith.subf %94, %110 : vector<4x32xf32>
    %cst_53 = arith.constant 9.99999997E-7 : f32
    %112 = vector.broadcast %cst_53 : f32 to vector<4x1xf32>
    %113 = arith.addf %109, %112 : vector<4x1xf32>
    %114 = math.rsqrt %113 : vector<4x1xf32>
    %115 = vector.broadcast %114 : vector<4x1xf32> to vector<4x32xf32>
    %116 = arith.mulf %111, %115 : vector<4x32xf32>
    %117 = vector.broadcast %96 : vector<1x32xf32> to vector<4x32xf32>
    %118 = arith.mulf %116, %117 : vector<4x32xf32>
    %119 = vector.broadcast %98 : vector<1x32xf32> to vector<4x32xf32>
    %120 = arith.addf %118, %119 : vector<4x32xf32>
    %c0_54 = arith.constant 0 : index
    %c0_55 = arith.constant 0 : index
    %c0_56 = arith.constant 0 : index
    %121 = vector.load %arg14[%c0_54, %c0_55, %c0_56] : memref<2x32x128xbf16, #tpu.memory_space<vmem>>, vector<1x32x128xbf16>
    %122 = vector.shape_cast %121 : vector<1x32x128xbf16> to vector<32x128xbf16>
    %123 = arith.truncf %120 : vector<4x32xf32> to vector<4x32xbf16>
    %cst_57 = arith.constant dense<0.000000e+00> : vector<4x128xf32>
    %124 = tpu.matmul %123, %122, %cst_57 {dimension_numbers = #tpu.dot_dimension_numbers<[1], [0], [0], [1], [0, 0, 1, 1], [], []>} : vector<4x32xbf16>, vector<32x128xbf16>, vector<4x128xf32> -> vector<4x128xf32>
    %c0_58 = arith.constant 0 : index
    %c0_59 = arith.constant 0 : index
    %c0_60 = arith.constant 0 : index
    %125 = vector.load %arg15[%c0_58, %c0_59, %c0_60] : memref<2x1x128xf32, #tpu.memory_space<vmem>>, vector<1x1x128xf32>
    %126 = vector.shape_cast %125 : vector<1x1x128xf32> to vector<1x128xf32>
    %127 = vector.broadcast %126 : vector<1x128xf32> to vector<4x128xf32>
    %128 = arith.addf %124, %127 : vector<4x128xf32>
    %129 = arith.mulf %128, %128 : vector<4x128xf32>
    %130 = arith.mulf %128, %129 : vector<4x128xf32>
    %cst_61 = arith.constant 4.471500e-02 : f32
    %131 = vector.broadcast %cst_61 : f32 to vector<4x128xf32>
    %132 = arith.mulf %131, %130 : vector<4x128xf32>
    %133 = arith.addf %128, %132 : vector<4x128xf32>
    %cst_62 = arith.constant 0.797884583 : f32
    %134 = vector.broadcast %cst_62 : f32 to vector<4x128xf32>
    %135 = arith.mulf %134, %133 : vector<4x128xf32>
    %136 = math.tanh %135 : vector<4x128xf32>
    %cst_63 = arith.constant 1.000000e+00 : f32
    %137 = vector.broadcast %cst_63 : f32 to vector<4x128xf32>
    %138 = arith.addf %137, %136 : vector<4x128xf32>
    %cst_64 = arith.constant 5.000000e-01 : f32
    %139 = vector.broadcast %cst_64 : f32 to vector<4x128xf32>
    %140 = arith.mulf %139, %138 : vector<4x128xf32>
    %141 = arith.mulf %128, %140 : vector<4x128xf32>
    %c0_65 = arith.constant 0 : index
    %c0_66 = arith.constant 0 : index
    %c0_67 = arith.constant 0 : index
    %142 = vector.load %arg16[%c0_65, %c0_66, %c0_67] : memref<2x128x32xbf16, #tpu.memory_space<vmem>>, vector<1x128x32xbf16>
    %143 = vector.shape_cast %142 : vector<1x128x32xbf16> to vector<128x32xbf16>
    %144 = arith.truncf %141 : vector<4x128xf32> to vector<4x128xbf16>
    %cst_68 = arith.constant dense<0.000000e+00> : vector<4x32xf32>
    %145 = tpu.matmul %144, %143, %cst_68 {dimension_numbers = #tpu.dot_dimension_numbers<[1], [0], [0], [1], [0, 0, 1, 1], [], []>} : vector<4x128xbf16>, vector<128x32xbf16>, vector<4x32xf32> -> vector<4x32xf32>
    %146 = arith.addf %94, %145 : vector<4x32xf32>
    %c0_69 = arith.constant 0 : index
    %c0_70 = arith.constant 0 : index
    %c0_71 = arith.constant 0 : index
    %147 = vector.load %arg17[%c0_69, %c0_70, %c0_71] : memref<2x1x32xf32, #tpu.memory_space<vmem>>, vector<1x1x32xf32>
    %148 = vector.shape_cast %147 : vector<1x1x32xf32> to vector<1x32xf32>
    %149 = vector.broadcast %148 : vector<1x32xf32> to vector<4x32xf32>
    %150 = arith.addf %146, %149 : vector<4x32xf32>
    %c1 = arith.constant 1 : index
    %c0_72 = arith.constant 0 : index
    %c0_73 = arith.constant 0 : index
    %151 = vector.load %arg6[%c1, %c0_72, %c0_73] : memref<2x1x32xf32, #tpu.memory_space<vmem>>, vector<1x1x32xf32>
    %152 = vector.shape_cast %151 : vector<1x1x32xf32> to vector<1x32xf32>
    %c1_74 = arith.constant 1 : index
    %c0_75 = arith.constant 0 : index
    %c0_76 = arith.constant 0 : index
    %153 = vector.load %arg7[%c1_74, %c0_75, %c0_76] : memref<2x1x32xf32, #tpu.memory_space<vmem>>, vector<1x1x32xf32>
    %154 = vector.shape_cast %153 : vector<1x1x32xf32> to vector<1x32xf32>
    %cst_77 = arith.constant dense<0.000000e+00> : vector<4xf32>
    %155 = vector.multi_reduction <add>, %150, %cst_77 [1] : vector<4x32xf32> to vector<4xf32>
    %156 = vector.shape_cast %155 : vector<4xf32> to vector<4x1xf32>
    %cst_78 = arith.constant 3.200000e+01 : f32
    %157 = vector.broadcast %cst_78 : f32 to vector<4x1xf32>
    %158 = arith.divf %156, %157 : vector<4x1xf32>
    %159 = vector.broadcast %158 : vector<4x1xf32> to vector<4x32xf32>
    %160 = arith.subf %150, %159 : vector<4x32xf32>
    %161 = arith.mulf %160, %160 : vector<4x32xf32>
    %cst_79 = arith.constant dense<0.000000e+00> : vector<4xf32>
    %162 = vector.multi_reduction <add>, %161, %cst_79 [1] : vector<4x32xf32> to vector<4xf32>
    %163 = vector.shape_cast %162 : vector<4xf32> to vector<4x1xf32>
    %cst_80 = arith.constant 3.200000e+01 : f32
    %164 = vector.broadcast %cst_80 : f32 to vector<4x1xf32>
    %165 = arith.divf %163, %164 : vector<4x1xf32>
    %166 = vector.broadcast %158 : vector<4x1xf32> to vector<4x32xf32>
    %167 = arith.subf %150, %166 : vector<4x32xf32>
    %cst_81 = arith.constant 9.99999997E-7 : f32
    %168 = vector.broadcast %cst_81 : f32 to vector<4x1xf32>
    %169 = arith.addf %165, %168 : vector<4x1xf32>
    %170 = math.rsqrt %169 : vector<4x1xf32>
    %171 = vector.broadcast %170 : vector<4x1xf32> to vector<4x32xf32>
    %172 = arith.mulf %167, %171 : vector<4x32xf32>
    %173 = vector.broadcast %152 : vector<1x32xf32> to vector<4x32xf32>
    %174 = arith.mulf %172, %173 : vector<4x32xf32>
    %175 = vector.broadcast %154 : vector<1x32xf32> to vector<4x32xf32>
    %176 = arith.addf %174, %175 : vector<4x32xf32>
    %c1_82 = arith.constant 1 : index
    %c0_83 = arith.constant 0 : index
    %c0_84 = arith.constant 0 : index
    %177 = vector.load %arg8[%c1_82, %c0_83, %c0_84] : memref<2x32x96xbf16, #tpu.memory_space<vmem>>, vector<1x32x96xbf16>
    %178 = vector.shape_cast %177 : vector<1x32x96xbf16> to vector<32x96xbf16>
    %179 = arith.truncf %176 : vector<4x32xf32> to vector<4x32xbf16>
    %cst_85 = arith.constant dense<0.000000e+00> : vector<4x96xf32>
    %180 = tpu.matmul %179, %178, %cst_85 {dimension_numbers = #tpu.dot_dimension_numbers<[1], [0], [0], [1], [0, 0, 1, 1], [], []>} : vector<4x32xbf16>, vector<32x96xbf16>, vector<4x96xf32> -> vector<4x96xf32>
    %c1_86 = arith.constant 1 : index
    %c0_87 = arith.constant 0 : index
    %c0_88 = arith.constant 0 : index
    %181 = vector.load %arg9[%c1_86, %c0_87, %c0_88] : memref<2x1x96xf32, #tpu.memory_space<vmem>>, vector<1x1x96xf32>
    %182 = vector.shape_cast %181 : vector<1x1x96xf32> to vector<1x96xf32>
    %183 = vector.broadcast %182 : vector<1x96xf32> to vector<4x96xf32>
    %184 = arith.addf %180, %183 : vector<4x96xf32>
    %185 = vector.extract_strided_slice %184 {offsets = [0, 0], sizes = [4, 16], strides = [1, 1]} : vector<4x96xf32> to vector<4x16xf32>
    %186 = vector.extract_strided_slice %184 {offsets = [0, 32], sizes = [4, 16], strides = [1, 1]} : vector<4x96xf32> to vector<4x16xf32>
    %187 = vector.extract_strided_slice %184 {offsets = [0, 64], sizes = [4, 16], strides = [1, 1]} : vector<4x96xf32> to vector<4x16xf32>
    %188 = arith.truncf %185 : vector<4x16xf32> to vector<4x16xbf16>
    %189 = arith.truncf %186 : vector<4x16xf32> to vector<4x16xbf16>
    %cst_89 = arith.constant dense<0.000000e+00> : vector<4x4xf32>
    %190 = tpu.matmul %188, %189, %cst_89 {dimension_numbers = #tpu.dot_dimension_numbers<[1], [1], [0], [0], [0, 0, 1, 0], [], []>} : vector<4x16xbf16>, vector<4x16xbf16>, vector<4x4xf32> -> vector<4x4xf32>
    %cst_90 = arith.constant 2.500000e-01 : f32
    %191 = vector.broadcast %cst_90 : f32 to vector<4x4xf32>
    %192 = arith.mulf %190, %191 : vector<4x4xf32>
    %cst_91 = arith.constant dense<0xFF800000> : vector<4xf32>
    %193 = vector.multi_reduction <maximumf>, %192, %cst_91 [1] : vector<4x4xf32> to vector<4xf32>
    %194 = vector.shape_cast %193 : vector<4xf32> to vector<4x1xf32>
    %195 = vector.broadcast %194 : vector<4x1xf32> to vector<4x4xf32>
    %196 = arith.subf %192, %195 : vector<4x4xf32>
    %197 = math.exp %196 : vector<4x4xf32>
    %cst_92 = arith.constant dense<0.000000e+00> : vector<4xf32>
    %198 = vector.multi_reduction <add>, %197, %cst_92 [1] : vector<4x4xf32> to vector<4xf32>
    %199 = vector.shape_cast %198 : vector<4xf32> to vector<4x1xf32>
    %200 = arith.truncf %197 : vector<4x4xf32> to vector<4x4xbf16>
    %201 = arith.truncf %187 : vector<4x16xf32> to vector<4x16xbf16>
    %cst_93 = arith.constant dense<0.000000e+00> : vector<4x16xf32>
    %202 = tpu.matmul %200, %201, %cst_93 {dimension_numbers = #tpu.dot_dimension_numbers<[1], [0], [0], [1], [0, 0, 1, 1], [], []>} : vector<4x4xbf16>, vector<4x16xbf16>, vector<4x16xf32> -> vector<4x16xf32>
    %203 = tpu.reciprocal %199 {approx = true} : vector<4x1xf32> -> vector<4x1xf32>
    %204 = vector.broadcast %203 : vector<4x1xf32> to vector<4x16xf32>
    %205 = arith.mulf %202, %204 : vector<4x16xf32>
    %206 = vector.extract_strided_slice %184 {offsets = [0, 16], sizes = [4, 16], strides = [1, 1]} : vector<4x96xf32> to vector<4x16xf32>
    %207 = vector.extract_strided_slice %184 {offsets = [0, 48], sizes = [4, 16], strides = [1, 1]} : vector<4x96xf32> to vector<4x16xf32>
    %208 = vector.extract_strided_slice %184 {offsets = [0, 80], sizes = [4, 16], strides = [1, 1]} : vector<4x96xf32> to vector<4x16xf32>
    %209 = arith.truncf %206 : vector<4x16xf32> to vector<4x16xbf16>
    %210 = arith.truncf %207 : vector<4x16xf32> to vector<4x16xbf16>
    %cst_94 = arith.constant dense<0.000000e+00> : vector<4x4xf32>
    %211 = tpu.matmul %209, %210, %cst_94 {dimension_numbers = #tpu.dot_dimension_numbers<[1], [1], [0], [0], [0, 0, 1, 0], [], []>} : vector<4x16xbf16>, vector<4x16xbf16>, vector<4x4xf32> -> vector<4x4xf32>
    %cst_95 = arith.constant 2.500000e-01 : f32
    %212 = vector.broadcast %cst_95 : f32 to vector<4x4xf32>
    %213 = arith.mulf %211, %212 : vector<4x4xf32>
    %cst_96 = arith.constant dense<0xFF800000> : vector<4xf32>
    %214 = vector.multi_reduction <maximumf>, %213, %cst_96 [1] : vector<4x4xf32> to vector<4xf32>
    %215 = vector.shape_cast %214 : vector<4xf32> to vector<4x1xf32>
    %216 = vector.broadcast %215 : vector<4x1xf32> to vector<4x4xf32>
    %217 = arith.subf %213, %216 : vector<4x4xf32>
    %218 = math.exp %217 : vector<4x4xf32>
    %cst_97 = arith.constant dense<0.000000e+00> : vector<4xf32>
    %219 = vector.multi_reduction <add>, %218, %cst_97 [1] : vector<4x4xf32> to vector<4xf32>
    %220 = vector.shape_cast %219 : vector<4xf32> to vector<4x1xf32>
    %221 = arith.truncf %218 : vector<4x4xf32> to vector<4x4xbf16>
    %222 = arith.truncf %208 : vector<4x16xf32> to vector<4x16xbf16>
    %cst_98 = arith.constant dense<0.000000e+00> : vector<4x16xf32>
    %223 = tpu.matmul %221, %222, %cst_98 {dimension_numbers = #tpu.dot_dimension_numbers<[1], [0], [0], [1], [0, 0, 1, 1], [], []>} : vector<4x4xbf16>, vector<4x16xbf16>, vector<4x16xf32> -> vector<4x16xf32>
    %224 = tpu.reciprocal %220 {approx = true} : vector<4x1xf32> -> vector<4x1xf32>
    %225 = vector.broadcast %224 : vector<4x1xf32> to vector<4x16xf32>
    %226 = arith.mulf %223, %225 : vector<4x16xf32>
    %227 = tpu.concatenate %205, %226 in 1 : vector<4x16xf32>, vector<4x16xf32> -> vector<4x32xf32>
    %c1_99 = arith.constant 1 : index
    %c0_100 = arith.constant 0 : index
    %c0_101 = arith.constant 0 : index
    %228 = vector.load %arg10[%c1_99, %c0_100, %c0_101] : memref<2x32x32xbf16, #tpu.memory_space<vmem>>, vector<1x32x32xbf16>
    %229 = vector.shape_cast %228 : vector<1x32x32xbf16> to vector<32x32xbf16>
    %230 = arith.truncf %227 : vector<4x32xf32> to vector<4x32xbf16>
    %cst_102 = arith.constant dense<0.000000e+00> : vector<4x32xf32>
    %231 = tpu.matmul %230, %229, %cst_102 {dimension_numbers = #tpu.dot_dimension_numbers<[1], [0], [0], [1], [0, 0, 1, 1], [], []>} : vector<4x32xbf16>, vector<32x32xbf16>, vector<4x32xf32> -> vector<4x32xf32>
    %232 = arith.addf %150, %231 : vector<4x32xf32>
    %c1_103 = arith.constant 1 : index
    %c0_104 = arith.constant 0 : index
    %c0_105 = arith.constant 0 : index
    %233 = vector.load %arg11[%c1_103, %c0_104, %c0_105] : memref<2x1x32xf32, #tpu.memory_space<vmem>>, vector<1x1x32xf32>
    %234 = vector.shape_cast %233 : vector<1x1x32xf32> to vector<1x32xf32>
    %235 = vector.broadcast %234 : vector<1x32xf32> to vector<4x32xf32>
    %236 = arith.addf %232, %235 : vector<4x32xf32>
    %c1_106 = arith.constant 1 : index
    %c0_107 = arith.constant 0 : index
    %c0_108 = arith.constant 0 : index
    %237 = vector.load %arg12[%c1_106, %c0_107, %c0_108] : memref<2x1x32xf32, #tpu.memory_space<vmem>>, vector<1x1x32xf32>
    %238 = vector.shape_cast %237 : vector<1x1x32xf32> to vector<1x32xf32>
    %c1_109 = arith.constant 1 : index
    %c0_110 = arith.constant 0 : index
    %c0_111 = arith.constant 0 : index
    %239 = vector.load %arg13[%c1_109, %c0_110, %c0_111] : memref<2x1x32xf32, #tpu.memory_space<vmem>>, vector<1x1x32xf32>
    %240 = vector.shape_cast %239 : vector<1x1x32xf32> to vector<1x32xf32>
    %cst_112 = arith.constant dense<0.000000e+00> : vector<4xf32>
    %241 = vector.multi_reduction <add>, %236, %cst_112 [1] : vector<4x32xf32> to vector<4xf32>
    %242 = vector.shape_cast %241 : vector<4xf32> to vector<4x1xf32>
    %cst_113 = arith.constant 3.200000e+01 : f32
    %243 = vector.broadcast %cst_113 : f32 to vector<4x1xf32>
    %244 = arith.divf %242, %243 : vector<4x1xf32>
    %245 = vector.broadcast %244 : vector<4x1xf32> to vector<4x32xf32>
    %246 = arith.subf %236, %245 : vector<4x32xf32>
    %247 = arith.mulf %246, %246 : vector<4x32xf32>
    %cst_114 = arith.constant dense<0.000000e+00> : vector<4xf32>
    %248 = vector.multi_reduction <add>, %247, %cst_114 [1] : vector<4x32xf32> to vector<4xf32>
    %249 = vector.shape_cast %248 : vector<4xf32> to vector<4x1xf32>
    %cst_115 = arith.constant 3.200000e+01 : f32
    %250 = vector.broadcast %cst_115 : f32 to vector<4x1xf32>
    %251 = arith.divf %249, %250 : vector<4x1xf32>
    %252 = vector.broadcast %244 : vector<4x1xf32> to vector<4x32xf32>
    %253 = arith.subf %236, %252 : vector<4x32xf32>
    %cst_116 = arith.constant 9.99999997E-7 : f32
    %254 = vector.broadcast %cst_116 : f32 to vector<4x1xf32>
    %255 = arith.addf %251, %254 : vector<4x1xf32>
    %256 = math.rsqrt %255 : vector<4x1xf32>
    %257 = vector.broadcast %256 : vector<4x1xf32> to vector<4x32xf32>
    %258 = arith.mulf %253, %257 : vector<4x32xf32>
    %259 = vector.broadcast %238 : vector<1x32xf32> to vector<4x32xf32>
    %260 = arith.mulf %258, %259 : vector<4x32xf32>
    %261 = vector.broadcast %240 : vector<1x32xf32> to vector<4x32xf32>
    %262 = arith.addf %260, %261 : vector<4x32xf32>
    %c1_117 = arith.constant 1 : index
    %c0_118 = arith.constant 0 : index
    %c0_119 = arith.constant 0 : index
    %263 = vector.load %arg14[%c1_117, %c0_118, %c0_119] : memref<2x32x128xbf16, #tpu.memory_space<vmem>>, vector<1x32x128xbf16>
    %264 = vector.shape_cast %263 : vector<1x32x128xbf16> to vector<32x128xbf16>
    %265 = arith.truncf %262 : vector<4x32xf32> to vector<4x32xbf16>
    %cst_120 = arith.constant dense<0.000000e+00> : vector<4x128xf32>
    %266 = tpu.matmul %265, %264, %cst_120 {dimension_numbers = #tpu.dot_dimension_numbers<[1], [0], [0], [1], [0, 0, 1, 1], [], []>} : vector<4x32xbf16>, vector<32x128xbf16>, vector<4x128xf32> -> vector<4x128xf32>
    %c1_121 = arith.constant 1 : index
    %c0_122 = arith.constant 0 : index
    %c0_123 = arith.constant 0 : index
    %267 = vector.load %arg15[%c1_121, %c0_122, %c0_123] : memref<2x1x128xf32, #tpu.memory_space<vmem>>, vector<1x1x128xf32>
    %268 = vector.shape_cast %267 : vector<1x1x128xf32> to vector<1x128xf32>
    %269 = vector.broadcast %268 : vector<1x128xf32> to vector<4x128xf32>
    %270 = arith.addf %266, %269 : vector<4x128xf32>
    %271 = arith.mulf %270, %270 : vector<4x128xf32>
    %272 = arith.mulf %270, %271 : vector<4x128xf32>
    %cst_124 = arith.constant 4.471500e-02 : f32
    %273 = vector.broadcast %cst_124 : f32 to vector<4x128xf32>
    %274 = arith.mulf %273, %272 : vector<4x128xf32>
    %275 = arith.addf %270, %274 : vector<4x128xf32>
    %cst_125 = arith.constant 0.797884583 : f32
    %276 = vector.broadcast %cst_125 : f32 to vector<4x128xf32>
    %277 = arith.mulf %276, %275 : vector<4x128xf32>
    %278 = math.tanh %277 : vector<4x128xf32>
    %cst_126 = arith.constant 1.000000e+00 : f32
    %279 = vector.broadcast %cst_126 : f32 to vector<4x128xf32>
    %280 = arith.addf %279, %278 : vector<4x128xf32>
    %cst_127 = arith.constant 5.000000e-01 : f32
    %281 = vector.broadcast %cst_127 : f32 to vector<4x128xf32>
    %282 = arith.mulf %281, %280 : vector<4x128xf32>
    %283 = arith.mulf %270, %282 : vector<4x128xf32>
    %c1_128 = arith.constant 1 : index
    %c0_129 = arith.constant 0 : index
    %c0_130 = arith.constant 0 : index
    %284 = vector.load %arg16[%c1_128, %c0_129, %c0_130] : memref<2x128x32xbf16, #tpu.memory_space<vmem>>, vector<1x128x32xbf16>
    %285 = vector.shape_cast %284 : vector<1x128x32xbf16> to vector<128x32xbf16>
    %286 = arith.truncf %283 : vector<4x128xf32> to vector<4x128xbf16>
    %cst_131 = arith.constant dense<0.000000e+00> : vector<4x32xf32>
    %287 = tpu.matmul %286, %285, %cst_131 {dimension_numbers = #tpu.dot_dimension_numbers<[1], [0], [0], [1], [0, 0, 1, 1], [], []>} : vector<4x128xbf16>, vector<128x32xbf16>, vector<4x32xf32> -> vector<4x32xf32>
    %288 = arith.addf %236, %287 : vector<4x32xf32>
    %c1_132 = arith.constant 1 : index
    %c0_133 = arith.constant 0 : index
    %c0_134 = arith.constant 0 : index
    %289 = vector.load %arg17[%c1_132, %c0_133, %c0_134] : memref<2x1x32xf32, #tpu.memory_space<vmem>>, vector<1x1x32xf32>
    %290 = vector.shape_cast %289 : vector<1x1x32xf32> to vector<1x32xf32>
    %291 = vector.broadcast %290 : vector<1x32xf32> to vector<4x32xf32>
    %292 = arith.addf %288, %291 : vector<4x32xf32>
    %c0_135 = arith.constant 0 : index
    %c0_136 = arith.constant 0 : index
    %293 = vector.load %arg18[%c0_135, %c0_136] : memref<1x32xf32, #tpu.memory_space<vmem>>, vector<1x32xf32>
    %c0_137 = arith.constant 0 : index
    %c0_138 = arith.constant 0 : index
    %294 = vector.load %arg19[%c0_137, %c0_138] : memref<1x32xf32, #tpu.memory_space<vmem>>, vector<1x32xf32>
    %cst_139 = arith.constant dense<0.000000e+00> : vector<4xf32>
    %295 = vector.multi_reduction <add>, %292, %cst_139 [1] : vector<4x32xf32> to vector<4xf32>
    %296 = vector.shape_cast %295 : vector<4xf32> to vector<4x1xf32>
    %cst_140 = arith.constant 3.200000e+01 : f32
    %297 = vector.broadcast %cst_140 : f32 to vector<4x1xf32>
    %298 = arith.divf %296, %297 : vector<4x1xf32>
    %299 = vector.broadcast %298 : vector<4x1xf32> to vector<4x32xf32>
    %300 = arith.subf %292, %299 : vector<4x32xf32>
    %301 = arith.mulf %300, %300 : vector<4x32xf32>
    %cst_141 = arith.constant dense<0.000000e+00> : vector<4xf32>
    %302 = vector.multi_reduction <add>, %301, %cst_141 [1] : vector<4x32xf32> to vector<4xf32>
    %303 = vector.shape_cast %302 : vector<4xf32> to vector<4x1xf32>
    %cst_142 = arith.constant 3.200000e+01 : f32
    %304 = vector.broadcast %cst_142 : f32 to vector<4x1xf32>
    %305 = arith.divf %303, %304 : vector<4x1xf32>
    %306 = vector.broadcast %298 : vector<4x1xf32> to vector<4x32xf32>
    %307 = arith.subf %292, %306 : vector<4x32xf32>
    %cst_143 = arith.constant 9.99999997E-7 : f32
    %308 = vector.broadcast %cst_143 : f32 to vector<4x1xf32>
    %309 = arith.addf %305, %308 : vector<4x1xf32>
    %310 = math.rsqrt %309 : vector<4x1xf32>
    %311 = vector.broadcast %310 : vector<4x1xf32> to vector<4x32xf32>
    %312 = arith.mulf %307, %311 : vector<4x32xf32>
    %313 = vector.broadcast %293 : vector<1x32xf32> to vector<4x32xf32>
    %314 = arith.mulf %312, %313 : vector<4x32xf32>
    %315 = vector.broadcast %294 : vector<1x32xf32> to vector<4x32xf32>
    %316 = arith.addf %314, %315 : vector<4x32xf32>
    %c0_144 = arith.constant 0 : index
    %c0_145 = arith.constant 0 : index
    %c0_146 = arith.constant 0 : index
    %317 = vector.load %arg2[%c0_144, %c0_145, %c0_146] : memref<1x4x192xbf16, #tpu.memory_space<vmem>>, vector<1x4x192xbf16>
    %318 = vector.shape_cast %317 : vector<1x4x192xbf16> to vector<4x192xbf16>
    %c0_147 = arith.constant 0 : index
    %c0_148 = arith.constant 0 : index
    %319 = vector.load %arg4[%c0_147, %c0_148] : memref<192x32xbf16, #tpu.memory_space<vmem>>, vector<192x32xbf16>
    %cst_149 = arith.constant dense<0.000000e+00> : vector<4x32xf32>
    %320 = tpu.matmul %318, %319, %cst_149 {dimension_numbers = #tpu.dot_dimension_numbers<[1], [0], [0], [1], [0, 0, 1, 1], [], []>} : vector<4x192xbf16>, vector<192x32xbf16>, vector<4x32xf32> -> vector<4x32xf32>
    %c0_150 = arith.constant 0 : index
    %c0_151 = arith.constant 0 : index
    %321 = vector.load %arg5[%c0_150, %c0_151] : memref<1x32xf32, #tpu.memory_space<vmem>>, vector<1x32xf32>
    %322 = vector.broadcast %321 : vector<1x32xf32> to vector<4x32xf32>
    %323 = arith.addf %320, %322 : vector<4x32xf32>
    %c0_152 = arith.constant 0 : index
    %c0_153 = arith.constant 0 : index
    %324 = vector.load %arg3[%c0_152, %c0_153] : memref<4x32xf32, #tpu.memory_space<vmem>>, vector<4x32xf32>
    %325 = arith.addf %323, %324 : vector<4x32xf32>
    %c0_154 = arith.constant 0 : index
    %c0_155 = arith.constant 0 : index
    %c0_156 = arith.constant 0 : index
    %326 = vector.load %arg6[%c0_154, %c0_155, %c0_156] : memref<2x1x32xf32, #tpu.memory_space<vmem>>, vector<1x1x32xf32>
    %327 = vector.shape_cast %326 : vector<1x1x32xf32> to vector<1x32xf32>
    %c0_157 = arith.constant 0 : index
    %c0_158 = arith.constant 0 : index
    %c0_159 = arith.constant 0 : index
    %328 = vector.load %arg7[%c0_157, %c0_158, %c0_159] : memref<2x1x32xf32, #tpu.memory_space<vmem>>, vector<1x1x32xf32>
    %329 = vector.shape_cast %328 : vector<1x1x32xf32> to vector<1x32xf32>
    %cst_160 = arith.constant dense<0.000000e+00> : vector<4xf32>
    %330 = vector.multi_reduction <add>, %325, %cst_160 [1] : vector<4x32xf32> to vector<4xf32>
    %331 = vector.shape_cast %330 : vector<4xf32> to vector<4x1xf32>
    %cst_161 = arith.constant 3.200000e+01 : f32
    %332 = vector.broadcast %cst_161 : f32 to vector<4x1xf32>
    %333 = arith.divf %331, %332 : vector<4x1xf32>
    %334 = vector.broadcast %333 : vector<4x1xf32> to vector<4x32xf32>
    %335 = arith.subf %325, %334 : vector<4x32xf32>
    %336 = arith.mulf %335, %335 : vector<4x32xf32>
    %cst_162 = arith.constant dense<0.000000e+00> : vector<4xf32>
    %337 = vector.multi_reduction <add>, %336, %cst_162 [1] : vector<4x32xf32> to vector<4xf32>
    %338 = vector.shape_cast %337 : vector<4xf32> to vector<4x1xf32>
    %cst_163 = arith.constant 3.200000e+01 : f32
    %339 = vector.broadcast %cst_163 : f32 to vector<4x1xf32>
    %340 = arith.divf %338, %339 : vector<4x1xf32>
    %341 = vector.broadcast %333 : vector<4x1xf32> to vector<4x32xf32>
    %342 = arith.subf %325, %341 : vector<4x32xf32>
    %cst_164 = arith.constant 9.99999997E-7 : f32
    %343 = vector.broadcast %cst_164 : f32 to vector<4x1xf32>
    %344 = arith.addf %340, %343 : vector<4x1xf32>
    %345 = math.rsqrt %344 : vector<4x1xf32>
    %346 = vector.broadcast %345 : vector<4x1xf32> to vector<4x32xf32>
    %347 = arith.mulf %342, %346 : vector<4x32xf32>
    %348 = vector.broadcast %327 : vector<1x32xf32> to vector<4x32xf32>
    %349 = arith.mulf %347, %348 : vector<4x32xf32>
    %350 = vector.broadcast %329 : vector<1x32xf32> to vector<4x32xf32>
    %351 = arith.addf %349, %350 : vector<4x32xf32>
    %c0_165 = arith.constant 0 : index
    %c0_166 = arith.constant 0 : index
    %c0_167 = arith.constant 0 : index
    %352 = vector.load %arg8[%c0_165, %c0_166, %c0_167] : memref<2x32x96xbf16, #tpu.memory_space<vmem>>, vector<1x32x96xbf16>
    %353 = vector.shape_cast %352 : vector<1x32x96xbf16> to vector<32x96xbf16>
    %354 = arith.truncf %351 : vector<4x32xf32> to vector<4x32xbf16>
    %cst_168 = arith.constant dense<0.000000e+00> : vector<4x96xf32>
    %355 = tpu.matmul %354, %353, %cst_168 {dimension_numbers = #tpu.dot_dimension_numbers<[1], [0], [0], [1], [0, 0, 1, 1], [], []>} : vector<4x32xbf16>, vector<32x96xbf16>, vector<4x96xf32> -> vector<4x96xf32>
    %c0_169 = arith.constant 0 : index
    %c0_170 = arith.constant 0 : index
    %c0_171 = arith.constant 0 : index
    %356 = vector.load %arg9[%c0_169, %c0_170, %c0_171] : memref<2x1x96xf32, #tpu.memory_space<vmem>>, vector<1x1x96xf32>
    %357 = vector.shape_cast %356 : vector<1x1x96xf32> to vector<1x96xf32>
    %358 = vector.broadcast %357 : vector<1x96xf32> to vector<4x96xf32>
    %359 = arith.addf %355, %358 : vector<4x96xf32>
    %360 = vector.extract_strided_slice %359 {offsets = [0, 0], sizes = [4, 16], strides = [1, 1]} : vector<4x96xf32> to vector<4x16xf32>
    %361 = vector.extract_strided_slice %359 {offsets = [0, 32], sizes = [4, 16], strides = [1, 1]} : vector<4x96xf32> to vector<4x16xf32>
    %362 = vector.extract_strided_slice %359 {offsets = [0, 64], sizes = [4, 16], strides = [1, 1]} : vector<4x96xf32> to vector<4x16xf32>
    %363 = arith.truncf %360 : vector<4x16xf32> to vector<4x16xbf16>
    %364 = arith.truncf %361 : vector<4x16xf32> to vector<4x16xbf16>
    %cst_172 = arith.constant dense<0.000000e+00> : vector<4x4xf32>
    %365 = tpu.matmul %363, %364, %cst_172 {dimension_numbers = #tpu.dot_dimension_numbers<[1], [1], [0], [0], [0, 0, 1, 0], [], []>} : vector<4x16xbf16>, vector<4x16xbf16>, vector<4x4xf32> -> vector<4x4xf32>
    %cst_173 = arith.constant 2.500000e-01 : f32
    %366 = vector.broadcast %cst_173 : f32 to vector<4x4xf32>
    %367 = arith.mulf %365, %366 : vector<4x4xf32>
    %cst_174 = arith.constant dense<0xFF800000> : vector<4xf32>
    %368 = vector.multi_reduction <maximumf>, %367, %cst_174 [1] : vector<4x4xf32> to vector<4xf32>
    %369 = vector.shape_cast %368 : vector<4xf32> to vector<4x1xf32>
    %370 = vector.broadcast %369 : vector<4x1xf32> to vector<4x4xf32>
    %371 = arith.subf %367, %370 : vector<4x4xf32>
    %372 = math.exp %371 : vector<4x4xf32>
    %cst_175 = arith.constant dense<0.000000e+00> : vector<4xf32>
    %373 = vector.multi_reduction <add>, %372, %cst_175 [1] : vector<4x4xf32> to vector<4xf32>
    %374 = vector.shape_cast %373 : vector<4xf32> to vector<4x1xf32>
    %375 = arith.truncf %372 : vector<4x4xf32> to vector<4x4xbf16>
    %376 = arith.truncf %362 : vector<4x16xf32> to vector<4x16xbf16>
    %cst_176 = arith.constant dense<0.000000e+00> : vector<4x16xf32>
    %377 = tpu.matmul %375, %376, %cst_176 {dimension_numbers = #tpu.dot_dimension_numbers<[1], [0], [0], [1], [0, 0, 1, 1], [], []>} : vector<4x4xbf16>, vector<4x16xbf16>, vector<4x16xf32> -> vector<4x16xf32>
    %378 = tpu.reciprocal %374 {approx = true} : vector<4x1xf32> -> vector<4x1xf32>
    %379 = vector.broadcast %378 : vector<4x1xf32> to vector<4x16xf32>
    %380 = arith.mulf %377, %379 : vector<4x16xf32>
    %381 = vector.extract_strided_slice %359 {offsets = [0, 16], sizes = [4, 16], strides = [1, 1]} : vector<4x96xf32> to vector<4x16xf32>
    %382 = vector.extract_strided_slice %359 {offsets = [0, 48], sizes = [4, 16], strides = [1, 1]} : vector<4x96xf32> to vector<4x16xf32>
    %383 = vector.extract_strided_slice %359 {offsets = [0, 80], sizes = [4, 16], strides = [1, 1]} : vector<4x96xf32> to vector<4x16xf32>
    %384 = arith.truncf %381 : vector<4x16xf32> to vector<4x16xbf16>
    %385 = arith.truncf %382 : vector<4x16xf32> to vector<4x16xbf16>
    %cst_177 = arith.constant dense<0.000000e+00> : vector<4x4xf32>
    %386 = tpu.matmul %384, %385, %cst_177 {dimension_numbers = #tpu.dot_dimension_numbers<[1], [1], [0], [0], [0, 0, 1, 0], [], []>} : vector<4x16xbf16>, vector<4x16xbf16>, vector<4x4xf32> -> vector<4x4xf32>
    %cst_178 = arith.constant 2.500000e-01 : f32
    %387 = vector.broadcast %cst_178 : f32 to vector<4x4xf32>
    %388 = arith.mulf %386, %387 : vector<4x4xf32>
    %cst_179 = arith.constant dense<0xFF800000> : vector<4xf32>
    %389 = vector.multi_reduction <maximumf>, %388, %cst_179 [1] : vector<4x4xf32> to vector<4xf32>
    %390 = vector.shape_cast %389 : vector<4xf32> to vector<4x1xf32>
    %391 = vector.broadcast %390 : vector<4x1xf32> to vector<4x4xf32>
    %392 = arith.subf %388, %391 : vector<4x4xf32>
    %393 = math.exp %392 : vector<4x4xf32>
    %cst_180 = arith.constant dense<0.000000e+00> : vector<4xf32>
    %394 = vector.multi_reduction <add>, %393, %cst_180 [1] : vector<4x4xf32> to vector<4xf32>
    %395 = vector.shape_cast %394 : vector<4xf32> to vector<4x1xf32>
    %396 = arith.truncf %393 : vector<4x4xf32> to vector<4x4xbf16>
    %397 = arith.truncf %383 : vector<4x16xf32> to vector<4x16xbf16>
    %cst_181 = arith.constant dense<0.000000e+00> : vector<4x16xf32>
    %398 = tpu.matmul %396, %397, %cst_181 {dimension_numbers = #tpu.dot_dimension_numbers<[1], [0], [0], [1], [0, 0, 1, 1], [], []>} : vector<4x4xbf16>, vector<4x16xbf16>, vector<4x16xf32> -> vector<4x16xf32>
    %399 = tpu.reciprocal %395 {approx = true} : vector<4x1xf32> -> vector<4x1xf32>
    %400 = vector.broadcast %399 : vector<4x1xf32> to vector<4x16xf32>
    %401 = arith.mulf %398, %400 : vector<4x16xf32>
    %402 = tpu.concatenate %380, %401 in 1 : vector<4x16xf32>, vector<4x16xf32> -> vector<4x32xf32>
    %c0_182 = arith.constant 0 : index
    %c0_183 = arith.constant 0 : index
    %c0_184 = arith.constant 0 : index
    %403 = vector.load %arg10[%c0_182, %c0_183, %c0_184] : memref<2x32x32xbf16, #tpu.memory_space<vmem>>, vector<1x32x32xbf16>
    %404 = vector.shape_cast %403 : vector<1x32x32xbf16> to vector<32x32xbf16>
    %405 = arith.truncf %402 : vector<4x32xf32> to vector<4x32xbf16>
    %cst_185 = arith.constant dense<0.000000e+00> : vector<4x32xf32>
    %406 = tpu.matmul %405, %404, %cst_185 {dimension_numbers = #tpu.dot_dimension_numbers<[1], [0], [0], [1], [0, 0, 1, 1], [], []>} : vector<4x32xbf16>, vector<32x32xbf16>, vector<4x32xf32> -> vector<4x32xf32>
    %407 = arith.addf %325, %406 : vector<4x32xf32>
    %c0_186 = arith.constant 0 : index
    %c0_187 = arith.constant 0 : index
    %c0_188 = arith.constant 0 : index
    %408 = vector.load %arg11[%c0_186, %c0_187, %c0_188] : memref<2x1x32xf32, #tpu.memory_space<vmem>>, vector<1x1x32xf32>
    %409 = vector.shape_cast %408 : vector<1x1x32xf32> to vector<1x32xf32>
    %410 = vector.broadcast %409 : vector<1x32xf32> to vector<4x32xf32>
    %411 = arith.addf %407, %410 : vector<4x32xf32>
    %c0_189 = arith.constant 0 : index
    %c0_190 = arith.constant 0 : index
    %c0_191 = arith.constant 0 : index
    %412 = vector.load %arg12[%c0_189, %c0_190, %c0_191] : memref<2x1x32xf32, #tpu.memory_space<vmem>>, vector<1x1x32xf32>
    %413 = vector.shape_cast %412 : vector<1x1x32xf32> to vector<1x32xf32>
    %c0_192 = arith.constant 0 : index
    %c0_193 = arith.constant 0 : index
    %c0_194 = arith.constant 0 : index
    %414 = vector.load %arg13[%c0_192, %c0_193, %c0_194] : memref<2x1x32xf32, #tpu.memory_space<vmem>>, vector<1x1x32xf32>
    %415 = vector.shape_cast %414 : vector<1x1x32xf32> to vector<1x32xf32>
    %cst_195 = arith.constant dense<0.000000e+00> : vector<4xf32>
    %416 = vector.multi_reduction <add>, %411, %cst_195 [1] : vector<4x32xf32> to vector<4xf32>
    %417 = vector.shape_cast %416 : vector<4xf32> to vector<4x1xf32>
    %cst_196 = arith.constant 3.200000e+01 : f32
    %418 = vector.broadcast %cst_196 : f32 to vector<4x1xf32>
    %419 = arith.divf %417, %418 : vector<4x1xf32>
    %420 = vector.broadcast %419 : vector<4x1xf32> to vector<4x32xf32>
    %421 = arith.subf %411, %420 : vector<4x32xf32>
    %422 = arith.mulf %421, %421 : vector<4x32xf32>
    %cst_197 = arith.constant dense<0.000000e+00> : vector<4xf32>
    %423 = vector.multi_reduction <add>, %422, %cst_197 [1] : vector<4x32xf32> to vector<4xf32>
    %424 = vector.shape_cast %423 : vector<4xf32> to vector<4x1xf32>
    %cst_198 = arith.constant 3.200000e+01 : f32
    %425 = vector.broadcast %cst_198 : f32 to vector<4x1xf32>
    %426 = arith.divf %424, %425 : vector<4x1xf32>
    %427 = vector.broadcast %419 : vector<4x1xf32> to vector<4x32xf32>
    %428 = arith.subf %411, %427 : vector<4x32xf32>
    %cst_199 = arith.constant 9.99999997E-7 : f32
    %429 = vector.broadcast %cst_199 : f32 to vector<4x1xf32>
    %430 = arith.addf %426, %429 : vector<4x1xf32>
    %431 = math.rsqrt %430 : vector<4x1xf32>
    %432 = vector.broadcast %431 : vector<4x1xf32> to vector<4x32xf32>
    %433 = arith.mulf %428, %432 : vector<4x32xf32>
    %434 = vector.broadcast %413 : vector<1x32xf32> to vector<4x32xf32>
    %435 = arith.mulf %433, %434 : vector<4x32xf32>
    %436 = vector.broadcast %415 : vector<1x32xf32> to vector<4x32xf32>
    %437 = arith.addf %435, %436 : vector<4x32xf32>
    %c0_200 = arith.constant 0 : index
    %c0_201 = arith.constant 0 : index
    %c0_202 = arith.constant 0 : index
    %438 = vector.load %arg14[%c0_200, %c0_201, %c0_202] : memref<2x32x128xbf16, #tpu.memory_space<vmem>>, vector<1x32x128xbf16>
    %439 = vector.shape_cast %438 : vector<1x32x128xbf16> to vector<32x128xbf16>
    %440 = arith.truncf %437 : vector<4x32xf32> to vector<4x32xbf16>
    %cst_203 = arith.constant dense<0.000000e+00> : vector<4x128xf32>
    %441 = tpu.matmul %440, %439, %cst_203 {dimension_numbers = #tpu.dot_dimension_numbers<[1], [0], [0], [1], [0, 0, 1, 1], [], []>} : vector<4x32xbf16>, vector<32x128xbf16>, vector<4x128xf32> -> vector<4x128xf32>
    %c0_204 = arith.constant 0 : index
    %c0_205 = arith.constant 0 : index
    %c0_206 = arith.constant 0 : index
    %442 = vector.load %arg15[%c0_204, %c0_205, %c0_206] : memref<2x1x128xf32, #tpu.memory_space<vmem>>, vector<1x1x128xf32>
    %443 = vector.shape_cast %442 : vector<1x1x128xf32> to vector<1x128xf32>
    %444 = vector.broadcast %443 : vector<1x128xf32> to vector<4x128xf32>
    %445 = arith.addf %441, %444 : vector<4x128xf32>
    %446 = arith.mulf %445, %445 : vector<4x128xf32>
    %447 = arith.mulf %445, %446 : vector<4x128xf32>
    %cst_207 = arith.constant 4.471500e-02 : f32
    %448 = vector.broadcast %cst_207 : f32 to vector<4x128xf32>
    %449 = arith.mulf %448, %447 : vector<4x128xf32>
    %450 = arith.addf %445, %449 : vector<4x128xf32>
    %cst_208 = arith.constant 0.797884583 : f32
    %451 = vector.broadcast %cst_208 : f32 to vector<4x128xf32>
    %452 = arith.mulf %451, %450 : vector<4x128xf32>
    %453 = math.tanh %452 : vector<4x128xf32>
    %cst_209 = arith.constant 1.000000e+00 : f32
    %454 = vector.broadcast %cst_209 : f32 to vector<4x128xf32>
    %455 = arith.addf %454, %453 : vector<4x128xf32>
    %cst_210 = arith.constant 5.000000e-01 : f32
    %456 = vector.broadcast %cst_210 : f32 to vector<4x128xf32>
    %457 = arith.mulf %456, %455 : vector<4x128xf32>
    %458 = arith.mulf %445, %457 : vector<4x128xf32>
    %c0_211 = arith.constant 0 : index
    %c0_212 = arith.constant 0 : index
    %c0_213 = arith.constant 0 : index
    %459 = vector.load %arg16[%c0_211, %c0_212, %c0_213] : memref<2x128x32xbf16, #tpu.memory_space<vmem>>, vector<1x128x32xbf16>
    %460 = vector.shape_cast %459 : vector<1x128x32xbf16> to vector<128x32xbf16>
    %461 = arith.truncf %458 : vector<4x128xf32> to vector<4x128xbf16>
    %cst_214 = arith.constant dense<0.000000e+00> : vector<4x32xf32>
    %462 = tpu.matmul %461, %460, %cst_214 {dimension_numbers = #tpu.dot_dimension_numbers<[1], [0], [0], [1], [0, 0, 1, 1], [], []>} : vector<4x128xbf16>, vector<128x32xbf16>, vector<4x32xf32> -> vector<4x32xf32>
    %463 = arith.addf %411, %462 : vector<4x32xf32>
    %c0_215 = arith.constant 0 : index
    %c0_216 = arith.constant 0 : index
    %c0_217 = arith.constant 0 : index
    %464 = vector.load %arg17[%c0_215, %c0_216, %c0_217] : memref<2x1x32xf32, #tpu.memory_space<vmem>>, vector<1x1x32xf32>
    %465 = vector.shape_cast %464 : vector<1x1x32xf32> to vector<1x32xf32>
    %466 = vector.broadcast %465 : vector<1x32xf32> to vector<4x32xf32>
    %467 = arith.addf %463, %466 : vector<4x32xf32>
    %c1_218 = arith.constant 1 : index
    %c0_219 = arith.constant 0 : index
    %c0_220 = arith.constant 0 : index
    %468 = vector.load %arg6[%c1_218, %c0_219, %c0_220] : memref<2x1x32xf32, #tpu.memory_space<vmem>>, vector<1x1x32xf32>
    %469 = vector.shape_cast %468 : vector<1x1x32xf32> to vector<1x32xf32>
    %c1_221 = arith.constant 1 : index
    %c0_222 = arith.constant 0 : index
    %c0_223 = arith.constant 0 : index
    %470 = vector.load %arg7[%c1_221, %c0_222, %c0_223] : memref<2x1x32xf32, #tpu.memory_space<vmem>>, vector<1x1x32xf32>
    %471 = vector.shape_cast %470 : vector<1x1x32xf32> to vector<1x32xf32>
    %cst_224 = arith.constant dense<0.000000e+00> : vector<4xf32>
    %472 = vector.multi_reduction <add>, %467, %cst_224 [1] : vector<4x32xf32> to vector<4xf32>
    %473 = vector.shape_cast %472 : vector<4xf32> to vector<4x1xf32>
    %cst_225 = arith.constant 3.200000e+01 : f32
    %474 = vector.broadcast %cst_225 : f32 to vector<4x1xf32>
    %475 = arith.divf %473, %474 : vector<4x1xf32>
    %476 = vector.broadcast %475 : vector<4x1xf32> to vector<4x32xf32>
    %477 = arith.subf %467, %476 : vector<4x32xf32>
    %478 = arith.mulf %477, %477 : vector<4x32xf32>
    %cst_226 = arith.constant dense<0.000000e+00> : vector<4xf32>
    %479 = vector.multi_reduction <add>, %478, %cst_226 [1] : vector<4x32xf32> to vector<4xf32>
    %480 = vector.shape_cast %479 : vector<4xf32> to vector<4x1xf32>
    %cst_227 = arith.constant 3.200000e+01 : f32
    %481 = vector.broadcast %cst_227 : f32 to vector<4x1xf32>
    %482 = arith.divf %480, %481 : vector<4x1xf32>
    %483 = vector.broadcast %475 : vector<4x1xf32> to vector<4x32xf32>
    %484 = arith.subf %467, %483 : vector<4x32xf32>
    %cst_228 = arith.constant 9.99999997E-7 : f32
    %485 = vector.broadcast %cst_228 : f32 to vector<4x1xf32>
    %486 = arith.addf %482, %485 : vector<4x1xf32>
    %487 = math.rsqrt %486 : vector<4x1xf32>
    %488 = vector.broadcast %487 : vector<4x1xf32> to vector<4x32xf32>
    %489 = arith.mulf %484, %488 : vector<4x32xf32>
    %490 = vector.broadcast %469 : vector<1x32xf32> to vector<4x32xf32>
    %491 = arith.mulf %489, %490 : vector<4x32xf32>
    %492 = vector.broadcast %471 : vector<1x32xf32> to vector<4x32xf32>
    %493 = arith.addf %491, %492 : vector<4x32xf32>
    %c1_229 = arith.constant 1 : index
    %c0_230 = arith.constant 0 : index
    %c0_231 = arith.constant 0 : index
    %494 = vector.load %arg8[%c1_229, %c0_230, %c0_231] : memref<2x32x96xbf16, #tpu.memory_space<vmem>>, vector<1x32x96xbf16>
    %495 = vector.shape_cast %494 : vector<1x32x96xbf16> to vector<32x96xbf16>
    %496 = arith.truncf %493 : vector<4x32xf32> to vector<4x32xbf16>
    %cst_232 = arith.constant dense<0.000000e+00> : vector<4x96xf32>
    %497 = tpu.matmul %496, %495, %cst_232 {dimension_numbers = #tpu.dot_dimension_numbers<[1], [0], [0], [1], [0, 0, 1, 1], [], []>} : vector<4x32xbf16>, vector<32x96xbf16>, vector<4x96xf32> -> vector<4x96xf32>
    %c1_233 = arith.constant 1 : index
    %c0_234 = arith.constant 0 : index
    %c0_235 = arith.constant 0 : index
    %498 = vector.load %arg9[%c1_233, %c0_234, %c0_235] : memref<2x1x96xf32, #tpu.memory_space<vmem>>, vector<1x1x96xf32>
    %499 = vector.shape_cast %498 : vector<1x1x96xf32> to vector<1x96xf32>
    %500 = vector.broadcast %499 : vector<1x96xf32> to vector<4x96xf32>
    %501 = arith.addf %497, %500 : vector<4x96xf32>
    %502 = vector.extract_strided_slice %501 {offsets = [0, 0], sizes = [4, 16], strides = [1, 1]} : vector<4x96xf32> to vector<4x16xf32>
    %503 = vector.extract_strided_slice %501 {offsets = [0, 32], sizes = [4, 16], strides = [1, 1]} : vector<4x96xf32> to vector<4x16xf32>
    %504 = vector.extract_strided_slice %501 {offsets = [0, 64], sizes = [4, 16], strides = [1, 1]} : vector<4x96xf32> to vector<4x16xf32>
    %505 = arith.truncf %502 : vector<4x16xf32> to vector<4x16xbf16>
    %506 = arith.truncf %503 : vector<4x16xf32> to vector<4x16xbf16>
    %cst_236 = arith.constant dense<0.000000e+00> : vector<4x4xf32>
    %507 = tpu.matmul %505, %506, %cst_236 {dimension_numbers = #tpu.dot_dimension_numbers<[1], [1], [0], [0], [0, 0, 1, 0], [], []>} : vector<4x16xbf16>, vector<4x16xbf16>, vector<4x4xf32> -> vector<4x4xf32>
    %cst_237 = arith.constant 2.500000e-01 : f32
    %508 = vector.broadcast %cst_237 : f32 to vector<4x4xf32>
    %509 = arith.mulf %507, %508 : vector<4x4xf32>
    %cst_238 = arith.constant dense<0xFF800000> : vector<4xf32>
    %510 = vector.multi_reduction <maximumf>, %509, %cst_238 [1] : vector<4x4xf32> to vector<4xf32>
    %511 = vector.shape_cast %510 : vector<4xf32> to vector<4x1xf32>
    %512 = vector.broadcast %511 : vector<4x1xf32> to vector<4x4xf32>
    %513 = arith.subf %509, %512 : vector<4x4xf32>
    %514 = math.exp %513 : vector<4x4xf32>
    %cst_239 = arith.constant dense<0.000000e+00> : vector<4xf32>
    %515 = vector.multi_reduction <add>, %514, %cst_239 [1] : vector<4x4xf32> to vector<4xf32>
    %516 = vector.shape_cast %515 : vector<4xf32> to vector<4x1xf32>
    %517 = arith.truncf %514 : vector<4x4xf32> to vector<4x4xbf16>
    %518 = arith.truncf %504 : vector<4x16xf32> to vector<4x16xbf16>
    %cst_240 = arith.constant dense<0.000000e+00> : vector<4x16xf32>
    %519 = tpu.matmul %517, %518, %cst_240 {dimension_numbers = #tpu.dot_dimension_numbers<[1], [0], [0], [1], [0, 0, 1, 1], [], []>} : vector<4x4xbf16>, vector<4x16xbf16>, vector<4x16xf32> -> vector<4x16xf32>
    %520 = tpu.reciprocal %516 {approx = true} : vector<4x1xf32> -> vector<4x1xf32>
    %521 = vector.broadcast %520 : vector<4x1xf32> to vector<4x16xf32>
    %522 = arith.mulf %519, %521 : vector<4x16xf32>
    %523 = vector.extract_strided_slice %501 {offsets = [0, 16], sizes = [4, 16], strides = [1, 1]} : vector<4x96xf32> to vector<4x16xf32>
    %524 = vector.extract_strided_slice %501 {offsets = [0, 48], sizes = [4, 16], strides = [1, 1]} : vector<4x96xf32> to vector<4x16xf32>
    %525 = vector.extract_strided_slice %501 {offsets = [0, 80], sizes = [4, 16], strides = [1, 1]} : vector<4x96xf32> to vector<4x16xf32>
    %526 = arith.truncf %523 : vector<4x16xf32> to vector<4x16xbf16>
    %527 = arith.truncf %524 : vector<4x16xf32> to vector<4x16xbf16>
    %cst_241 = arith.constant dense<0.000000e+00> : vector<4x4xf32>
    %528 = tpu.matmul %526, %527, %cst_241 {dimension_numbers = #tpu.dot_dimension_numbers<[1], [1], [0], [0], [0, 0, 1, 0], [], []>} : vector<4x16xbf16>, vector<4x16xbf16>, vector<4x4xf32> -> vector<4x4xf32>
    %cst_242 = arith.constant 2.500000e-01 : f32
    %529 = vector.broadcast %cst_242 : f32 to vector<4x4xf32>
    %530 = arith.mulf %528, %529 : vector<4x4xf32>
    %cst_243 = arith.constant dense<0xFF800000> : vector<4xf32>
    %531 = vector.multi_reduction <maximumf>, %530, %cst_243 [1] : vector<4x4xf32> to vector<4xf32>
    %532 = vector.shape_cast %531 : vector<4xf32> to vector<4x1xf32>
    %533 = vector.broadcast %532 : vector<4x1xf32> to vector<4x4xf32>
    %534 = arith.subf %530, %533 : vector<4x4xf32>
    %535 = math.exp %534 : vector<4x4xf32>
    %cst_244 = arith.constant dense<0.000000e+00> : vector<4xf32>
    %536 = vector.multi_reduction <add>, %535, %cst_244 [1] : vector<4x4xf32> to vector<4xf32>
    %537 = vector.shape_cast %536 : vector<4xf32> to vector<4x1xf32>
    %538 = arith.truncf %535 : vector<4x4xf32> to vector<4x4xbf16>
    %539 = arith.truncf %525 : vector<4x16xf32> to vector<4x16xbf16>
    %cst_245 = arith.constant dense<0.000000e+00> : vector<4x16xf32>
    %540 = tpu.matmul %538, %539, %cst_245 {dimension_numbers = #tpu.dot_dimension_numbers<[1], [0], [0], [1], [0, 0, 1, 1], [], []>} : vector<4x4xbf16>, vector<4x16xbf16>, vector<4x16xf32> -> vector<4x16xf32>
    %541 = tpu.reciprocal %537 {approx = true} : vector<4x1xf32> -> vector<4x1xf32>
    %542 = vector.broadcast %541 : vector<4x1xf32> to vector<4x16xf32>
    %543 = arith.mulf %540, %542 : vector<4x16xf32>
    %544 = tpu.concatenate %522, %543 in 1 : vector<4x16xf32>, vector<4x16xf32> -> vector<4x32xf32>
    %c1_246 = arith.constant 1 : index
    %c0_247 = arith.constant 0 : index
    %c0_248 = arith.constant 0 : index
    %545 = vector.load %arg10[%c1_246, %c0_247, %c0_248] : memref<2x32x32xbf16, #tpu.memory_space<vmem>>, vector<1x32x32xbf16>
    %546 = vector.shape_cast %545 : vector<1x32x32xbf16> to vector<32x32xbf16>
    %547 = arith.truncf %544 : vector<4x32xf32> to vector<4x32xbf16>
    %cst_249 = arith.constant dense<0.000000e+00> : vector<4x32xf32>
    %548 = tpu.matmul %547, %546, %cst_249 {dimension_numbers = #tpu.dot_dimension_numbers<[1], [0], [0], [1], [0, 0, 1, 1], [], []>} : vector<4x32xbf16>, vector<32x32xbf16>, vector<4x32xf32> -> vector<4x32xf32>
    %549 = arith.addf %467, %548 : vector<4x32xf32>
    %c1_250 = arith.constant 1 : index
    %c0_251 = arith.constant 0 : index
    %c0_252 = arith.constant 0 : index
    %550 = vector.load %arg11[%c1_250, %c0_251, %c0_252] : memref<2x1x32xf32, #tpu.memory_space<vmem>>, vector<1x1x32xf32>
    %551 = vector.shape_cast %550 : vector<1x1x32xf32> to vector<1x32xf32>
    %552 = vector.broadcast %551 : vector<1x32xf32> to vector<4x32xf32>
    %553 = arith.addf %549, %552 : vector<4x32xf32>
    %c1_253 = arith.constant 1 : index
    %c0_254 = arith.constant 0 : index
    %c0_255 = arith.constant 0 : index
    %554 = vector.load %arg12[%c1_253, %c0_254, %c0_255] : memref<2x1x32xf32, #tpu.memory_space<vmem>>, vector<1x1x32xf32>
    %555 = vector.shape_cast %554 : vector<1x1x32xf32> to vector<1x32xf32>
    %c1_256 = arith.constant 1 : index
    %c0_257 = arith.constant 0 : index
    %c0_258 = arith.constant 0 : index
    %556 = vector.load %arg13[%c1_256, %c0_257, %c0_258] : memref<2x1x32xf32, #tpu.memory_space<vmem>>, vector<1x1x32xf32>
    %557 = vector.shape_cast %556 : vector<1x1x32xf32> to vector<1x32xf32>
    %cst_259 = arith.constant dense<0.000000e+00> : vector<4xf32>
    %558 = vector.multi_reduction <add>, %553, %cst_259 [1] : vector<4x32xf32> to vector<4xf32>
    %559 = vector.shape_cast %558 : vector<4xf32> to vector<4x1xf32>
    %cst_260 = arith.constant 3.200000e+01 : f32
    %560 = vector.broadcast %cst_260 : f32 to vector<4x1xf32>
    %561 = arith.divf %559, %560 : vector<4x1xf32>
    %562 = vector.broadcast %561 : vector<4x1xf32> to vector<4x32xf32>
    %563 = arith.subf %553, %562 : vector<4x32xf32>
    %564 = arith.mulf %563, %563 : vector<4x32xf32>
    %cst_261 = arith.constant dense<0.000000e+00> : vector<4xf32>
    %565 = vector.multi_reduction <add>, %564, %cst_261 [1] : vector<4x32xf32> to vector<4xf32>
    %566 = vector.shape_cast %565 : vector<4xf32> to vector<4x1xf32>
    %cst_262 = arith.constant 3.200000e+01 : f32
    %567 = vector.broadcast %cst_262 : f32 to vector<4x1xf32>
    %568 = arith.divf %566, %567 : vector<4x1xf32>
    %569 = vector.broadcast %561 : vector<4x1xf32> to vector<4x32xf32>
    %570 = arith.subf %553, %569 : vector<4x32xf32>
    %cst_263 = arith.constant 9.99999997E-7 : f32
    %571 = vector.broadcast %cst_263 : f32 to vector<4x1xf32>
    %572 = arith.addf %568, %571 : vector<4x1xf32>
    %573 = math.rsqrt %572 : vector<4x1xf32>
    %574 = vector.broadcast %573 : vector<4x1xf32> to vector<4x32xf32>
    %575 = arith.mulf %570, %574 : vector<4x32xf32>
    %576 = vector.broadcast %555 : vector<1x32xf32> to vector<4x32xf32>
    %577 = arith.mulf %575, %576 : vector<4x32xf32>
    %578 = vector.broadcast %557 : vector<1x32xf32> to vector<4x32xf32>
    %579 = arith.addf %577, %578 : vector<4x32xf32>
    %c1_264 = arith.constant 1 : index
    %c0_265 = arith.constant 0 : index
    %c0_266 = arith.constant 0 : index
    %580 = vector.load %arg14[%c1_264, %c0_265, %c0_266] : memref<2x32x128xbf16, #tpu.memory_space<vmem>>, vector<1x32x128xbf16>
    %581 = vector.shape_cast %580 : vector<1x32x128xbf16> to vector<32x128xbf16>
    %582 = arith.truncf %579 : vector<4x32xf32> to vector<4x32xbf16>
    %cst_267 = arith.constant dense<0.000000e+00> : vector<4x128xf32>
    %583 = tpu.matmul %582, %581, %cst_267 {dimension_numbers = #tpu.dot_dimension_numbers<[1], [0], [0], [1], [0, 0, 1, 1], [], []>} : vector<4x32xbf16>, vector<32x128xbf16>, vector<4x128xf32> -> vector<4x128xf32>
    %c1_268 = arith.constant 1 : index
    %c0_269 = arith.constant 0 : index
    %c0_270 = arith.constant 0 : index
    %584 = vector.load %arg15[%c1_268, %c0_269, %c0_270] : memref<2x1x128xf32, #tpu.memory_space<vmem>>, vector<1x1x128xf32>
    %585 = vector.shape_cast %584 : vector<1x1x128xf32> to vector<1x128xf32>
    %586 = vector.broadcast %585 : vector<1x128xf32> to vector<4x128xf32>
    %587 = arith.addf %583, %586 : vector<4x128xf32>
    %588 = arith.mulf %587, %587 : vector<4x128xf32>
    %589 = arith.mulf %587, %588 : vector<4x128xf32>
    %cst_271 = arith.constant 4.471500e-02 : f32
    %590 = vector.broadcast %cst_271 : f32 to vector<4x128xf32>
    %591 = arith.mulf %590, %589 : vector<4x128xf32>
    %592 = arith.addf %587, %591 : vector<4x128xf32>
    %cst_272 = arith.constant 0.797884583 : f32
    %593 = vector.broadcast %cst_272 : f32 to vector<4x128xf32>
    %594 = arith.mulf %593, %592 : vector<4x128xf32>
    %595 = math.tanh %594 : vector<4x128xf32>
    %cst_273 = arith.constant 1.000000e+00 : f32
    %596 = vector.broadcast %cst_273 : f32 to vector<4x128xf32>
    %597 = arith.addf %596, %595 : vector<4x128xf32>
    %cst_274 = arith.constant 5.000000e-01 : f32
    %598 = vector.broadcast %cst_274 : f32 to vector<4x128xf32>
    %599 = arith.mulf %598, %597 : vector<4x128xf32>
    %600 = arith.mulf %587, %599 : vector<4x128xf32>
    %c1_275 = arith.constant 1 : index
    %c0_276 = arith.constant 0 : index
    %c0_277 = arith.constant 0 : index
    %601 = vector.load %arg16[%c1_275, %c0_276, %c0_277] : memref<2x128x32xbf16, #tpu.memory_space<vmem>>, vector<1x128x32xbf16>
    %602 = vector.shape_cast %601 : vector<1x128x32xbf16> to vector<128x32xbf16>
    %603 = arith.truncf %600 : vector<4x128xf32> to vector<4x128xbf16>
    %cst_278 = arith.constant dense<0.000000e+00> : vector<4x32xf32>
    %604 = tpu.matmul %603, %602, %cst_278 {dimension_numbers = #tpu.dot_dimension_numbers<[1], [0], [0], [1], [0, 0, 1, 1], [], []>} : vector<4x128xbf16>, vector<128x32xbf16>, vector<4x32xf32> -> vector<4x32xf32>
    %605 = arith.addf %553, %604 : vector<4x32xf32>
    %c1_279 = arith.constant 1 : index
    %c0_280 = arith.constant 0 : index
    %c0_281 = arith.constant 0 : index
    %606 = vector.load %arg17[%c1_279, %c0_280, %c0_281] : memref<2x1x32xf32, #tpu.memory_space<vmem>>, vector<1x1x32xf32>
    %607 = vector.shape_cast %606 : vector<1x1x32xf32> to vector<1x32xf32>
    %608 = vector.broadcast %607 : vector<1x32xf32> to vector<4x32xf32>
    %609 = arith.addf %605, %608 : vector<4x32xf32>
    %c0_282 = arith.constant 0 : index
    %c0_283 = arith.constant 0 : index
    %610 = vector.load %arg18[%c0_282, %c0_283] : memref<1x32xf32, #tpu.memory_space<vmem>>, vector<1x32xf32>
    %c0_284 = arith.constant 0 : index
    %c0_285 = arith.constant 0 : index
    %611 = vector.load %arg19[%c0_284, %c0_285] : memref<1x32xf32, #tpu.memory_space<vmem>>, vector<1x32xf32>
    %cst_286 = arith.constant dense<0.000000e+00> : vector<4xf32>
    %612 = vector.multi_reduction <add>, %609, %cst_286 [1] : vector<4x32xf32> to vector<4xf32>
    %613 = vector.shape_cast %612 : vector<4xf32> to vector<4x1xf32>
    %cst_287 = arith.constant 3.200000e+01 : f32
    %614 = vector.broadcast %cst_287 : f32 to vector<4x1xf32>
    %615 = arith.divf %613, %614 : vector<4x1xf32>
    %616 = vector.broadcast %615 : vector<4x1xf32> to vector<4x32xf32>
    %617 = arith.subf %609, %616 : vector<4x32xf32>
    %618 = arith.mulf %617, %617 : vector<4x32xf32>
    %cst_288 = arith.constant dense<0.000000e+00> : vector<4xf32>
    %619 = vector.multi_reduction <add>, %618, %cst_288 [1] : vector<4x32xf32> to vector<4xf32>
    %620 = vector.shape_cast %619 : vector<4xf32> to vector<4x1xf32>
    %cst_289 = arith.constant 3.200000e+01 : f32
    %621 = vector.broadcast %cst_289 : f32 to vector<4x1xf32>
    %622 = arith.divf %620, %621 : vector<4x1xf32>
    %623 = vector.broadcast %615 : vector<4x1xf32> to vector<4x32xf32>
    %624 = arith.subf %609, %623 : vector<4x32xf32>
    %cst_290 = arith.constant 9.99999997E-7 : f32
    %625 = vector.broadcast %cst_290 : f32 to vector<4x1xf32>
    %626 = arith.addf %622, %625 : vector<4x1xf32>
    %627 = math.rsqrt %626 : vector<4x1xf32>
    %628 = vector.broadcast %627 : vector<4x1xf32> to vector<4x32xf32>
    %629 = arith.mulf %624, %628 : vector<4x32xf32>
    %630 = vector.broadcast %610 : vector<1x32xf32> to vector<4x32xf32>
    %631 = arith.mulf %629, %630 : vector<4x32xf32>
    %632 = vector.broadcast %611 : vector<1x32xf32> to vector<4x32xf32>
    %633 = arith.addf %631, %632 : vector<4x32xf32>
    %634 = tpu.concatenate %316, %633 in 1 : vector<4x32xf32>, vector<4x32xf32> -> vector<4x64xf32>
    %c0_291 = arith.constant 0 : index
    %c0_292 = arith.constant 0 : index
    %635 = vector.load %arg20[%c0_291, %c0_292] : memref<64x192xbf16, #tpu.memory_space<vmem>>, vector<64x192xbf16>
    %636 = arith.truncf %634 : vector<4x64xf32> to vector<4x64xbf16>
    %cst_293 = arith.constant dense<0.000000e+00> : vector<4x192xf32>
    %637 = tpu.matmul %636, %635, %cst_293 {dimension_numbers = #tpu.dot_dimension_numbers<[1], [0], [0], [1], [0, 0, 1, 1], [], []>} : vector<4x64xbf16>, vector<64x192xbf16>, vector<4x192xf32> -> vector<4x192xf32>
    %c0_294 = arith.constant 0 : index
    %c0_295 = arith.constant 0 : index
    %638 = vector.load %arg21[%c0_294, %c0_295] : memref<1x192xf32, #tpu.memory_space<vmem>>, vector<1x192xf32>
    %639 = vector.broadcast %638 : vector<1x192xf32> to vector<4x192xf32>
    %640 = arith.addf %637, %639 : vector<4x192xf32>
    %c0_296 = arith.constant 0 : index
    %c0_297 = arith.constant 0 : index
    %c0_298 = arith.constant 0 : index
    %641 = vector.load %arg24[%c0_296, %c0_297, %c0_298] : memref<1x4x192xf32, #tpu.memory_space<vmem>>, vector<1x4x192xf32>
    %642 = vector.shape_cast %641 : vector<1x4x192xf32> to vector<4x192xf32>
    %643 = vector.shape_cast %640 : vector<4x192xf32> to vector<1x4x192xf32>
    tpu.vector_store %arg24[%c0_296, %c0_297, %c0_298], %643 {strides = array<i32>} : memref<1x4x192xf32, #tpu.memory_space<vmem>>, vector<1x4x192xf32>,
    %c0_299 = arith.constant 0 : index
    %c0_300 = arith.constant 0 : index
    %644 = vector.load %arg22[%c0_299, %c0_300] : memref<64x8xbf16, #tpu.memory_space<vmem>>, vector<64x8xbf16>
    %645 = arith.truncf %634 : vector<4x64xf32> to vector<4x64xbf16>
    %cst_301 = arith.constant dense<0.000000e+00> : vector<4x8xf32>
    %646 = tpu.matmul %645, %644, %cst_301 {dimension_numbers = #tpu.dot_dimension_numbers<[1], [0], [0], [1], [0, 0, 1, 1], [], []>} : vector<4x64xbf16>, vector<64x8xbf16>, vector<4x8xf32> -> vector<4x8xf32>
    %c0_302 = arith.constant 0 : index
    %c0_303 = arith.constant 0 : index
    %647 = vector.load %arg23[%c0_302, %c0_303] : memref<1x8xf32, #tpu.memory_space<vmem>>, vector<1x8xf32>
    %648 = vector.broadcast %647 : vector<1x8xf32> to vector<4x8xf32>
    %649 = arith.addf %646, %648 : vector<4x8xf32>
    %c0_304 = arith.constant 0 : index
    %c0_305 = arith.constant 0 : index
    %c0_306 = arith.constant 0 : index
    %650 = vector.load %arg25[%c0_304, %c0_305, %c0_306] : memref<1x4x8xf32, #tpu.memory_space<vmem>>, vector<1x4x8xf32>
    %651 = vector.shape_cast %650 : vector<1x4x8xf32> to vector<4x8xf32>
    %652 = vector.shape_cast %649 : vector<4x8xf32> to vector<1x4x8xf32>
    tpu.vector_store %arg25[%c0_304, %c0_305, %c0_306], %652 {strides = array<i32>} : memref<1x4x8xf32, #tpu.memory_space<vmem>>, vector<1x4x8xf32>,
    return
  }
  func.func @transform_0(%arg0: i32) -> (i32, i32, i32) {
    %c0_i32 = arith.constant 0 : i32
    %c0_i32_0 = arith.constant 0 : i32
    %c0_i32_1 = arith.constant 0 : i32
    return %arg0, %c0_i32, %c0_i32_0 : i32, i32, i32
  }
  func.func @transform_1(%arg0: i32) -> (i32, i32, i32) {
    %c0_i32 = arith.constant 0 : i32
    %c0_i32_0 = arith.constant 0 : i32
    %c0_i32_1 = arith.constant 0 : i32
    return %arg0, %c0_i32, %c0_i32_0 : i32, i32, i32
  }
  func.func @transform_2(%arg0: i32) -> (i32, i32) {
    %c0_i32 = arith.constant 0 : i32
    %c0_i32_0 = arith.constant 0 : i32
    %c0_i32_1 = arith.constant 0 : i32
    return %c0_i32, %c0_i32_0 : i32, i32
  }
  func.func @transform_3(%arg0: i32) -> (i32, i32) {
    %c0_i32 = arith.constant 0 : i32
    %c0_i32_0 = arith.constant 0 : i32
    %c0_i32_1 = arith.constant 0 : i32
    return %c0_i32, %c0_i32_0 : i32, i32
  }
  func.func @transform_4(%arg0: i32) -> (i32, i32) {
    %c0_i32 = arith.constant 0 : i32
    %c0_i32_0 = arith.constant 0 : i32
    %c0_i32_1 = arith.constant 0 : i32
    return %c0_i32, %c0_i32_0 : i32, i32
  }
  func.func @transform_5(%arg0: i32) -> (i32, i32, i32) {
    %c0_i32 = arith.constant 0 : i32
    %c0_i32_0 = arith.constant 0 : i32
    %c0_i32_1 = arith.constant 0 : i32
    %c0_i32_2 = arith.constant 0 : i32
    return %c0_i32, %c0_i32_0, %c0_i32_1 : i32, i32, i32
  }
  func.func @transform_6(%arg0: i32) -> (i32, i32, i32) {
    %c0_i32 = arith.constant 0 : i32
    %c0_i32_0 = arith.constant 0 : i32
    %c0_i32_1 = arith.constant 0 : i32
    %c0_i32_2 = arith.constant 0 : i32
    return %c0_i32, %c0_i32_0, %c0_i32_1 : i32, i32, i32
  }
  func.func @transform_7(%arg0: i32) -> (i32, i32, i32) {
    %c0_i32 = arith.constant 0 : i32
    %c0_i32_0 = arith.constant 0 : i32
    %c0_i32_1 = arith.constant 0 : i32
    %c0_i32_2 = arith.constant 0 : i32
    return %c0_i32, %c0_i32_0, %c0_i32_1 : i32, i32, i32
  }
  func.func @transform_8(%arg0: i32) -> (i32, i32, i32) {
    %c0_i32 = arith.constant 0 : i32
    %c0_i32_0 = arith.constant 0 : i32
    %c0_i32_1 = arith.constant 0 : i32
    %c0_i32_2 = arith.constant 0 : i32
    return %c0_i32, %c0_i32_0, %c0_i32_1 : i32, i32, i32
  }
  func.func @transform_9(%arg0: i32) -> (i32, i32, i32) {
    %c0_i32 = arith.constant 0 : i32
    %c0_i32_0 = arith.constant 0 : i32
    %c0_i32_1 = arith.constant 0 : i32
    %c0_i32_2 = arith.constant 0 : i32
    return %c0_i32, %c0_i32_0, %c0_i32_1 : i32, i32, i32
  }
  func.func @transform_10(%arg0: i32) -> (i32, i32, i32) {
    %c0_i32 = arith.constant 0 : i32
    %c0_i32_0 = arith.constant 0 : i32
    %c0_i32_1 = arith.constant 0 : i32
    %c0_i32_2 = arith.constant 0 : i32
    return %c0_i32, %c0_i32_0, %c0_i32_1 : i32, i32, i32
  }
  func.func @transform_11(%arg0: i32) -> (i32, i32, i32) {
    %c0_i32 = arith.constant 0 : i32
    %c0_i32_0 = arith.constant 0 : i32
    %c0_i32_1 = arith.constant 0 : i32
    %c0_i32_2 = arith.constant 0 : i32
    return %c0_i32, %c0_i32_0, %c0_i32_1 : i32, i32, i32
  }
  func.func @transform_12(%arg0: i32) -> (i32, i32, i32) {
    %c0_i32 = arith.constant 0 : i32
    %c0_i32_0 = arith.constant 0 : i32
    %c0_i32_1 = arith.constant 0 : i32
    %c0_i32_2 = arith.constant 0 : i32
    return %c0_i32, %c0_i32_0, %c0_i32_1 : i32, i32, i32
  }
  func.func @transform_13(%arg0: i32) -> (i32, i32, i32) {
    %c0_i32 = arith.constant 0 : i32
    %c0_i32_0 = arith.constant 0 : i32
    %c0_i32_1 = arith.constant 0 : i32
    %c0_i32_2 = arith.constant 0 : i32
    return %c0_i32, %c0_i32_0, %c0_i32_1 : i32, i32, i32
  }
  func.func @transform_14(%arg0: i32) -> (i32, i32, i32) {
    %c0_i32 = arith.constant 0 : i32
    %c0_i32_0 = arith.constant 0 : i32
    %c0_i32_1 = arith.constant 0 : i32
    %c0_i32_2 = arith.constant 0 : i32
    return %c0_i32, %c0_i32_0, %c0_i32_1 : i32, i32, i32
  }
  func.func @transform_15(%arg0: i32) -> (i32, i32, i32) {
    %c0_i32 = arith.constant 0 : i32
    %c0_i32_0 = arith.constant 0 : i32
    %c0_i32_1 = arith.constant 0 : i32
    %c0_i32_2 = arith.constant 0 : i32
    return %c0_i32, %c0_i32_0, %c0_i32_1 : i32, i32, i32
  }
  func.func @transform_16(%arg0: i32) -> (i32, i32, i32) {
    %c0_i32 = arith.constant 0 : i32
    %c0_i32_0 = arith.constant 0 : i32
    %c0_i32_1 = arith.constant 0 : i32
    %c0_i32_2 = arith.constant 0 : i32
    return %c0_i32, %c0_i32_0, %c0_i32_1 : i32, i32, i32
  }
  func.func @transform_17(%arg0: i32) -> (i32, i32) {
    %c0_i32 = arith.constant 0 : i32
    %c0_i32_0 = arith.constant 0 : i32
    %c0_i32_1 = arith.constant 0 : i32
    return %c0_i32, %c0_i32_0 : i32, i32
  }
  func.func @transform_18(%arg0: i32) -> (i32, i32) {
    %c0_i32 = arith.constant 0 : i32
    %c0_i32_0 = arith.constant 0 : i32
    %c0_i32_1 = arith.constant 0 : i32
    return %c0_i32, %c0_i32_0 : i32, i32
  }
  func.func @transform_19(%arg0: i32) -> (i32, i32) {
    %c0_i32 = arith.constant 0 : i32
    %c0_i32_0 = arith.constant 0 : i32
    %c0_i32_1 = arith.constant 0 : i32
    return %c0_i32, %c0_i32_0 : i32, i32
  }
  func.func @transform_20(%arg0: i32) -> (i32, i32) {
    %c0_i32 = arith.constant 0 : i32
    %c0_i32_0 = arith.constant 0 : i32
    %c0_i32_1 = arith.constant 0 : i32
    return %c0_i32, %c0_i32_0 : i32, i32
  }
  func.func @transform_21(%arg0: i32) -> (i32, i32) {
    %c0_i32 = arith.constant 0 : i32
    %c0_i32_0 = arith.constant 0 : i32
    %c0_i32_1 = arith.constant 0 : i32
    return %c0_i32, %c0_i32_0 : i32, i32
  }
  func.func @transform_22(%arg0: i32) -> (i32, i32) {
    %c0_i32 = arith.constant 0 : i32
    %c0_i32_0 = arith.constant 0 : i32
    %c0_i32_1 = arith.constant 0 : i32
    return %c0_i32, %c0_i32_0 : i32, i32
  }
  func.func @transform_23(%arg0: i32) -> (i32, i32, i32) {
    %c0_i32 = arith.constant 0 : i32
    %c0_i32_0 = arith.constant 0 : i32
    %c0_i32_1 = arith.constant 0 : i32
    return %arg0, %c0_i32, %c0_i32_0 : i32, i32, i32
  }
  func.func @transform_24(%arg0: i32) -> (i32, i32, i32) {
    %c0_i32 = arith.constant 0 : i32
    %c0_i32_0 = arith.constant 0 : i32
    %c0_i32_1 = arith.constant 0 : i32
    return %arg0, %c0_i32, %c0_i32_0 : i32, i32, i32
  }
}

</mosaic_0001>

<bundles_post_ra>
// kernel: croco_forward.1
= control target key start
LH: loop header
LB: loop body
LE: loop exit
PB: predicated region body
PF: predicated region fallthrough
CT: control target
= control target key end

     0   :  { %s5265_s0 = inlined_call_operand.vmem [shape: bf16[2,4,192], index: 0, kind: input, shape index: {}]   ;;  %s5266_s1 = inlined_call_operand.vmem [shape: bf16[2,4,192], index: 1, kind: input, shape index: {}]   ;;  %s5267_s2 = inlined_call_operand.vmem [shape: f32[4,32], index: 2, kind: input, shape index: {}]   ;;  %s5268_s3 = inlined_call_operand.vmem [shape: bf16[192,32], index: 3, kind: input, shape index: {}]   ;;  %s5269_s4 = inlined_call_operand.vmem [shape: f32[1,32], index: 4, kind: input, shape index: {}]   ;;  %s5270_s5 = inlined_call_operand.vmem [shape: f32[2,1,32], index: 5, kind: input, shape index: {}]   ;;  %s5271_s6 = inlined_call_operand.vmem [shape: f32[2,1,32], index: 6, kind: input, shape index: {}]   ;;  %s5272_s7 = inlined_call_operand.vmem [shape: bf16[2,32,96], index: 7, kind: input, shape index: {}]   ;;  %s5273_s8 = inlined_call_operand.vmem [shape: f32[2,1,96], index: 8, kind: input, shape index: {}]   ;;  %s5274_s9 = inlined_call_operand.vmem [shape: bf16[2,32,32], index: 9, kind: input, shape index: {}]   ;;  %s5275_s10 = inlined_call_operand.vmem [shape: f32[2,1,32], index: 10, kind: input, shape index: {}]   ;;  %s5276_s11 = inlined_call_operand.vmem [shape: f32[2,1,32], index: 11, kind: input, shape index: {}]   ;;  %s5277_s12 = inlined_call_operand.vmem [shape: f32[2,1,32], index: 12, kind: input, shape index: {}]   ;;  %s5278_s13 = inlined_call_operand.vmem [shape: bf16[2,32,128], index: 13, kind: input, shape index: {}]   ;;  %s5279_s14 = inlined_call_operand.vmem [shape: f32[2,1,128], index: 14, kind: input, shape index: {}]   ;;  %s5280_s15 = inlined_call_operand.vmem [shape: bf16[2,128,32], index: 15, kind: input, shape index: {}]   ;;  %s5281_s16 = inlined_call_operand.vmem [shape: f32[2,1,32], index: 16, kind: input, shape index: {}]   ;;  %s5282_s17 = inlined_call_operand.vmem [shape: f32[1,32], index: 17, kind: input, shape index: {}]   ;;  %s5283_s18 = inlined_call_operand.vmem [shape: f32[1,32], index: 18, kind: input, shape index: {}]   ;;  %s5284_s19 = inlined_call_operand.vmem [shape: bf16[64,192], index: 19, kind: input, shape index: {}]   ;;  %s5285_s20 = inlined_call_operand.vmem [shape: f32[1,192], index: 20, kind: input, shape index: {}]   ;;  %s5286_s21 = inlined_call_operand.vmem [shape: bf16[64,8], index: 21, kind: input, shape index: {}]   ;;  %s5287_s22 = inlined_call_operand.vmem [shape: f32[1,8], index: 22, kind: input, shape index: {}]   ;;  %s5288_s23 = inlined_call_operand.vmem [shape: f32[2,4,192], index: 23, kind: output, shape index: {0}]   ;;  %s5289_s24 = inlined_call_operand.hbm [shape: f32[2,4,8], index: 24, kind: output, shape index: {1}]  }
   0x1   :  { %5321 = sst [smem:[#allocation12_spill]] %s5265_s0 }
   0x2   :  { %5322 = sst [smem:[#allocation13_spill]] %s5266_s1 }
   0x3   :  { %5323 = sst [smem:[#allocation14_spill]] %s5267_s2 }
   0x4   :  { %5324 = sst [smem:[#allocation15_spill]] %s5268_s3 }
   0x5   :  { %5325 = sst [smem:[#allocation16_spill]] %s5269_s4 }
   0x6   :  { %5326 = sst [smem:[#allocation17_spill]] %s5270_s5 }
   0x7   :  { %5327 = sst [smem:[#allocation18_spill]] %s5271_s6 }
   0x8   :  { %5328 = sst [smem:[#allocation19_spill]] %s5272_s7 }
   0x9   :  { %5329 = sst [smem:[#allocation20_spill]] %s5273_s8 }
   0xa   :  { %5330 = sst [smem:[#allocation21_spill]] %s5274_s9 }
   0xb   :  { %5331 = sst [smem:[#allocation22_spill]] %s5275_s10 }
   0xc   :  { %5332 = sst [smem:[#allocation23_spill]] %s5278_s13 }
   0xd   :  { %5333 = sst [smem:[#allocation24_spill]] %s5289_s24 }
   0xe   :  { %30 = vsyncpa [#allocation3], 0 }
   0xf   :  { %32 = vsyncpa [#allocation3 + $0x1], 0  ;;  %s4392_s5 = smov 0   ;;  %s4394_s26 = smov 0  }
  0x10   :  { %s4396_s27 = smov 0   ;;  %s4398_s28 = smov 0  }
  0x11 LB: > { %5334 = sst [smem:[#allocation5_spill]] %s4242_s5  ;;  %s4413_s6 = sadd.s32 4294967295, %s4254_s28   ;;  %s4254_s28 = sphi %s4398_s28, %s5368_s28   ;;  %s4250_s27 = sphi %s4396_s27, %s5370_s27   ;;  %s4246_s26 = sphi %s4394_s26, %s5372_s26   ;;  %s4242_s5 = sphi %s4392_s5, %s5371_s5  }
  0x12   : > { %5335 = sst [smem:[#allocation6_spill]] %s4250_s27  ;;  %s3473_s2 = sadd.s32 4294967294, %s4254_s28  }
  0x13   : > { %5336 = sst [smem:[#allocation7_spill]] %s4254_s28  ;;  %s4417_s29 = sadd.s32 1, %s4254_s28  }
  0x14   : > { %5337 = sst [smem:[#allocation8_spill]] %s4417_s29  ;;  %s564_s0 = sadd.s32 1, %s4250_s27 }
  0x15   : > { %s561_s7 = ssub.s32 %s4254_s28, %s4417_s29  ;;  %p574_p0 = scmp.ne.s32.totalorder %s4250_s27, %s4246_s26 }
  0x16   : > { %p562_p1 = scmp.eq.s32.totalorder %s561_s7, 0  ;;  %p575_p2 = scmp.eq.s32.totalorder %s4413_s6, 1 }
  0x17   : > { %p580_p3 = scmp.ne.s32.totalorder %s4246_s26, %s4242_s5  ;;  %p581_p4 = scmp.eq.s32.totalorder %s3473_s2, 1 }
  0x18   : > { %s4428_s30 = scalar_select %p562_p1, %s4250_s27, %s564_s0  }
  0x19   : > { %p4430_p5 = por %p575_p2, %p574_p0  ;;  %p4434_p6 = por %p581_p4, %p580_p3 }
  0x1a   : > { %5338 = sst [smem:[#allocation9_spill]] %s4428_s30  ;;  %p3476_p7 = scmp.ge.s32.totalorder %s4254_s28, 1 }
  0x1b   : > { %s5339_s3 = scalar_select %p4430_p5, 1, 0 }
  0x1c   : > { %s5341_s25 = scalar_select %p4434_p6, 1, 0 }
  0x1d   : > { %5340 = sst [smem:[#allocation10_spill]] %s5339_s3  ;;  %p678_p8 = scmp.lt.s32.totalorder %s4254_s28, 3 }
  0x1e   : > { %5342 = sst [smem:[#allocation11_spill]] %s5341_s25 }
  0x1f   : > { %p679_p9 = pnand %p3476_p7, %p678_p8 }
  0x20   : > { %s5343_s1 = sld [smem:[#allocation15_spill]] (!%p679_p9)  ;;  %p754_p10 = scmp.lt.s32.totalorder (!%p679_p9), %s4413_s6, 1 }
  0x21   : > { %682 = sbr.rel (%p679_p9) target bundleno = 10762 (0x2a0a), region = 112  ;;  %s5344_s25 = sld [smem:[#allocation12_spill]] (!%p679_p9) }
  0x22   : > { %s5345_s27 = sld [smem:[#allocation16_spill]] (!%p679_p9)  ;;  %s5310_s0 = smov (!%p679_p9), 96  }
  0x23   : > { %s5347_s8 = sld [smem:[#allocation19_spill]] (!%p679_p9)  ;;  %s5304_s28 = smov (!%p679_p9), 112  }
  0x24   : > { %s5349_s4 = sld [smem:[#allocation18_spill]] (!%p679_p9)  ;;  %s5355_s5 = smov (!%p679_p9), 96  }
  0x25   : > { %s5350_s29 = sld [smem:[#allocation20_spill]] (!%p679_p9) }
  0x26   : > { %v4075_v0 = vld [vmem:[%s5343_s1 + $0x38] sm:$0xff]   ;;  %v4256_v1 = vmov 0   ;;  %v4076_v2 = vld [vmem:[%s5343_s1 + $0x30] sm:$0xff]   ;;  %s4450_s7 = scalar_select %p754_p10, %s4413_s6, 1  ;;  %v4077_v3 = vld [vmem:[%s5343_s1 + $0x28] sm:$0xff]   ;;  %vm884_vm0 = vcmask 523264  }
  0x27   : > { %888 = vmatprep.subr.bf16.mxu0 %v4256_v1  ;;  %v4465_v4 = vld [vmem:[%s5343_s1 + $0x20] sm:$0xff]   ;;  %v4471_v6 = vld [vmem:[%s5343_s1 + $0x18] sm:$0xff]   ;;  %v4479_v8 = vld [vmem:[%s5343_s1 + $0x10] sm:$0xff]   ;;  %vm932_vm1 = vcmask 257024   ;;  %v4257_v30 = vmov 0.0   ;;  %vm4258_vm2 = vmmov 0  }
  0x28   : > { %889 = vmatpush1.bf16.msra.mxu0 %v4075_v0  ;;  %s5300_s30 = sshll.u32 %s4450_s7, 2  ;;  %v4486_v9 = vld [vmem:[%s5343_s1 + $0x8] sm:$0xff]   ;;  %v4493_v10 = vld [vmem:[%s5343_s1] sm:$0xff]   ;;  %v4500_v11 = vld [vmem:[%s5343_s1 + $0x58] sm:$0xff]   ;;  %3742 = vmatprep.subr.bf16.mxu1 %v4257_v30  ;;  %vm985_vm3 = vcmask 261120   ;;  %vm1033_vm4 = vcmask 130048  }
  0x29   : > { %890 = vmatprep.subr.bf16.mxu0 %v4256_v1  ;;  %s758_s2 = scalar_lea.vmem %s5344_s25, %s5300_s30  ;;  %v4507_v12 = vld [vmem:[%s5343_s1 + $0x50] sm:$0xff]   ;;  %v4515_v13 = vld [vmem:[%s5343_s1 + $0x48] sm:$0xff]   ;;  %v4522_v14 = vld [vmem:[%s5343_s1 + $0x40] sm:$0xff]   ;;  %s5346_s25 = sld [smem:[#allocation14_spill]]  ;;  %3746 = vmatprep.mubr.msk.bf16.mxu1 %vm4258_vm2, %v4257_v30  ;;  %vm1098_vm5 = vcmask 1041408   ;;  %vm1081_vm6 = vcmask 27648  }
  0x2a   : > { %v3485_v5 = vld.sshfl [vmem:[%s758_s2] sm:$0x33 pattern:$0x76325410]  ;;  %v4547_v29 = vld [vmem:[%s5347_s8 + $0x8] sm:$0xff]   ;;  %s5312_s2 = smov 64  }
  0x2b   : > { %v810_v7 = vcombine.high %v3485_v5, %v3485_v5  ;;  %v4529_v15 = vld [vmem:[%s5345_s27] ss:$0 sm:$0xff]  ;;  %3743 = vmatpush3.bf16.msra.mxu1 %v4547_v29  ;;  %s5306_s30 = smov 80   ;;  %s5302_s27 = smov 48   ;;  %vm1094_vm7 = vcmask 31744   ;;  %vm3270_vm8 = vcmask 1043456  }
  0x2c   : > { %891 = vmatpush1.bf16.msra.mxu0 %v4076_v2  ;;  %v4556_v31 = vld [vmem:[%s5347_s8] sm:$0xff]   ;;  %3744 = vmatprep.subr.bf16.mxu1 %v4257_v30  ;;  %s5351_s9 = sld [smem:[#allocation21_spill]]  ;;  %vm3271_vm9 = vcmask 523268   ;;  %vm3353_vm11 = vcmask 60416  }
  0x2d   : > { %892 = vmatprep.subr.bf16.mxu0 %v4256_v1  ;;  %3498 = vmatprep.mubr.msk.bf16.mxu0 %vm884_vm0, %v810_v7  ;;  %v4572_v38 = vld [vmem:[%s5349_s4] ss:$0 sm:$0xff]  ;;  %s5352_s10 = sld [smem:[#allocation22_spill]]  ;;  %vm3272_vm10 = vmor %vm3271_vm9, %vm3270_vm8 }
  0x2e   : > { %v4582_v42 = vld [vmem:[%s5350_s29] ss:$0 sm:$0xff]  ;;  %s5353_s13 = sld [smem:[#allocation23_spill]] }
  0x2f   : > { %v4534_v17 = vld [vmem:[%s5346_s25] sm:$0xf]  ;;  %3745 = vmatpush3.bf16.msra.mxu1 %v4556_v31  ;;  %s5348_s25 = sld [smem:[#allocation17_spill]] }
  0x30   : > { %893 = vmatpush1.bf16.msra.mxu0 %v4077_v3  ;;  %3750 = vmatprep.subr.bf16.mxu1 %v4257_v30 }
  0x31   : > { %894 = vmatprep.subr.bf16.mxu0 %v4256_v1 }
  0x34   : > { %895 = vmatpush1.bf16.msra.mxu0 %v4465_v4 }
  0x35   : > { %896 = vmatprep.subr.bf16.mxu0 %v4256_v1  ;;  %v4567_v36 = vld [vmem:[%s5348_s25] ss:$0 sm:$0xff] }
  0x38   : > { %897 = vmatpush1.bf16.msra.mxu0 %v4471_v6 }
  0x39   : > { %898 = vmatprep.subr.bf16.mxu0 %v4256_v1 }
  0x3c   : > { %899 = vmatpush1.bf16.msra.mxu0 %v4479_v8 }
  0x3d   : > { %900 = vmatprep.subr.bf16.mxu0 %v4256_v1 }
  0x40   : > { %901 = vmatpush1.bf16.msra.mxu0 %v4486_v9 }
  0x41   : > { %902 = vmatprep.subr.bf16.mxu0 %v4256_v1 }
  0x44   : > { %903 = vmatpush1.bf16.msra.mxu0 %v4493_v10 }
  0x45   : > { %912 = vmatprep.subr.bf16.mxu0 %v4256_v1 }
  0x48   : > { %913 = vmatpush2.bf16.msra.mxu0 %v4500_v11 }
  0x49   : > { %914 = vmatprep.subr.bf16.mxu0 %v4256_v1 }
  0x4c   : > { %915 = vmatpush2.bf16.msra.mxu0 %v4507_v12 }
  0x4d   : > { %916 = vmatprep.subr.bf16.mxu0 %v4256_v1 }
  0x50   : > { %917 = vmatpush2.bf16.msra.mxu0 %v4515_v13 }
  0x51   : > { %918 = vmatprep.subr.bf16.mxu0 %v4256_v1 }
  0x54   : > { %919 = vmatpush2.bf16.msra.mxu0 %v4522_v14 }
  0x55   : > { %3782 = vmatprep.subr.bf16.mxu0 %v4257_v30 }
  0x57   : > { %921 = vmatmul.mubr.bf16.vlgmr.msra.gmra.mxu0 %v3485_v5 }
  0x58   : > { %3786 = vmatprep.mubr.msk.bf16.mxu0 %vm4258_vm2, %v4257_v30 }
 0x117   : > { %v922_v16 = vpop.f32.mrf.mxu0 }
 0x118   : > { %v923_v18 = vadd.f32 %v4529_v15, %v922_v16 }
 0x119   : > { %v924_v19 = vpop.f32.mrf.mxu0 }
 0x11a   : > { %v4538_v20 = vadd.f32 %v4534_v17, %v923_v18 }
 0x11b   : > { %v925_v21 = vpop.f32.mrf.mxu0 }
 0x11c   : > { %v933_v22 = vsel %vm932_vm1, %v4538_v20, 0.0 }
 0x11d   : > { %v926_v23 = vpop.f32.mrf.mxu0  ;;  %934 = vadd.xlane.f32.xlu0 %v933_v22 }
 0x1a6   : > { %v935_v24 = vpop.xlane.xlu0 %934 }
 0x1a7   : > { %v937_v25 = vmul.f32 0.03125, %v935_v24 }
 0x1a9   : > { %v938_v26 = vsub.f32 %v4538_v20, %v937_v25 }
 0x1ab   : > { %v939_v27 = vmul.f32 %v938_v26, %v938_v26 }
 0x1ad   : > { %v940_v28 = vsel %vm932_vm1, %v939_v27, 0.0 }
 0x1ae   : > { %941 = vadd.xlane.f32.xlu0 %v940_v28 }
 0x237   : > { %v942_v32 = vpop.xlane.xlu0 %941 }
 0x238   : > { %v943_v33 = vmul.f32 0.03125, %v942_v32 }
 0x23a   : > { %v944_v34 = vadd.f32 1e-06, %v943_v33 }
 0x23c   : > { %4131 = vrsqrt.f32 %v944_v34 }
 0x249   : > { %v4132_v35 = vpop.eup %4131 }
 0x24a   : > { %v946_v37 = vmul.f32 %v4132_v35, %v938_v26 }
 0x24c   : > { %v953_v39 = vmul.f32 %v4567_v36, %v946_v37 }
 0x24e   : > { %v960_v40 = vadd.f32 %v4572_v38, %v953_v39 }
 0x250   : > { %v965_v41 = vpack.c.bf16 %v960_v40, %v960_v40  ;;  %v4617_v40 = vld [vmem:[%s5351_s9 + $0x8] sm:$0xff]  }
 0x252   : > { %3747 = vmatmul.mubr.msk.bf16.vlgmr.msra.gmra.mxu1 %vm985_vm3, %v965_v41 }
 0x253   : > { %3752 = vmatprep.mubr.msk.bf16.mxu1 %vm4258_vm2, %v4257_v30 }
 0x312   : > { %v1023_v43 = vpop.f32.mrf.mxu1 }
 0x313   : > { %v1024_v44 = vadd.f32 %v4582_v42, %v1023_v43  ;;  %v4624_v43 = vld [vmem:[%s5351_s9] sm:$0xff]  }
 0x314   : > { %v3748_v45 = vpop.f32.mrf.mxu1 }
 0x315   : > { %v1029_v46 = vpack.c.bf16 %v1024_v44, %v1024_v44 }
 0x316   : > { %v1026_v47 = vpop.f32.mrf.mxu1 }
 0x317   : > { %1092 = vrot.lane.b32.xlu0 %v1029_v46, %s5312_s2  ;;  %1031 = vrot.lane.b32.xlu1 %v1029_v46, %s5310_s0  ;;  %s5354_s0 = smov 64   ;;  %s5358_s2 = smov 48  }
 0x318   : > { %v3749_v48 = vpop.f32.mrf.mxu1 }
 0x31b   : > { %1146 = vrot.lane.b32.xlu0 %v1029_v46, %s5306_s30  ;;  %s5360_s30 = sshll.u32 %s4450_s7, 2 }
 0x31f   : > { %1144 = vrot.lane.b32.xlu0 %v1029_v46, %s5304_s28  ;;  %s5356_s28 = smov 80  }
 0x389   : > { %v1032_v49 = vpop.permute.xlu1 %1031  ;;  %v1093_v51 = vpop.permute.xlu0 %1092 }
 0x38a   : > { %v1038_v50 = vsel %vm1033_vm4, %v1032_v49, 0  ;;  %v1100_v52 = vsel %vm1098_vm5, %v1093_v51, 0 }
 0x38b   : > { %3751 = vmatpush3.bf16.xpose.msra.mxu1 %v1038_v50 }
 0x38c   : > { %3756 = vmatprep.subr.bf16.mxu1 %v4257_v30 }
 0x38d   : > { %v1147_v63 = vpop.permute.xlu0 %1146 }
 0x38e   : > { %v1152_v2 = vsel %vm1033_vm4, %v1147_v63, 0 }
 0x391   : > { %v1145_v5 = vpop.permute.xlu0 %1144 }
 0x392   : > { %3753 = vmatmul.mubr.msk.bf16.vlgmr.msra.gmra.mxu1 %vm1033_vm4, %v1029_v46 }
 0x393   : > { %3757 = vmatpush3.bf16.msra.mxu1 %v1100_v52  ;;  %3758 = vmatprep.mubr.msk.bf16.mxu1 %vm4258_vm2, %v4257_v30 }
 0x394   : > { %3762 = vmatprep.subr.bf16.mxu1 %v4257_v30 }
 0x452   : > { %v1074_v53 = vpop.f32.mrf.mxu1 }
 0x453   : > { %v1080_v54 = vmul.f32 0.25, %v1074_v53 }
 0x454   : > { %v3754_v55 = vpop.f32.mrf.mxu1 }
 0x455   : > { %v1082_v56 = vsel %vm1081_vm6, %v1080_v54, -inf }
 0x456   : > { %1083 = vmax.xlane.f32.xlu1 %v1082_v56  ;;  %v1077_v57 = vpop.f32.mrf.mxu1 }
 0x457   : > { %v4636_v57 = vld [vmem:[%s5352_s10] ss:$0 sm:$0xff] }
 0x458   : > { %v3755_v58 = vpop.f32.mrf.mxu1 }
 0x467   : > { %1205 = vrot.lane.b32.xlu1 %v1029_v46, %s5302_s27  ;;  %s5308_s27 = smov 16  }
 0x4df   : > { %v1084_v59 = vpop.xlane.xlu1 %1083 }
 0x4e0   : > { %v1085_v60 = vsub.f32 %v1080_v54, %v1084_v59 }
 0x4e2   : > { %v1086_v61 = vmul.f32 1.442695, %v1085_v60 }
 0x4e3   : > { %v1206_v3 = vpop.permute.xlu1 %1205 }
 0x4e4   : > { %4133 = vpow2.f32 %v1086_v61  ;;  %v1211_v7 = vsel %vm1098_vm5, %v1206_v3, 0 }
 0x4f1   : > { %v4134_v62 = vpop.eup %4133 }
 0x4f2   : > { %v1091_v0 = vpack.c.bf16 %v4134_v62, %v4134_v62  ;;  %v1088_v28 = vsel %vm1081_vm6, %v4134_v62, 0.0 }
 0x4f4   : > { %3759 = vmatmul.mubr.msk.bf16.vlgmr.msra.gmra.mxu1 %vm1094_vm7, %v1091_v0 }
 0x4f5   : > { %3763 = vmatpush3.bf16.xpose.msra.mxu1 %v1152_v2  ;;  %3764 = vmatprep.mubr.msk.bf16.mxu1 %vm4258_vm2, %v4257_v30 }
 0x4f6   : > { %3768 = vmatprep.subr.bf16.mxu1 %v4257_v30 }
 0x4fc   : > { %3765 = vmatmul.mubr.msk.bf16.vlgmr.msra.gmra.mxu1 %vm1033_vm4, %v1145_v5 }
 0x4fd   : > { %3769 = vmatpush3.bf16.msra.mxu1 %v1211_v7  ;;  %3770 = vmatprep.mubr.msk.bf16.mxu1 %vm4258_vm2, %v4257_v30 }
 0x4fe   : > { %3774 = vmatprep.subr.bf16.mxu1 %v4257_v30 }
 0x5b4   : > { %v1136_v16 = vpop.f32.mrf.mxu1 }
 0x5b6   : > { %v3760_v18 = vpop.f32.mrf.mxu1 }
 0x5b8   : > { %v1139_v19 = vpop.f32.mrf.mxu1 }
 0x5ba   : > { %v3761_v21 = vpop.f32.mrf.mxu1 }
 0x5bc   : > { %v1188_v22 = vpop.f32.mrf.mxu1 }
 0x5bd   : > { %v1194_v23 = vmul.f32 0.25, %v1188_v22 }
 0x5be   : > { %v3766_v24 = vpop.f32.mrf.mxu1 }
 0x5bf   : > { %v1195_v25 = vsel %vm1081_vm6, %v1194_v23, -inf }
 0x5c0   : > { %1196 = vmax.xlane.f32.xlu0 %v1195_v25  ;;  %v1191_v26 = vpop.f32.mrf.mxu1  ;;  %v4668_v25 = vld [vmem:[%s5277_s12] ss:$0 sm:$0xff] }
 0x5c2   : > { %v3767_v27 = vpop.f32.mrf.mxu1 }
 0x5c4   : > { %1089 = vadd.xlane.f32.xlu0 %v1088_v28 }
 0x649   : > { %v1197_v32 = vpop.xlane.xlu0 %1196 }
 0x64a   : > { %v1198_v33 = vsub.f32 %v1194_v23, %v1197_v32  ;;  %v4663_v23 = vld [vmem:[%s5276_s11] ss:$0 sm:$0xff]  ;;  %v4678_v32 = vld [vmem:[%s5280_s15 + $0x38] sm:$0xff]  }
 0x64c   : > { %v1199_v34 = vmul.f32 1.442695, %v1198_v33  ;;  %v4685_v33 = vld [vmem:[%s5280_s15 + $0x30] sm:$0xff]  }
 0x64d   : > { %v1090_v50 = vpop.xlane.xlu0 %1089 }
 0x64e   : > { %4135 = vpow2.f32 %v1199_v34  ;;  %v4692_v34 = vld [vmem:[%s5280_s15 + $0x28] sm:$0xff]  }
 0x65b   : > { %v4136_v35 = vpop.eup %4135 }
 0x65c   : > { %v1201_v37 = vsel %vm1081_vm6, %v4136_v35, 0.0  ;;  %v1204_v39 = vpack.c.bf16 %v4136_v35, %v4136_v35  ;;  %v4698_v35 = vld [vmem:[%s5280_s15 + $0x20] sm:$0xff]  }
 0x65d   : > { %1202 = vadd.xlane.f32.xlu1 %v1201_v37  ;;  %v4705_v37 = vld [vmem:[%s5280_s15 + $0x18] sm:$0xff]  }
 0x65e   : > { %3771 = vmatmul.mubr.msk.bf16.vlgmr.msra.gmra.mxu1 %vm1094_vm7, %v1204_v39  ;;  %v4712_v39 = vld [vmem:[%s5280_s15 + $0x10] sm:$0xff]  }
 0x65f   : > { %3778 = vmatprep.mubr.msk.bf16.mxu1 %vm4258_vm2, %v4257_v30  ;;  %3775 = vmatpush3.bf16.msra.mxu1 %v4617_v40 }
 0x660   : > { %3776 = vmatprep.subr.bf16.mxu1 %v4257_v30 }
 0x663   : > { %3777 = vmatpush3.bf16.msra.mxu1 %v4624_v43 }
 0x664   : > { %3790 = vmatprep.subr.bf16.mxu1 %v4257_v30 }
 0x6e6   : > { %v1203_v41 = vpop.xlane.xlu1 %1202 }
 0x6e7   : > { %4137 = vrcp.f32 %v1203_v41  ;;  %v4719_v41 = vld [vmem:[%s5280_s15 + $0x8] sm:$0xff]  }
 0x6e8   : > { %4139 = vrcp.f32 %v1090_v50 }
 0x6f4   : > { %v4138_v44 = vpop.eup %4137 }
 0x6f5   : > { %v4140_v51 = vpop.eup %4139 }
 0x6f6   : > { %v1143_v52 = vmul.f32 %v4140_v51, %v1136_v16  ;;  %v4655_v16 = vld [vmem:[%s5353_s13] sm:$0xff]  }
 0x71e   : > { %v1247_v45 = vpop.f32.mrf.mxu1 }
 0x71f   : > { %v1254_v46 = vmul.f32 %v4138_v44, %v1247_v45  ;;  %v4726_v44 = vld [vmem:[%s5280_s15] sm:$0xff]  }
 0x720   : > { %v3772_v47 = vpop.f32.mrf.mxu1  ;;  %v4734_v45 = vld [vmem:[%s5279_s14] ss:$0 sm:$0xff] }
 0x721   : > { %1256 = vrot.lane.b32.xlu0 %v1254_v46, %s5308_s27  ;;  %s5357_s27 = smov 112  }
 0x722   : > { %v1250_v48 = vpop.f32.mrf.mxu1 }
 0x724   : > { %v3773_v49 = vpop.f32.mrf.mxu1 }
 0x793   : > { %v1257_v53 = vpop.permute.xlu0 %1256 }
 0x794   : > { %v1259_v54 = vsel %vm1033_vm4, %v1143_v52, %v1257_v53 }
 0x795   : > { %v1264_v55 = vpack.c.bf16 %v1259_v54, %v1259_v54 }
 0x797   : > { %3779 = vmatmul.mubr.msk.bf16.vlgmr.msra.gmra.mxu1 %vm985_vm3, %v1264_v55 }
 0x798   : > { %3806 = vmatprep.mubr.msk.bf16.mxu1 %vm4258_vm2, %v4257_v30  ;;  %3791 = vmatpush3.bf16.msra.mxu1 %v4678_v32 }
 0x799   : > { %3792 = vmatprep.subr.bf16.mxu1 %v4257_v30 }
 0x79c   : > { %3793 = vmatpush3.bf16.msra.mxu1 %v4685_v33 }
 0x79d   : > { %3794 = vmatprep.subr.bf16.mxu1 %v4257_v30 }
 0x7a0   : > { %3795 = vmatpush3.bf16.msra.mxu1 %v4692_v34 }
 0x7a1   : > { %3796 = vmatprep.subr.bf16.mxu1 %v4257_v30 }
 0x7a4   : > { %3797 = vmatpush3.bf16.msra.mxu1 %v4698_v35 }
 0x7a5   : > { %3798 = vmatprep.subr.bf16.mxu1 %v4257_v30 }
 0x7a8   : > { %3799 = vmatpush3.bf16.msra.mxu1 %v4705_v37 }
 0x7a9   : > { %3800 = vmatprep.subr.bf16.mxu1 %v4257_v30 }
 0x7ac   : > { %3801 = vmatpush3.bf16.msra.mxu1 %v4712_v39 }
 0x7ad   : > { %3802 = vmatprep.subr.bf16.mxu1 %v4257_v30 }
 0x7b0   : > { %3803 = vmatpush3.bf16.msra.mxu1 %v4719_v41 }
 0x7b1   : > { %3804 = vmatprep.subr.bf16.mxu1 %v4257_v30 }
 0x7b4   : > { %3805 = vmatpush3.bf16.msra.mxu1 %v4726_v44 }
 0x7b5   : > { %3836 = vmatprep.subr.bf16.mxu1 %v4257_v30 }
 0x857   : > { %v1314_v56 = vpop.f32.mrf.mxu1 }
 0x858   : > { %v1320_v58 = vadd.f32 %v1314_v56, %v4538_v20  ;;  %v4649_v20 = vld [vmem:[%s5353_s13 + $0x8] sm:$0xff]  }
 0x859   : > { %v3780_v59 = vpop.f32.mrf.mxu1  ;;  %3783 = vmatpush3.bf16.msra.mxu0 %v4649_v20 }
 0x85a   : > { %v4640_v60 = vadd.f32 %v4636_v57, %v1320_v58  ;;  %3784 = vmatprep.subr.bf16.mxu0 %v4257_v30 }
 0x85b   : > { %v1317_v61 = vpop.f32.mrf.mxu1 }
 0x85c   : > { %v1331_v62 = vsel %vm932_vm1, %v4640_v60, 0.0 }
 0x85d   : > { %1332 = vadd.xlane.f32.xlu1 %v1331_v62  ;;  %v3781_v63 = vpop.f32.mrf.mxu1  ;;  %3785 = vmatpush3.bf16.msra.mxu0 %v4655_v16 }
 0x85e   : > { %3810 = vmatprep.subr.bf16.mxu0 %v4257_v30 }
 0x8e6   : > { %v1333_v0 = vpop.xlane.xlu1 %1332 }
 0x8e7   : > { %v1334_v2 = vmul.f32 0.03125, %v1333_v0  ;;  %v4742_v0 = vld [vmem:[%s5281_s16] ss:$0 sm:$0xff] }
 0x8e9   : > { %v1335_v3 = vsub.f32 %v4640_v60, %v1334_v2 }
 0x8eb   : > { %v1336_v5 = vmul.f32 %v1335_v3, %v1335_v3 }
 0x8ed   : > { %v1337_v7 = vsel %vm932_vm1, %v1336_v5, 0.0 }
 0x8ee   : > { %1338 = vadd.xlane.f32.xlu0 %v1337_v7 }
 0x977   : > { %v1339_v18 = vpop.xlane.xlu0 %1338 }
 0x978   : > { %v1340_v19 = vmul.f32 0.03125, %v1339_v18 }
 0x97a   : > { %v1341_v21 = vadd.f32 1e-06, %v1340_v19 }
 0x97c   : > { %4141 = vrsqrt.f32 %v1341_v21 }
 0x989   : > { %v4142_v22 = vpop.eup %4141 }
 0x98a   : > { %v1343_v24 = vmul.f32 %v4142_v22, %v1335_v3 }
 0x98c   : > { %v1350_v26 = vmul.f32 %v4663_v23, %v1343_v24 }
 0x98e   : > { %v1357_v27 = vadd.f32 %v4668_v25, %v1350_v26 }
 0x990   : > { %v1362_v28 = vpack.c.bf16 %v1357_v27, %v1357_v27 }
 0x992   : > { %3787 = vmatmul.mubr.msk.bf16.vlgmr.msra.gmra.mxu0 %vm985_vm3, %v1362_v28  ;;  %v4761_v28 = vld [vmem:[%s5347_s8 + $0x10] sm:$0xff]  }
 0x993   : > { %3814 = vmatprep.mubr.msk.bf16.mxu0 %vm4258_vm2, %v4257_v30 }
 0xa52   : > { %v1419_v46 = vpop.f32.mrf.mxu0 }
 0xa53   : > { %v1420_v47 = vadd.f32 %v4734_v45, %v1419_v46 }
 0xa54   : > { %v3788_v48 = vpop.f32.mrf.mxu0 }
 0xa55   : > { %v1425_v49 = vmul.f32 %v1420_v47, %v1420_v47 }
 0xa56   : > { %v1422_v50 = vpop.f32.mrf.mxu0 }
 0xa57   : > { %v1426_v51 = vmul.f32 %v1425_v49, %v1420_v47  ;;  %v4769_v50 = vld [vmem:[%s5348_s25 + $0x1] ss:$0 sm:$0xff] }
 0xa58   : > { %v3789_v52 = vpop.f32.mrf.mxu0 }
 0xa59   : > { %v1427_v53 = vmul.f32 0.044715, %v1426_v51  ;;  %v4774_v52 = vld [vmem:[%s5349_s4 + $0x1] ss:$0 sm:$0xff]  ;;  %s5359_s4 = smov 16  }
 0xa5b   : > { %v1428_v54 = vadd.f32 %v1427_v53, %v1420_v47 }
 0xa5d   : > { %v1429_v55 = vmul.f32 0.7978846, %v1428_v54 }
 0xa5f   : > { %4143 = vtanh.f32 %v1429_v55 }
 0xa6c   : > { %v4144_v56 = vpop.eup %4143 }
 0xa6d   : > { %v1431_v58 = vadd.f32 1.0, %v4144_v56  ;;  %v4784_v56 = vld [vmem:[%s5350_s29 + $0x1] ss:$0 sm:$0xff]  ;;  %s5361_s29 = sld [smem:[#allocation13_spill]] }
 0xa6f   : > { %v1432_v59 = vmul.f32 0.5, %v1431_v58 }
 0xa71   : > { %v1433_v61 = vmul.f32 %v1432_v59, %v1420_v47 }
 0xa73   : > { %v1450_v62 = vpack.c.bf16 %v1433_v61, %v1433_v61  ;;  %s763_s24 = scalar_lea.vmem %s5361_s29, %s5360_s30 }
 0xa75   : > { %3807 = vmatmul.mubr.bf16.vlgmr.msra.gmra.mxu1 %v1450_v62 }
 0xa76   : > { %3838 = vmatprep.mubr.msk.bf16.mxu1 %vm4258_vm2, %v4257_v30 }
 0xb35   : > { %v1533_v63 = vpop.f32.mrf.mxu1 }
 0xb36   : > { %v1539_v2 = vadd.f32 %v1533_v63, %v4640_v60  ;;  %v4755_v60 = vld [vmem:[%s5347_s8 + $0x18] sm:$0xff]  }
 0xb37   : > { %v3808_v3 = vpop.f32.mrf.mxu1  ;;  %3811 = vmatpush3.bf16.msra.mxu0 %v4755_v60 }
 0xb38   : > { %v4746_v5 = vadd.f32 %v4742_v0, %v1539_v2  ;;  %3812 = vmatprep.subr.bf16.mxu0 %v4257_v30 }
 0xb39   : > { %v1536_v7 = vpop.f32.mrf.mxu1 }
 0xb3a   : > { %v1552_v18 = vsel %vm932_vm1, %v4746_v5, 0.0 }
 0xb3b   : > { %1553 = vadd.xlane.f32.xlu1 %v1552_v18  ;;  %v3809_v19 = vpop.f32.mrf.mxu1  ;;  %3813 = vmatpush3.bf16.msra.mxu0 %v4761_v28 }
 0xb3c   : > { %3818 = vmatprep.subr.bf16.mxu0 %v4257_v30 }
 0xbc4   : > { %v1554_v21 = vpop.xlane.xlu1 %1553 }
 0xbc5   : > { %v1555_v22 = vmul.f32 0.03125, %v1554_v21 }
 0xbc7   : > { %v1556_v24 = vsub.f32 %v4746_v5, %v1555_v22 }
 0xbc9   : > { %v1557_v26 = vmul.f32 %v1556_v24, %v1556_v24 }
 0xbcb   : > { %v1558_v27 = vsel %vm932_vm1, %v1557_v26, 0.0 }
 0xbcc   : > { %1559 = vadd.xlane.f32.xlu1 %v1558_v27 }
 0xc55   : > { %v1560_v46 = vpop.xlane.xlu1 %1559 }
 0xc56   : > { %v1561_v47 = vmul.f32 0.03125, %v1560_v46 }
 0xc58   : > { %v1562_v48 = vadd.f32 1e-06, %v1561_v47 }
 0xc5a   : > { %4145 = vrsqrt.f32 %v1562_v48 }
 0xc67   : > { %v4146_v49 = vpop.eup %4145 }
 0xc68   : > { %v1564_v51 = vmul.f32 %v4146_v49, %v1556_v24 }
 0xc6a   : > { %v1571_v53 = vmul.f32 %v4769_v50, %v1564_v51 }
 0xc6c   : > { %v1578_v54 = vadd.f32 %v4774_v52, %v1571_v53 }
 0xc6e   : > { %v1584_v55 = vpack.c.bf16 %v1578_v54, %v1578_v54 }
 0xc70   : > { %3815 = vmatmul.mubr.msk.bf16.vlgmr.msra.gmra.mxu0 %vm985_vm3, %v1584_v55 }
 0xc71   : > { %3820 = vmatprep.mubr.msk.bf16.mxu0 %vm4258_vm2, %v4257_v30 }
 0xd30   : > { %v1642_v58 = vpop.f32.mrf.mxu0 }
 0xd31   : > { %v1643_v59 = vadd.f32 %v4784_v56, %v1642_v58 }
 0xd32   : > { %v3816_v61 = vpop.f32.mrf.mxu0 }
 0xd33   : > { %v1648_v62 = vpack.c.bf16 %v1643_v59, %v1643_v59 }
 0xd34   : > { %v1645_v63 = vpop.f32.mrf.mxu0 }
 0xd35   : > { %1709 = vrot.lane.b32.xlu0 %v1648_v62, %s5354_s0  ;;  %1650 = vrot.lane.b32.xlu1 %v1648_v62, %s5355_s5 }
 0xd36   : > { %v3817_v2 = vpop.f32.mrf.mxu0 }
 0xd39   : > { %1761 = vrot.lane.b32.xlu0 %v1648_v62, %s5356_s28 }
 0xd3d   : > { %1759 = vrot.lane.b32.xlu0 %v1648_v62, %s5357_s27 }
 0xda7   : > { %v1651_v3 = vpop.permute.xlu1 %1650  ;;  %v1710_v18 = vpop.permute.xlu0 %1709 }
 0xda8   : > { %v1656_v7 = vsel %vm1033_vm4, %v1651_v3, 0  ;;  %v1715_v19 = vsel %vm1098_vm5, %v1710_v18, 0 }
 0xda9   : > { %3819 = vmatpush3.bf16.xpose.msra.mxu0 %v1656_v7 }
 0xdaa   : > { %3824 = vmatprep.subr.bf16.mxu0 %v4257_v30 }
 0xdab   : > { %v1762_v55 = vpop.permute.xlu0 %1761 }
 0xdac   : > { %v1767_v59 = vsel %vm1033_vm4, %v1762_v55, 0  ;;  %v4826_v55 = vld [vmem:[%s5351_s9 + $0x10] sm:$0xff]  }
 0xdaf   : > { %v1760_v61 = vpop.permute.xlu0 %1759 }
 0xdb0   : > { %3821 = vmatmul.mubr.msk.bf16.vlgmr.msra.gmra.mxu0 %vm1033_vm4, %v1648_v62 }
 0xdb1   : > { %3825 = vmatpush3.bf16.msra.mxu0 %v1715_v19  ;;  %3826 = vmatprep.mubr.msk.bf16.mxu0 %vm4258_vm2, %v4257_v30 }
 0xdb2   : > { %3830 = vmatprep.subr.bf16.mxu0 %v4257_v30 }
 0xe70   : > { %v1692_v21 = vpop.f32.mrf.mxu0 }
 0xe71   : > { %v1698_v22 = vmul.f32 0.25, %v1692_v21 }
 0xe72   : > { %v3822_v24 = vpop.f32.mrf.mxu0 }
 0xe73   : > { %v1699_v26 = vsel %vm1081_vm6, %v1698_v22, -inf }
 0xe74   : > { %1700 = vmax.xlane.f32.xlu1 %v1699_v26  ;;  %v1695_v27 = vpop.f32.mrf.mxu0 }
 0xe76   : > { %v3823_v46 = vpop.f32.mrf.mxu0 }
 0xe85   : > { %1820 = vrot.lane.b32.xlu1 %v1648_v62, %s5358_s2 }
 0xefd   : > { %v1701_v47 = vpop.xlane.xlu1 %1700 }
 0xefe   : > { %v1702_v48 = vsub.f32 %v1698_v22, %v1701_v47 }
 0xf00   : > { %v1703_v49 = vmul.f32 1.442695, %v1702_v48 }
 0xf01   : > { %v1821_v51 = vpop.permute.xlu1 %1820 }
 0xf02   : > { %4147 = vpow2.f32 %v1703_v49  ;;  %v1826_v53 = vsel %vm1098_vm5, %v1821_v51, 0 }
 0xf03   : > { %3837 = vmatpush3.bf16.msra.mxu1 %v1826_v53  ;;  %v4819_v53 = vld [vmem:[%s5351_s9 + $0x18] sm:$0xff]   ;;  %s4265_s9 = smov 32  }
 0xf04   : > { %3850 = vmatprep.subr.bf16.mxu1 %v4257_v30 }
 0xf0f   : > { %v4148_v54 = vpop.eup %4147 }
 0xf10   : > { %v1708_v58 = vpack.c.bf16 %v4148_v54, %v4148_v54  ;;  %v1705_v26 = vsel %vm1081_vm6, %v4148_v54, 0.0 }
 0xf12   : > { %3827 = vmatmul.mubr.msk.bf16.vlgmr.msra.gmra.mxu0 %vm1094_vm7, %v1708_v58 }
 0xf13   : > { %3831 = vmatpush3.bf16.xpose.msra.mxu0 %v1767_v59  ;;  %3832 = vmatprep.mubr.msk.bf16.mxu0 %vm4258_vm2, %v4257_v30 }
 0xf14   : > { %3842 = vmatprep.subr.bf16.mxu0 %v4257_v30 }
 0xf1a   : > { %3833 = vmatmul.mubr.msk.bf16.vlgmr.msra.gmra.mxu0 %vm1033_vm4, %v1760_v61 }
 0xf1b   : > { %3846 = vmatprep.mubr.msk.bf16.mxu0 %vm4258_vm2, %v4257_v30  ;;  %3843 = vmatpush3.bf16.msra.mxu0 %v4819_v53 }
 0xf1c   : > { %3844 = vmatprep.subr.bf16.mxu0 %v4257_v30 }
 0xf1f   : > { %3845 = vmatpush3.bf16.msra.mxu0 %v4826_v55 }
 0xf20   : > { %3858 = vmatprep.subr.bf16.mxu0 %v4257_v30 }
 0xfd2   : > { %v1751_v62 = vpop.f32.mrf.mxu0 }
 0xfd4   : > { %v3828_v63 = vpop.f32.mrf.mxu0 }
 0xfd6   : > { %v1754_v2 = vpop.f32.mrf.mxu0 }
 0xfd8   : > { %v3829_v3 = vpop.f32.mrf.mxu0 }
 0xfda   : > { %v1803_v7 = vpop.f32.mrf.mxu0 }
 0xfdb   : > { %v1809_v18 = vmul.f32 0.25, %v1803_v7 }
 0xfdc   : > { %v3834_v19 = vpop.f32.mrf.mxu0 }
 0xfdd   : > { %v1810_v21 = vsel %vm1081_vm6, %v1809_v18, -inf }
 0xfde   : > { %1811 = vmax.xlane.f32.xlu0 %v1810_v21  ;;  %v1806_v22 = vpop.f32.mrf.mxu0 }
 0xfe0   : > { %v3835_v24 = vpop.f32.mrf.mxu0 }
 0xfe2   : > { %1706 = vadd.xlane.f32.xlu0 %v1705_v26 }
0x1067   : > { %v1812_v27 = vpop.xlane.xlu0 %1811 }
0x1068   : > { %v1813_v46 = vsub.f32 %v1809_v18, %v1812_v27  ;;  %v4838_v27 = vld [vmem:[%s5352_s10 + $0x1] ss:$0 sm:$0xff] }
0x106a   : > { %v1814_v47 = vmul.f32 1.442695, %v1813_v46 }
0x106b   : > { %v1707_v7 = vpop.xlane.xlu0 %1706 }
0x106c   : > { %4149 = vpow2.f32 %v1814_v47 }
0x1079   : > { %v4150_v48 = vpop.eup %4149 }
0x107a   : > { %v1816_v49 = vsel %vm1081_vm6, %v4150_v48, 0.0  ;;  %v1819_v51 = vpack.c.bf16 %v4150_v48, %v4150_v48 }
0x107b   : > { %1817 = vadd.xlane.f32.xlu1 %v1816_v49 }
0x107c   : > { %3839 = vmatmul.mubr.msk.bf16.vlgmr.msra.gmra.mxu1 %vm1094_vm7, %v1819_v51 }
0x107d   : > { %3854 = vmatprep.mubr.msk.bf16.mxu1 %vm4258_vm2, %v4257_v30 }
0x1104   : > { %v1818_v54 = vpop.xlane.xlu1 %1817 }
0x1105   : > { %4151 = vrcp.f32 %v1818_v54 }
0x1106   : > { %4153 = vrcp.f32 %v1707_v7 }
0x1112   : > { %v4152_v58 = vpop.eup %4151 }
0x1113   : > { %v4154_v18 = vpop.eup %4153 }
0x1114   : > { %v1758_v19 = vmul.f32 %v4154_v18, %v1751_v62 }
0x113c   : > { %v1862_v59 = vpop.f32.mrf.mxu1 }
0x113d   : > { %v1869_v61 = vmul.f32 %v4152_v58, %v1862_v59 }
0x113e   : > { %v3840_v63 = vpop.f32.mrf.mxu1 }
0x113f   : > { %1871 = vrot.lane.b32.xlu0 %v1869_v61, %s5359_s4 }
0x1140   : > { %v1865_v2 = vpop.f32.mrf.mxu1 }
0x1141   : > { %v4857_v2 = vld [vmem:[%s5353_s13 + $0x10] sm:$0xff]  }
0x1142   : > { %v3841_v3 = vpop.f32.mrf.mxu1 }
0x11b1   : > { %v1872_v21 = vpop.permute.xlu0 %1871 }
0x11b2   : > { %v1874_v22 = vsel %vm1033_vm4, %v1758_v19, %v1872_v21  ;;  %v4870_v21 = vld [vmem:[%s5276_s11 + $0x1] ss:$0 sm:$0xff] }
0x11b3   : > { %v1880_v24 = vpack.c.bf16 %v1874_v22, %v1874_v22 }
0x11b5   : > { %3847 = vmatmul.mubr.msk.bf16.vlgmr.msra.gmra.mxu0 %vm985_vm3, %v1880_v24  ;;  %v4875_v24 = vld [vmem:[%s5277_s12 + $0x1] ss:$0 sm:$0xff] }
0x11b6   : > { %3874 = vmatprep.mubr.msk.bf16.mxu0 %vm4258_vm2, %v4257_v30 }
0x1275   : > { %v1930_v26 = vpop.f32.mrf.mxu0 }
0x1276   : > { %v1936_v46 = vadd.f32 %v1930_v26, %v4746_v5  ;;  %v4851_v5 = vld [vmem:[%s5353_s13 + $0x18] sm:$0xff]   ;;  %v3595_v26 = vld.sshfl [vmem:[%s763_s24] sm:$0x33 pattern:$0x76325410]  ;;  %s3627_s13 = sshll.u32 %s4413_s6, 6 }
0x1277   : > { %v3848_v47 = vpop.f32.mrf.mxu0  ;;  %3851 = vmatpush3.bf16.msra.mxu1 %v4851_v5 }
0x1278   : > { %v4842_v62 = vadd.f32 %v4838_v27, %v1936_v46  ;;  %3852 = vmatprep.subr.bf16.mxu1 %v4257_v30 }
0x1279   : > { %v1933_v48 = vpop.f32.mrf.mxu0 }
0x127a   : > { %v1950_v49 = vsel %vm932_vm1, %v4842_v62, 0.0  ;;  %v2209_v48 = vcombine.high %v3595_v26, %v3595_v26 }
0x127b   : > { %1951 = vadd.xlane.f32.xlu1 %v1950_v49  ;;  %v3849_v51 = vpop.f32.mrf.mxu0  ;;  %3853 = vmatpush3.bf16.msra.mxu1 %v4857_v2 }
0x127c   : > { %2214 = vmatprep.subr.bf16.mxu1 %v4256_v1  ;;  %v4191_v51 = vld [vmem:[%s5343_s1 + $0x38] sm:$0xff]  }
0x1304   : > { %v1952_v54 = vpop.xlane.xlu1 %1951 }
0x1305   : > { %v1953_v58 = vmul.f32 0.03125, %v1952_v54  ;;  %v4192_v54 = vld [vmem:[%s5343_s1 + $0x30] sm:$0xff]  }
0x1307   : > { %v1954_v59 = vsub.f32 %v4842_v62, %v1953_v58  ;;  %v4193_v58 = vld [vmem:[%s5343_s1 + $0x28] sm:$0xff]  }
0x1309   : > { %v1955_v61 = vmul.f32 %v1954_v59, %v1954_v59 }
0x130b   : > { %v1956_v63 = vsel %vm932_vm1, %v1955_v61, 0.0 }
0x130c   : > { %1957 = vadd.xlane.f32.xlu0 %v1956_v63 }
0x1395   : > { %v1958_v3 = vpop.xlane.xlu0 %1957 }
0x1396   : > { %v1959_v7 = vmul.f32 0.03125, %v1958_v3 }
0x1398   : > { %v1960_v18 = vadd.f32 1e-06, %v1959_v7 }
0x139a   : > { %4155 = vrsqrt.f32 %v1960_v18 }
0x13a7   : > { %v4156_v19 = vpop.eup %4155 }
0x13a8   : > { %v1962_v22 = vmul.f32 %v4156_v19, %v1954_v59 }
0x13aa   : > { %v1969_v46 = vmul.f32 %v4870_v21, %v1962_v22 }
0x13ac   : > { %v1976_v47 = vadd.f32 %v4875_v24, %v1969_v46 }
0x13ae   : > { %v1982_v49 = vpack.c.bf16 %v1976_v47, %v1976_v47 }
0x13b0   : > { %3855 = vmatmul.mubr.msk.bf16.vlgmr.msra.gmra.mxu1 %vm985_vm3, %v1982_v49 }
0x13b1   : > { %2215 = vmatpush1.bf16.msra.mxu1 %v4191_v51  ;;  %3596 = vmatprep.mubr.msk.bf16.mxu1 %vm884_vm0, %v2209_v48 }
0x13b2   : > { %2216 = vmatprep.subr.bf16.mxu1 %v4256_v1 }
0x13b5   : > { %2217 = vmatpush1.bf16.msra.mxu1 %v4192_v54 }
0x13b6   : > { %2218 = vmatprep.subr.bf16.mxu1 %v4256_v1 }
0x13b9   : > { %2219 = vmatpush1.bf16.msra.mxu1 %v4193_v58 }
0x13ba   : > { %2220 = vmatprep.subr.bf16.mxu1 %v4256_v1 }
0x13bd   : > { %2221 = vmatpush1.bf16.msra.mxu1 %v4465_v4  ;;  %v4916_v4 = vld [vmem:[%s5280_s15 + $0x78] sm:$0xff]  }
0x13be   : > { %2222 = vmatprep.subr.bf16.mxu1 %v4256_v1  ;;  %3859 = vmatpush3.bf16.msra.mxu0 %v4916_v4 }
0x13bf   : > { %3860 = vmatprep.subr.bf16.mxu0 %v4257_v30 }
0x13c1   : > { %2223 = vmatpush1.bf16.msra.mxu1 %v4471_v6  ;;  %v4923_v6 = vld [vmem:[%s5280_s15 + $0x70] sm:$0xff]  }
0x13c2   : > { %2224 = vmatprep.subr.bf16.mxu1 %v4256_v1  ;;  %3861 = vmatpush3.bf16.msra.mxu0 %v4923_v6 }
0x13c3   : > { %3862 = vmatprep.subr.bf16.mxu0 %v4257_v30 }
0x13c5   : > { %2225 = vmatpush1.bf16.msra.mxu1 %v4479_v8  ;;  %v4930_v8 = vld [vmem:[%s5280_s15 + $0x68] sm:$0xff]  }
0x13c6   : > { %2226 = vmatprep.subr.bf16.mxu1 %v4256_v1  ;;  %3863 = vmatpush3.bf16.msra.mxu0 %v4930_v8 }
0x13c7   : > { %3864 = vmatprep.subr.bf16.mxu0 %v4257_v30 }
0x13c9   : > { %2227 = vmatpush1.bf16.msra.mxu1 %v4486_v9  ;;  %v4936_v9 = vld [vmem:[%s5280_s15 + $0x60] sm:$0xff]  }
0x13ca   : > { %2228 = vmatprep.subr.bf16.mxu1 %v4256_v1  ;;  %3865 = vmatpush3.bf16.msra.mxu0 %v4936_v9 }
0x13cb   : > { %3866 = vmatprep.subr.bf16.mxu0 %v4257_v30 }
0x13cd   : > { %2229 = vmatpush1.bf16.msra.mxu1 %v4493_v10  ;;  %v4943_v10 = vld [vmem:[%s5280_s15 + $0x58] sm:$0xff]  }
0x13ce   : > { %2238 = vmatprep.subr.bf16.mxu1 %v4256_v1  ;;  %3867 = vmatpush3.bf16.msra.mxu0 %v4943_v10 }
0x13cf   : > { %3868 = vmatprep.subr.bf16.mxu0 %v4257_v30 }
0x13d1   : > { %2239 = vmatpush2.bf16.msra.mxu1 %v4500_v11  ;;  %v4950_v11 = vld [vmem:[%s5280_s15 + $0x50] sm:$0xff]  }
0x13d2   : > { %2240 = vmatprep.subr.bf16.mxu1 %v4256_v1  ;;  %3869 = vmatpush3.bf16.msra.mxu0 %v4950_v11 }
0x13d3   : > { %3870 = vmatprep.subr.bf16.mxu0 %v4257_v30 }
0x13d5   : > { %2241 = vmatpush2.bf16.msra.mxu1 %v4507_v12  ;;  %v4957_v12 = vld [vmem:[%s5280_s15 + $0x48] sm:$0xff]  }
0x13d6   : > { %2242 = vmatprep.subr.bf16.mxu1 %v4256_v1  ;;  %3871 = vmatpush3.bf16.msra.mxu0 %v4957_v12 }
0x13d7   : > { %3872 = vmatprep.subr.bf16.mxu0 %v4257_v30 }
0x13d9   : > { %2243 = vmatpush2.bf16.msra.mxu1 %v4515_v13  ;;  %v4964_v13 = vld [vmem:[%s5280_s15 + $0x40] sm:$0xff]  }
0x13da   : > { %2244 = vmatprep.subr.bf16.mxu1 %v4256_v1  ;;  %3873 = vmatpush3.bf16.msra.mxu0 %v4964_v13 }
0x13db   : > { %3878 = vmatprep.subr.bf16.mxu0 %v4257_v30 }
0x13dd   : > { %2245 = vmatpush2.bf16.msra.mxu1 %v4522_v14  ;;  %v4972_v14 = vld [vmem:[%s5279_s14 + $0x1] ss:$0 sm:$0xff] }
0x13de   : > { %3898 = vmatprep.subr.bf16.mxu1 %v4257_v30 }
0x13e0   : > { %2247 = vmatmul.mubr.bf16.vlgmr.msra.gmra.mxu1 %v3595_v26 }
0x13e1   : > { %3900 = vmatprep.mubr.msk.bf16.mxu1 %vm4258_vm2, %v4257_v30 }
0x1470   : > { %v2040_v59 = vpop.f32.mrf.mxu1 }
0x1471   : > { %v2041_v61 = vadd.f32 %v4972_v14, %v2040_v59 }
0x1472   : > { %v3856_v63 = vpop.f32.mrf.mxu1 }
0x1473   : > { %v2046_v3 = vmul.f32 %v2041_v61, %v2041_v61 }
0x1474   : > { %v2043_v7 = vpop.f32.mrf.mxu1 }
0x1475   : > { %v2047_v18 = vmul.f32 %v2046_v3, %v2041_v61 }
0x1476   : > { %v3857_v19 = vpop.f32.mrf.mxu1 }
0x1477   : > { %v2048_v22 = vmul.f32 0.044715, %v2047_v18 }
0x1479   : > { %v2049_v26 = vadd.f32 %v2048_v22, %v2041_v61 }
0x147b   : > { %v2050_v46 = vmul.f32 0.7978846, %v2049_v26 }
0x147d   : > { %4157 = vtanh.f32 %v2050_v46 }
0x148a   : > { %v4158_v47 = vpop.eup %4157 }
0x148b   : > { %v2052_v48 = vadd.f32 1.0, %v4158_v47 }
0x148d   : > { %v2053_v49 = vmul.f32 0.5, %v2052_v48 }
0x148f   : > { %v2054_v51 = vmul.f32 %v2053_v49, %v2041_v61 }
0x1491   : > { %v2072_v54 = vpack.c.bf16 %v2054_v51, %v2054_v51 }
0x1493   : > { %3875 = vmatmul.mubr.bf16.vlgmr.msra.gmra.mxu0 %v2072_v54 }
0x1494   : > { %3879 = vmatpush3.bf16.msra.mxu0 %v4547_v29  ;;  %3882 = vmatprep.mubr.msk.bf16.mxu0 %vm4258_vm2, %v4257_v30 }
0x1495   : > { %3880 = vmatprep.subr.bf16.mxu0 %v4257_v30 }
0x1498   : > { %3881 = vmatpush3.bf16.msra.mxu0 %v4556_v31 }
0x1499   : > { %3886 = vmatprep.subr.bf16.mxu0 %v4257_v30 }
0x14a0   : > { %v2248_v58 = vpop.f32.mrf.mxu1 }
0x14a1   : > { %v2249_v59 = vadd.f32 %v4529_v15, %v2248_v58 }
0x14a2   : > { %v2250_v63 = vpop.f32.mrf.mxu1 }
0x14a3   : > { %v4983_v3 = vadd.f32 %v2249_v59, %v4534_v17 }
0x14a4   : > { %v2251_v61 = vpop.f32.mrf.mxu1 }
0x14a5   : > { %v2255_v29 = vsel %vm932_vm1, %v4983_v3, 0.0 }
0x14a6   : > { %v2252_v7 = vpop.f32.mrf.mxu1  ;;  %2256 = vadd.xlane.f32.xlu1 %v2255_v29 }
0x152f   : > { %v2257_v18 = vpop.xlane.xlu1 %2256 }
0x1530   : > { %v2258_v19 = vmul.f32 0.03125, %v2257_v18 }
0x1532   : > { %v2259_v22 = vsub.f32 %v4983_v3, %v2258_v19 }
0x1534   : > { %v2260_v31 = vmul.f32 %v2259_v22, %v2259_v22 }
0x1536   : > { %v2261_v26 = vsel %vm932_vm1, %v2260_v31, 0.0 }
0x1537   : > { %2262 = vadd.xlane.f32.xlu1 %v2261_v26 }
0x1553   : > { %v4989_v46 = vpop.f32.mrf.mxu0 }
0x1555   : > { %v3876_v15 = vpop.f32.mrf.mxu0 }
0x1557   : > { %v2158_v47 = vpop.f32.mrf.mxu0 }
0x1559   : > { %v3877_v17 = vpop.f32.mrf.mxu0 }
0x15c0   : > { %v2263_v48 = vpop.xlane.xlu1 %2262 }
0x15c1   : > { %v2264_v49 = vmul.f32 0.03125, %v2263_v48 }
0x15c3   : > { %v2265_v51 = vadd.f32 1e-06, %v2264_v49 }
0x15c5   : > { %4159 = vrsqrt.f32 %v2265_v51 }
0x15d2   : > { %v4160_v54 = vpop.eup %4159 }
0x15d3   : > { %v2267_v58 = vmul.f32 %v4160_v54, %v2259_v22 }
0x15d5   : > { %v2268_v59 = vmul.f32 %v4567_v36, %v2267_v58 }
0x15d7   : > { %v2269_v63 = vadd.f32 %v4572_v38, %v2268_v59 }
0x15d9   : > { %v2270_v61 = vpack.c.bf16 %v2269_v63, %v2269_v63 }
0x15db   : > { %3883 = vmatmul.mubr.msk.bf16.vlgmr.msra.gmra.mxu0 %vm985_vm3, %v2270_v61 }
0x15dc   : > { %3888 = vmatprep.mubr.msk.bf16.mxu0 %vm4258_vm2, %v4257_v30 }
0x169b   : > { %v2308_v29 = vpop.f32.mrf.mxu0 }
0x169c   : > { %v2309_v7 = vadd.f32 %v4582_v42, %v2308_v29 }
0x169d   : > { %v3884_v18 = vpop.f32.mrf.mxu0 }
0x169e   : > { %v2314_v19 = vpack.c.bf16 %v2309_v7, %v2309_v7 }
0x169f   : > { %v2311_v31 = vpop.f32.mrf.mxu0 }
0x16a0   : > { %2425 = vrot.lane.b32.xlu0 %v2314_v19, %s5357_s27  ;;  %2316 = vrot.lane.b32.xlu1 %v2314_v19, %s5355_s5 }
0x16a1   : > { %v3885_v22 = vpop.f32.mrf.mxu0 }
0x16a4   : > { %2427 = vrot.lane.b32.xlu1 %v2314_v19, %s5356_s28 }
0x1712   : > { %v2317_v36 = vpop.permute.xlu1 %2316  ;;  %v2426_v42 = vpop.permute.xlu0 %2425 }
0x1713   : > { %v2322_v38 = vsel %vm1033_vm4, %v2317_v36, 0 }
0x1714   : > { %3887 = vmatpush3.bf16.xpose.msra.mxu0 %v2322_v38 }
0x1715   : > { %3892 = vmatprep.subr.bf16.mxu0 %v4257_v30 }
0x1716   : > { %v2428_v26 = vpop.permute.xlu1 %2427 }
0x1717   : > { %v2433_v15 = vsel %vm1033_vm4, %v2428_v26, 0 }
0x1718   : > { %3899 = vmatpush3.bf16.xpose.msra.mxu1 %v2433_v15 }
0x1719   : > { %3910 = vmatprep.subr.bf16.mxu1 %v4257_v30 }
0x171b   : > { %3889 = vmatmul.mubr.msk.bf16.vlgmr.msra.gmra.mxu0 %vm1033_vm4, %v2314_v19 }
0x171c   : > { %3894 = vmatprep.mubr.msk.bf16.mxu0 %vm4258_vm2, %v4257_v30 }
0x171f   : > { %3901 = vmatmul.mubr.msk.bf16.vlgmr.msra.gmra.mxu1 %vm1033_vm4, %v2426_v42 }
0x1720   : > { %3911 = vmatpush3.bf16.msra.mxu1 %v4617_v40  ;;  %3914 = vmatprep.mubr.msk.bf16.mxu1 %vm4258_vm2, %v4257_v30 }
0x1721   : > { %3912 = vmatprep.subr.bf16.mxu1 %v4257_v30 }
0x1724   : > { %3913 = vmatpush3.bf16.msra.mxu1 %v4624_v43 }
0x1725   : > { %3926 = vmatprep.subr.bf16.mxu1 %v4257_v30 }
0x17db   : > { %v2358_v47 = vpop.f32.mrf.mxu0 }
0x17dc   : > { %v2364_v17 = vmul.f32 0.25, %v2358_v47 }
0x17dd   : > { %v3890_v48 = vpop.f32.mrf.mxu0 }
0x17de   : > { %v2365_v49 = vsel %vm1081_vm6, %v2364_v17, -inf }
0x17df   : > { %v2469_v51 = vpop.f32.mrf.mxu1  ;;  %2366 = vmax.xlane.f32.xlu1 %v2365_v49  ;;  %v2361_v54 = vpop.f32.mrf.mxu0 }
0x17e0   : > { %v2475_v58 = vmul.f32 0.25, %v2469_v51 }
0x17e1   : > { %v3891_v59 = vpop.f32.mrf.mxu0  ;;  %v3902_v40 = vpop.f32.mrf.mxu1 }
0x17e2   : > { %v2476_v63 = vsel %vm1081_vm6, %v2475_v58, -inf }
0x17e3   : > { %2477 = vmax.xlane.f32.xlu0 %v2476_v63  ;;  %v2472_v61 = vpop.f32.mrf.mxu1 }
0x17e5   : > { %v3903_v29 = vpop.f32.mrf.mxu1 }
0x17f0   : > { %2375 = vrot.lane.b32.xlu1 %v2314_v19, %s5354_s0 }
0x17f9   : > { %2486 = vrot.lane.b32.xlu0 %v2314_v19, %s5358_s2 }
0x1868   : > { %v2367_v43 = vpop.xlane.xlu1 %2366 }
0x1869   : > { %v2368_v7 = vsub.f32 %v2364_v17, %v2367_v43 }
0x186b   : > { %v2369_v18 = vmul.f32 1.442695, %v2368_v7 }
0x186c   : > { %v2478_v31 = vpop.xlane.xlu0 %2477  ;;  %v2376_v22 = vpop.permute.xlu1 %2375 }
0x186d   : > { %4161 = vpow2.f32 %v2369_v18  ;;  %v2479_v36 = vsub.f32 %v2475_v58, %v2478_v31  ;;  %v2381_v38 = vsel %vm1098_vm5, %v2376_v22, 0 }
0x186e   : > { %3893 = vmatpush3.bf16.msra.mxu0 %v2381_v38 }
0x186f   : > { %v2480_v26 = vmul.f32 1.442695, %v2479_v36  ;;  %3904 = vmatprep.subr.bf16.mxu0 %v4257_v30 }
0x1870   : > { %v2487_v42 = vpop.permute.xlu0 %2486 }
0x1871   : > { %4163 = vpow2.f32 %v2480_v26  ;;  %v2492_v19 = vsel %vm1098_vm5, %v2487_v42, 0 }
0x187a   : > { %v4162_v15 = vpop.eup %4161 }
0x187b   : > { %v2371_v47 = vsel %vm1081_vm6, %v4162_v15, 0.0  ;;  %v2374_v48 = vpack.c.bf16 %v4162_v15, %v4162_v15 }
0x187c   : > { %2372 = vadd.xlane.f32.xlu0 %v2371_v47 }
0x187d   : > { %3895 = vmatmul.mubr.msk.bf16.vlgmr.msra.gmra.mxu0 %vm1094_vm7, %v2374_v48 }
0x187e   : > { %v4164_v17 = vpop.eup %4163  ;;  %3905 = vmatpush3.bf16.msra.mxu0 %v2492_v19  ;;  %3906 = vmatprep.mubr.msk.bf16.mxu0 %vm4258_vm2, %v4257_v30 }
0x187f   : > { %v2482_v49 = vsel %vm1081_vm6, %v4164_v17, 0.0  ;;  %3918 = vmatprep.subr.bf16.mxu0 %v4257_v30  ;;  %v2485_v51 = vpack.c.bf16 %v4164_v17, %v4164_v17 }
0x1880   : > { %2483 = vadd.xlane.f32.xlu1 %v2482_v49 }
0x1885   : > { %3907 = vmatmul.mubr.msk.bf16.vlgmr.msra.gmra.mxu0 %vm1094_vm7, %v2485_v51 }
0x1886   : > { %3919 = vmatpush3.bf16.msra.mxu0 %v4649_v20  ;;  %3922 = vmatprep.mubr.msk.bf16.mxu0 %vm4258_vm2, %v4257_v30 }
0x1887   : > { %3920 = vmatprep.subr.bf16.mxu0 %v4257_v30 }
0x188a   : > { %3921 = vmatpush3.bf16.msra.mxu0 %v4655_v16 }
0x188b   : > { %3946 = vmatprep.subr.bf16.mxu0 %v4257_v30 }
0x1905   : > { %v2373_v31 = vpop.xlane.xlu0 %2372 }
0x1909   : > { %v2484_v54 = vpop.xlane.xlu1 %2483 }
0x190a   : > { %4165 = vrcp.f32 %v2484_v54 }
0x190b   : > { %4167 = vrcp.f32 %v2373_v31 }
0x1917   : > { %v4166_v61 = vpop.eup %4165 }
0x1918   : > { %v4168_v22 = vpop.eup %4167 }
0x193d   : > { %v2417_v58 = vpop.f32.mrf.mxu0 }
0x193e   : > { %v2424_v16 = vmul.f32 %v4168_v22, %v2417_v58 }
0x193f   : > { %v3896_v59 = vpop.f32.mrf.mxu0 }
0x1941   : > { %v2420_v40 = vpop.f32.mrf.mxu0 }
0x1943   : > { %v3897_v63 = vpop.f32.mrf.mxu0 }
0x1945   : > { %v2528_v29 = vpop.f32.mrf.mxu0 }
0x1946   : > { %v2535_v43 = vmul.f32 %v4166_v61, %v2528_v29 }
0x1947   : > { %v3908_v7 = vpop.f32.mrf.mxu0 }
0x1948   : > { %2537 = vrot.lane.b32.xlu1 %v2535_v43, %s5359_s4 }
0x1949   : > { %v2531_v20 = vpop.f32.mrf.mxu0 }
0x194b   : > { %v3909_v18 = vpop.f32.mrf.mxu0 }
0x19ba   : > { %v2538_v36 = vpop.permute.xlu1 %2537 }
0x19bb   : > { %v2540_v38 = vsel %vm1033_vm4, %v2424_v16, %v2538_v36 }
0x19bc   : > { %v2541_v26 = vpack.c.bf16 %v2540_v38, %v2540_v38 }
0x19be   : > { %3915 = vmatmul.mubr.msk.bf16.vlgmr.msra.gmra.mxu1 %vm985_vm3, %v2541_v26 }
0x19bf   : > { %3927 = vmatpush3.bf16.msra.mxu1 %v4678_v32  ;;  %3942 = vmatprep.mubr.msk.bf16.mxu1 %vm4258_vm2, %v4257_v30 }
0x19c0   : > { %3928 = vmatprep.subr.bf16.mxu1 %v4257_v30 }
0x19c3   : > { %3929 = vmatpush3.bf16.msra.mxu1 %v4685_v33 }
0x19c4   : > { %3930 = vmatprep.subr.bf16.mxu1 %v4257_v30 }
0x19c7   : > { %3931 = vmatpush3.bf16.msra.mxu1 %v4692_v34 }
0x19c8   : > { %3932 = vmatprep.subr.bf16.mxu1 %v4257_v30 }
0x19cb   : > { %3933 = vmatpush3.bf16.msra.mxu1 %v4698_v35 }
0x19cc   : > { %3934 = vmatprep.subr.bf16.mxu1 %v4257_v30 }
0x19cf   : > { %3935 = vmatpush3.bf16.msra.mxu1 %v4705_v37 }
0x19d0   : > { %3936 = vmatprep.subr.bf16.mxu1 %v4257_v30 }
0x19d3   : > { %3937 = vmatpush3.bf16.msra.mxu1 %v4712_v39 }
0x19d4   : > { %3938 = vmatprep.subr.bf16.mxu1 %v4257_v30 }
0x19d7   : > { %3939 = vmatpush3.bf16.msra.mxu1 %v4719_v41 }
0x19d8   : > { %3940 = vmatprep.subr.bf16.mxu1 %v4257_v30 }
0x19db   : > { %3941 = vmatpush3.bf16.msra.mxu1 %v4726_v44 }
0x19dc   : > { %3972 = vmatprep.subr.bf16.mxu1 %v4257_v30 }
0x1a7e   : > { %v2579_v32 = vpop.f32.mrf.mxu1 }
0x1a7f   : > { %v2585_v33 = vadd.f32 %v2579_v32, %v4983_v3 }
0x1a80   : > { %v3916_v34 = vpop.f32.mrf.mxu1 }
0x1a81   : > { %v2586_v35 = vadd.f32 %v4636_v57, %v2585_v33 }
0x1a82   : > { %v2582_v37 = vpop.f32.mrf.mxu1 }
0x1a83   : > { %v2587_v15 = vsel %vm932_vm1, %v2586_v35, 0.0 }
0x1a84   : > { %2588 = vadd.xlane.f32.xlu0 %v2587_v15  ;;  %v3917_v39 = vpop.f32.mrf.mxu1 }
0x1b0d   : > { %v2589_v42 = vpop.xlane.xlu0 %2588 }
0x1b0e   : > { %v2590_v47 = vmul.f32 0.03125, %v2589_v42 }
0x1b10   : > { %v2591_v41 = vsub.f32 %v2586_v35, %v2590_v47 }
0x1b12   : > { %v2592_v48 = vmul.f32 %v2591_v41, %v2591_v41 }
0x1b14   : > { %v2593_v19 = vsel %vm932_vm1, %v2592_v48, 0.0 }
0x1b15   : > { %2594 = vadd.xlane.f32.xlu1 %v2593_v19 }
0x1b9e   : > { %v2595_v44 = vpop.xlane.xlu1 %2594 }
0x1b9f   : > { %v2596_v17 = vmul.f32 0.03125, %v2595_v44 }
0x1ba1   : > { %v2597_v49 = vadd.f32 1e-06, %v2596_v17 }
0x1ba3   : > { %4169 = vrsqrt.f32 %v2597_v49 }
0x1bb0   : > { %v4170_v3 = vpop.eup %4169 }
0x1bb1   : > { %v2599_v51 = vmul.f32 %v4170_v3, %v2591_v41 }
0x1bb3   : > { %v2600_v57 = vmul.f32 %v4663_v23, %v2599_v51 }
0x1bb5   : > { %v2601_v54 = vadd.f32 %v4668_v25, %v2600_v57 }
0x1bb7   : > { %v2602_v58 = vpack.c.bf16 %v2601_v54, %v2601_v54 }
0x1bb9   : > { %3923 = vmatmul.mubr.msk.bf16.vlgmr.msra.gmra.mxu0 %vm985_vm3, %v2602_v58 }
0x1bba   : > { %3947 = vmatpush3.bf16.msra.mxu0 %v4755_v60  ;;  %3950 = vmatprep.mubr.msk.bf16.mxu0 %vm4258_vm2, %v4257_v30 }
0x1bbb   : > { %3948 = vmatprep.subr.bf16.mxu0 %v4257_v30 }
0x1bbe   : > { %3949 = vmatpush3.bf16.msra.mxu0 %v4761_v28 }
0x1bbf   : > { %3954 = vmatprep.subr.bf16.mxu0 %v4257_v30 }
0x1c79   : > { %v2640_v59 = vpop.f32.mrf.mxu0 }
0x1c7a   : > { %v2641_v40 = vadd.f32 %v4734_v45, %v2640_v59 }
0x1c7b   : > { %v3924_v23 = vpop.f32.mrf.mxu0 }
0x1c7c   : > { %v2646_v63 = vmul.f32 %v2641_v40, %v2641_v40 }
0x1c7d   : > { %v2643_v25 = vpop.f32.mrf.mxu0 }
0x1c7e   : > { %v2647_v61 = vmul.f32 %v2646_v63, %v2641_v40 }
0x1c7f   : > { %v3925_v29 = vpop.f32.mrf.mxu0 }
0x1c80   : > { %v2648_v43 = vmul.f32 0.044715, %v2647_v61 }
0x1c82   : > { %v2649_v7 = vadd.f32 %v2648_v43, %v2641_v40 }
0x1c84   : > { %v2650_v60 = vmul.f32 0.7978846, %v2649_v7 }
0x1c86   : > { %4171 = vtanh.f32 %v2650_v60 }
0x1c93   : > { %v4172_v20 = vpop.eup %4171 }
0x1c94   : > { %v2652_v18 = vadd.f32 1.0, %v4172_v20 }
0x1c96   : > { %v2653_v31 = vmul.f32 0.5, %v2652_v18 }
0x1c98   : > { %v2654_v22 = vmul.f32 %v2653_v31, %v2641_v40 }
0x1c9a   : > { %v2655_v16 = vpack.c.bf16 %v2654_v22, %v2654_v22 }
0x1c9c   : > { %3943 = vmatmul.mubr.bf16.vlgmr.msra.gmra.mxu1 %v2655_v16 }
0x1c9d   : > { %3974 = vmatprep.mubr.msk.bf16.mxu1 %vm4258_vm2, %v4257_v30 }
0x1d5c   : > { %v2690_v28 = vpop.f32.mrf.mxu1 }
0x1d5d   : > { %v2696_v45 = vadd.f32 %v2690_v28, %v2586_v35 }
0x1d5e   : > { %v3944_v36 = vpop.f32.mrf.mxu1 }
0x1d5f   : > { %v5072_v38 = vadd.f32 %v4742_v0, %v2696_v45 }
0x1d60   : > { %v2693_v26 = vpop.f32.mrf.mxu1 }
0x1d61   : > { %v2698_v32 = vsel %vm932_vm1, %v5072_v38, 0.0 }
0x1d62   : > { %2699 = vadd.xlane.f32.xlu0 %v2698_v32  ;;  %v3945_v33 = vpop.f32.mrf.mxu1 }
0x1deb   : > { %v2700_v34 = vpop.xlane.xlu0 %2699 }
0x1dec   : > { %v2701_v37 = vmul.f32 0.03125, %v2700_v34 }
0x1dee   : > { %v2702_v15 = vsub.f32 %v5072_v38, %v2701_v37 }
0x1df0   : > { %v2703_v39 = vmul.f32 %v2702_v15, %v2702_v15 }
0x1df2   : > { %v2704_v42 = vsel %vm932_vm1, %v2703_v39, 0.0 }
0x1df3   : > { %2705 = vadd.xlane.f32.xlu0 %v2704_v42 }
0x1e7c   : > { %v2706_v47 = vpop.xlane.xlu0 %2705 }
0x1e7d   : > { %v2707_v35 = vmul.f32 0.03125, %v2706_v47 }
0x1e7f   : > { %v2708_v41 = vadd.f32 1e-06, %v2707_v35 }
0x1e81   : > { %4173 = vrsqrt.f32 %v2708_v41 }
0x1e8e   : > { %v4174_v0 = vpop.eup %4173 }
0x1e8f   : > { %v2710_v48 = vmul.f32 %v4174_v0, %v2702_v15 }
0x1e91   : > { %v2711_v19 = vmul.f32 %v4769_v50, %v2710_v48 }
0x1e93   : > { %v2712_v44 = vadd.f32 %v4774_v52, %v2711_v19 }
0x1e95   : > { %v2713_v17 = vpack.c.bf16 %v2712_v44, %v2712_v44 }
0x1e97   : > { %3951 = vmatmul.mubr.msk.bf16.vlgmr.msra.gmra.mxu0 %vm985_vm3, %v2713_v17 }
0x1e98   : > { %3956 = vmatprep.mubr.msk.bf16.mxu0 %vm4258_vm2, %v4257_v30 }
0x1f57   : > { %v2751_v49 = vpop.f32.mrf.mxu0 }
0x1f58   : > { %v2752_v3 = vadd.f32 %v4784_v56, %v2751_v49 }
0x1f59   : > { %v3952_v51 = vpop.f32.mrf.mxu0 }
0x1f5a   : > { %v2757_v57 = vpack.c.bf16 %v2752_v3, %v2752_v3 }
0x1f5b   : > { %v2754_v54 = vpop.f32.mrf.mxu0 }
0x1f5c   : > { %2818 = vrot.lane.b32.xlu1 %v2757_v57, %s5354_s0  ;;  %2759 = vrot.lane.b32.xlu0 %v2757_v57, %s5355_s5  ;;  %s5363_s5 = sld [smem:[#allocation24_spill]] }
0x1f5d   : > { %v3953_v58 = vpop.f32.mrf.mxu0 }
0x1f60   : > { %2870 = vrot.lane.b32.xlu1 %v2757_v57, %s5356_s28 }
0x1f62   : > { %s5224_s28 = scalar_lea.hbm %s5363_s5, %s3627_s13 }
0x1f64   : > { %2868 = vrot.lane.b32.xlu1 %v2757_v57, %s5357_s27  ;;  %s3632_s27 = sshll.u32 %s4450_s7, 3 }
0x1f65   : > { %s768_s8 = scalar_lea.vmem %s5288_s23, %s3632_s27 }
0x1fce   : > { %v2760_v50 = vpop.permute.xlu0 %2759  ;;  %v2819_v59 = vpop.permute.xlu1 %2818 }
0x1fcf   : > { %v2765_v52 = vsel %vm1033_vm4, %v2760_v50, 0  ;;  %v2824_v56 = vsel %vm1098_vm5, %v2819_v59, 0 }
0x1fd0   : > { %3955 = vmatpush3.bf16.xpose.msra.mxu0 %v2765_v52 }
0x1fd1   : > { %3960 = vmatprep.subr.bf16.mxu0 %v4257_v30 }
0x1fd2   : > { %v2871_v22 = vpop.permute.xlu1 %2870 }
0x1fd3   : > { %v2876_v28 = vsel %vm1033_vm4, %v2871_v22, 0 }
0x1fd6   : > { %v2869_v45 = vpop.permute.xlu1 %2868 }
0x1fd7   : > { %3957 = vmatmul.mubr.msk.bf16.vlgmr.msra.gmra.mxu0 %vm1033_vm4, %v2757_v57 }
0x1fd8   : > { %3961 = vmatpush3.bf16.msra.mxu0 %v2824_v56  ;;  %3962 = vmatprep.mubr.msk.bf16.mxu0 %vm4258_vm2, %v4257_v30 }
0x1fd9   : > { %3966 = vmatprep.subr.bf16.mxu0 %v4257_v30 }
0x2097   : > { %v2801_v40 = vpop.f32.mrf.mxu0 }
0x2098   : > { %v2807_v23 = vmul.f32 0.25, %v2801_v40 }
0x2099   : > { %v3958_v63 = vpop.f32.mrf.mxu0 }
0x209a   : > { %v2808_v25 = vsel %vm1081_vm6, %v2807_v23, -inf }
0x209b   : > { %2809 = vmax.xlane.f32.xlu0 %v2808_v25  ;;  %v2804_v61 = vpop.f32.mrf.mxu0 }
0x209d   : > { %v3959_v29 = vpop.f32.mrf.mxu0 }
0x20b1   : > { %2929 = vrot.lane.b32.xlu0 %v2757_v57, %s5358_s2  ;;  %s5364_s2 = smov %s5363_s5 }
0x2124   : > { %v2810_v43 = vpop.xlane.xlu0 %2809 }
0x2125   : > { %v2811_v7 = vsub.f32 %v2807_v23, %v2810_v43 }
0x2127   : > { %v2812_v60 = vmul.f32 1.442695, %v2811_v7 }
0x2128   : > { %v2930_v20 = vpop.permute.xlu0 %2929 }
0x2129   : > { %4175 = vpow2.f32 %v2812_v60  ;;  %v2935_v18 = vsel %vm1098_vm5, %v2930_v20, 0 }
0x212a   : > { %3973 = vmatpush3.bf16.msra.mxu1 %v2935_v18 }
0x212b   : > { %3986 = vmatprep.subr.bf16.mxu1 %v4257_v30 }
0x2136   : > { %v4176_v31 = vpop.eup %4175 }
0x2137   : > { %v2817_v16 = vpack.c.bf16 %v4176_v31, %v4176_v31  ;;  %v2814_v47 = vsel %vm1081_vm6, %v4176_v31, 0.0 }
0x2139   : > { %3963 = vmatmul.mubr.msk.bf16.vlgmr.msra.gmra.mxu0 %vm1094_vm7, %v2817_v16 }
0x213a   : > { %3967 = vmatpush3.bf16.xpose.msra.mxu0 %v2876_v28  ;;  %3968 = vmatprep.mubr.msk.bf16.mxu0 %vm4258_vm2, %v4257_v30 }
0x213b   : > { %3978 = vmatprep.subr.bf16.mxu0 %v4257_v30 }
0x2141   : > { %3969 = vmatmul.mubr.msk.bf16.vlgmr.msra.gmra.mxu0 %vm1033_vm4, %v2869_v45 }
0x2142   : > { %3979 = vmatpush3.bf16.msra.mxu0 %v4819_v53  ;;  %3982 = vmatprep.mubr.msk.bf16.mxu0 %vm4258_vm2, %v4257_v30 }
0x2143   : > { %3980 = vmatprep.subr.bf16.mxu0 %v4257_v30 }
0x2146   : > { %3981 = vmatpush3.bf16.msra.mxu0 %v4826_v55 }
0x2147   : > { %3994 = vmatprep.subr.bf16.mxu0 %v4257_v30 }
0x21f9   : > { %v2860_v36 = vpop.f32.mrf.mxu0 }
0x21fb   : > { %v3964_v26 = vpop.f32.mrf.mxu0 }
0x21fd   : > { %v2863_v32 = vpop.f32.mrf.mxu0 }
0x21ff   : > { %v3965_v33 = vpop.f32.mrf.mxu0 }
0x2201   : > { %v2912_v34 = vpop.f32.mrf.mxu0 }
0x2202   : > { %v2918_v37 = vmul.f32 0.25, %v2912_v34 }
0x2203   : > { %v3970_v15 = vpop.f32.mrf.mxu0 }
0x2204   : > { %v2919_v39 = vsel %vm1081_vm6, %v2918_v37, -inf }
0x2205   : > { %2920 = vmax.xlane.f32.xlu1 %v2919_v39  ;;  %v2915_v53 = vpop.f32.mrf.mxu0 }
0x2206   : > { %v3592_v53 = vld [vmem:[%s5281_s16 + $0x1] ss:$0 sm:$0xff] }
0x2207   : > { %v3971_v42 = vpop.f32.mrf.mxu0 }
0x2209   : > { %2815 = vadd.xlane.f32.xlu1 %v2814_v47 }
0x228e   : > { %v2921_v35 = vpop.xlane.xlu1 %2920 }
0x228f   : > { %v2922_v41 = vsub.f32 %v2918_v37, %v2921_v35 }
0x2291   : > { %v2923_v55 = vmul.f32 1.442695, %v2922_v41 }
0x2292   : > { %v2816_v58 = vpop.xlane.xlu1 %2815 }
0x2293   : > { %4177 = vpow2.f32 %v2923_v55 }
0x22a0   : > { %v4178_v0 = vpop.eup %4177 }
0x22a1   : > { %v2925_v48 = vsel %vm1081_vm6, %v4178_v0, 0.0  ;;  %v2928_v19 = vpack.c.bf16 %v4178_v0, %v4178_v0 }
0x22a2   : > { %2926 = vadd.xlane.f32.xlu0 %v2925_v48 }
0x22a3   : > { %3975 = vmatmul.mubr.msk.bf16.vlgmr.msra.gmra.mxu1 %vm1094_vm7, %v2928_v19 }
0x22a4   : > { %3987 = vmatpush3.bf16.msra.mxu1 %v4851_v5  ;;  %3990 = vmatprep.mubr.msk.bf16.mxu1 %vm4258_vm2, %v4257_v30 }
0x22a5   : > { %3988 = vmatprep.subr.bf16.mxu1 %v4257_v30 }
0x22a8   : > { %3989 = vmatpush3.bf16.msra.mxu1 %v4857_v2 }
0x232b   : > { %v2927_v44 = vpop.xlane.xlu0 %2926 }
0x232c   : > { %4179 = vrcp.f32 %v2927_v44 }
0x232d   : > { %4181 = vrcp.f32 %v2816_v58  ;;  %v4117_v58 = vld [vmem:[%s5284_s19 + $0x34] ss:$8 sps:$4 sm:$0xff]  }
0x232e   : > { %3233 = vmatprep.subr.bf16.mxu1 %v4117_v58 }
0x2339   : > { %v4180_v17 = vpop.eup %4179 }
0x233a   : > { %v4182_v5 = vpop.eup %4181 }
0x233b   : > { %v2867_v50 = vmul.f32 %v4182_v5, %v2860_v36  ;;  %v4120_v5 = vld [vmem:[%s5284_s19 + $0x24] ss:$8 sps:$4 sm:$0xff]  }
0x2363   : > { %v2971_v49 = vpop.f32.mrf.mxu1 }
0x2364   : > { %v2978_v3 = vmul.f32 %v4180_v17, %v2971_v49 }
0x2365   : > { %v3976_v51 = vpop.f32.mrf.mxu1 }
0x2366   : > { %2980 = vrot.lane.b32.xlu1 %v2978_v3, %s5359_s4  ;;  %s4266_s4 = smov [#allocation2]  }
0x2367   : > { %v2974_v57 = vpop.f32.mrf.mxu1 }
0x2369   : > { %v3977_v54 = vpop.f32.mrf.mxu1 }
0x236a   : > { %v4115_v54 = vld [vmem:[%s5284_s19 + $0x30] ss:$8 sps:$4 sm:$0xff]  }
0x23d8   : > { %v2981_v52 = vpop.permute.xlu1 %2980 }
0x23d9   : > { %v2983_v59 = vsel %vm1033_vm4, %v2867_v50, %v2981_v52  ;;  %v4118_v50 = vld [vmem:[%s5284_s19 + $0x20] ss:$8 sps:$4 sm:$0xff]   ;;  %v4123_v52 = vld [vmem:[%s5284_s19 + $0x14] ss:$8 sps:$4 sm:$0xff]  }
0x23da   : > { %v2984_v56 = vpack.c.bf16 %v2983_v59, %v2983_v59  ;;  %v4121_v59 = vld [vmem:[%s5284_s19 + $0x10] ss:$8 sps:$4 sm:$0xff]  }
0x23dc   : > { %3983 = vmatmul.mubr.msk.bf16.vlgmr.msra.gmra.mxu0 %vm985_vm3, %v2984_v56  ;;  %v4126_v56 = vld [vmem:[%s5284_s19 + $0x4] ss:$8 sps:$4 sm:$0xff]  }
0x23dd   : > { %3995 = vmatpush3.bf16.msra.mxu0 %v4916_v4  ;;  %4010 = vmatprep.mubr.msk.bf16.mxu0 %vm4258_vm2, %v4257_v30 }
0x23de   : > { %3996 = vmatprep.subr.bf16.mxu0 %v4257_v30 }
0x23e1   : > { %3997 = vmatpush3.bf16.msra.mxu0 %v4923_v6 }
0x23e2   : > { %3998 = vmatprep.subr.bf16.mxu0 %v4257_v30 }
0x23e5   : > { %3999 = vmatpush3.bf16.msra.mxu0 %v4930_v8 }
0x23e6   : > { %4000 = vmatprep.subr.bf16.mxu0 %v4257_v30 }
0x23e9   : > { %4001 = vmatpush3.bf16.msra.mxu0 %v4936_v9 }
0x23ea   : > { %4002 = vmatprep.subr.bf16.mxu0 %v4257_v30 }
0x23ed   : > { %4003 = vmatpush3.bf16.msra.mxu0 %v4943_v10 }
0x23ee   : > { %4004 = vmatprep.subr.bf16.mxu0 %v4257_v30 }
0x23f1   : > { %4005 = vmatpush3.bf16.msra.mxu0 %v4950_v11 }
0x23f2   : > { %4006 = vmatprep.subr.bf16.mxu0 %v4257_v30 }
0x23f5   : > { %4007 = vmatpush3.bf16.msra.mxu0 %v4957_v12 }
0x23f6   : > { %4008 = vmatprep.subr.bf16.mxu0 %v4257_v30 }
0x23f9   : > { %4009 = vmatpush3.bf16.msra.mxu0 %v4964_v13 }
0x249c   : > { %v3022_v2 = vpop.f32.mrf.mxu0 }
0x249d   : > { %v3028_v4 = vadd.f32 %v3022_v2, %v5072_v38  ;;  %v4124_v2 = vld [vmem:[%s5284_s19] ss:$8 sps:$4 sm:$0xff]  }
0x249e   : > { %v3984_v6 = vpop.f32.mrf.mxu0 }
0x249f   : > { %v3029_v8 = vadd.f32 %v4838_v27, %v3028_v4 }
0x24a0   : > { %v3025_v9 = vpop.f32.mrf.mxu0 }
0x24a1   : > { %v3030_v10 = vsel %vm932_vm1, %v3029_v8, 0.0 }
0x24a2   : > { %3031 = vadd.xlane.f32.xlu0 %v3030_v10  ;;  %v3985_v40 = vpop.f32.mrf.mxu0 }
0x252b   : > { %v3032_v11 = vpop.xlane.xlu0 %3031 }
0x252c   : > { %v3033_v23 = vmul.f32 0.03125, %v3032_v11 }
0x252e   : > { %v3034_v63 = vsub.f32 %v3029_v8, %v3033_v23  ;;  %v3593_v23 = vld [vmem:[%s5282_s17] ss:$0 sm:$0xff] }
0x2530   : > { %v3035_v25 = vmul.f32 %v3034_v63, %v3034_v63 }
0x2532   : > { %v3036_v12 = vsel %vm932_vm1, %v3035_v25, 0.0  ;;  %v3594_v25 = vld [vmem:[%s5283_s18] ss:$0 sm:$0xff] }
0x2533   : > { %3037 = vadd.xlane.f32.xlu1 %v3036_v12 }
0x25bc   : > { %v3038_v61 = vpop.xlane.xlu1 %3037 }
0x25bd   : > { %v3039_v13 = vmul.f32 0.03125, %v3038_v61 }
0x25bf   : > { %v3040_v29 = vadd.f32 1e-06, %v3039_v13 }
0x25c1   : > { %4183 = vrsqrt.f32 %v3040_v29 }
0x25ce   : > { %v4184_v38 = vpop.eup %4183 }
0x25cf   : > { %v3042_v43 = vmul.f32 %v4184_v38, %v3034_v63 }
0x25d1   : > { %v3043_v27 = vmul.f32 %v4870_v21, %v3042_v43 }
0x25d3   : > { %v3044_v7 = vadd.f32 %v4875_v24, %v3043_v27 }
0x25d5   : > { %v3045_v60 = vpack.c.bf16 %v3044_v7, %v3044_v7 }
0x25d7   : > { %3991 = vmatmul.mubr.msk.bf16.vlgmr.msra.gmra.mxu1 %vm985_vm3, %v3045_v60  ;;  %v4127_v60 = vld [vmem:[%s5286_s21 + $0x18] sm:$0xff]  }
0x25d8   : > { %3257 = vmatprep.mubr.bf16.mxu1 %v4256_v1  ;;  %v2161_v1 = vadd.f32 %v4989_v46, %v4842_v62  ;;  %3234 = vmatpush1.bf16.msra.mxu1 %v4115_v54 }
0x25d9   : > { %3235 = vmatprep.subr.bf16.mxu1 %v4120_v5 }
0x25da   : > { %v2170_v41 = vadd.f32 %v3592_v53, %v2161_v1 }
0x25dc   : > { %v2173_v0 = vsel %vm932_vm1, %v2170_v41, 0.0  ;;  %3236 = vmatpush1.bf16.msra.mxu1 %v4118_v50 }
0x25dd   : > { %3237 = vmatprep.subr.bf16.mxu1 %v4123_v52 }
0x25e0   : > { %3238 = vmatpush1.bf16.msra.mxu1 %v4121_v59 }
0x25e1   : > { %3239 = vmatprep.subr.bf16.mxu1 %v4126_v56 }
0x25e4   : > { %3240 = vmatpush1.bf16.msra.mxu1 %v4124_v2 }
0x25e5   : > { %4014 = vmatprep.subr.bf16.mxu1 %v4257_v30 }
0x2697   : > { %v3083_v20 = vpop.f32.mrf.mxu1 }
0x2698   : > { %v3084_v18 = vadd.f32 %v4972_v14, %v3083_v20 }
0x2699   : > { %v3992_v31 = vpop.f32.mrf.mxu1 }
0x269a   : > { %v3089_v22 = vmul.f32 %v3084_v18, %v3084_v18  ;;  %v4129_v31 = vld [vmem:[%s5286_s21 + $0x8] sm:$0xff]  }
0x269b   : > { %v3086_v16 = vpop.f32.mrf.mxu1 }
0x269c   : > { %v3090_v28 = vmul.f32 %v3089_v22, %v3084_v18  ;;  %v4130_v22 = vld [vmem:[%s5286_s21] sm:$0xff]   ;;  %v3172_v16 = vlaneseq }
0x269d   : > { %v3993_v45 = vpop.f32.mrf.mxu1 }
0x269e   : > { %v3091_v36 = vmul.f32 0.044715, %v3090_v28  ;;  %v3173_v28 = vshrl.u32 %v3172_v16, 7 }
0x26a0   : > { %v3092_v26 = vadd.f32 %v3091_v36, %v3084_v18  ;;  %v3174_v45 = vsub.s32 0, %v3173_v28  ;;  %v3178_v36 = vsub.s32 1, %v3173_v28 }
0x26a2   : > { %v3093_v32 = vmul.f32 0.7978846, %v3092_v26  ;;  %v3170_v26 = vld [vmem:[%s5285_s20] sm:$0x3] }
0x26a4   : > { %4185 = vtanh.f32 %v3093_v32  ;;  %v3175_v32 = vrot.slane %v3170_v26, %v3174_v45 }
0x26b1   : > { %v4186_v21 = vpop.eup %4185 }
0x26b2   : > { %v3095_v33 = vadd.f32 1.0, %v4186_v21  ;;  %v3179_v21 = vrot.slane %v3170_v26, %v3178_v36 }
0x26b4   : > { %v3096_v24 = vmul.f32 0.5, %v3095_v33 }
0x26b6   : > { %v3097_v34 = vmul.f32 %v3096_v24, %v3084_v18  ;;  %v4128_v18 = vld [vmem:[%s5286_s21 + $0x10] sm:$0xff]  }
0x26b8   : > { %v3098_v37 = vpack.c.bf16 %v3097_v34, %v3097_v34 }
0x26ba   : > { %4011 = vmatmul.mubr.bf16.vlgmr.msra.gmra.mxu0 %v3098_v37 }
0x277a   : > { %v3133_v15 = vpop.f32.mrf.mxu0 }
0x277b   : > { %v3139_v14 = vadd.f32 %v3133_v15, %v3029_v8 }
0x277c   : > { %v4012_v39 = vpop.f32.mrf.mxu0 }
0x277d   : > { %v3140_v42 = vadd.f32 %v3592_v53, %v3139_v14  ;;  %v3620_v14 = vld [vmem:[%s5287_s22] ss:$0 sm:$0xff] }
0x277e   : > { %v3136_v47 = vpop.f32.mrf.mxu0 }
0x277f   : > { %v3141_v35 = vsel %vm932_vm1, %v3140_v42, 0.0 }
0x2780   : > { %3142 = vadd.xlane.f32.xlu0 %v3141_v35  ;;  %v4013_v55 = vpop.f32.mrf.mxu0 }
0x2784   : > { %2174 = vadd.xlane.f32.xlu0 %v2173_v0 }
0x2809   : > { %v3143_v48 = vpop.xlane.xlu0 %3142 }
0x280a   : > { %v3144_v19 = vmul.f32 0.03125, %v3143_v48 }
0x280c   : > { %v3145_v44 = vsub.f32 %v3140_v42, %v3144_v19 }
0x280d   : > { %v2175_v62 = vpop.xlane.xlu0 %2174 }
0x280e   : > { %v2176_v46 = vmul.f32 0.03125, %v2175_v62  ;;  %v3146_v17 = vmul.f32 %v3145_v44, %v3145_v44 }
0x2810   : > { %v2177_v49 = vsub.f32 %v2170_v41, %v2176_v46  ;;  %v3147_v3 = vsel %vm932_vm1, %v3146_v17, 0.0 }
0x2811   : > { %3148 = vadd.xlane.f32.xlu0 %v3147_v3 }
0x2812   : > { %v2178_v51 = vmul.f32 %v2177_v49, %v2177_v49 }
0x2814   : > { %v2179_v57 = vsel %vm932_vm1, %v2178_v51, 0.0 }
0x2815   : > { %2180 = vadd.xlane.f32.xlu0 %v2179_v57 }
0x289a   : > { %v3149_v4 = vpop.xlane.xlu0 %3148 }
0x289b   : > { %v3150_v6 = vmul.f32 0.03125, %v3149_v4 }
0x289d   : > { %v3151_v8 = vadd.f32 1e-06, %v3150_v6 }
0x289e   : > { %v2181_v9 = vpop.xlane.xlu0 %2180 }
0x289f   : > { %4187 = vrsqrt.f32 %v3151_v8  ;;  %v2182_v10 = vmul.f32 0.03125, %v2181_v9 }
0x28a1   : > { %v2183_v40 = vadd.f32 1e-06, %v2182_v10 }
0x28a3   : > { %4189 = vrsqrt.f32 %v2183_v40 }
0x28ac   : > { %v4188_v11 = vpop.eup %4187 }
0x28ad   : > { %v3153_v63 = vmul.f32 %v4188_v11, %v3145_v44 }
0x28af   : > { %v3154_v12 = vmul.f32 %v3593_v23, %v3153_v63 }
0x28b0   : > { %v4190_v61 = vpop.eup %4189 }
0x28b1   : > { %v3155_v13 = vadd.f32 %v3594_v25, %v3154_v12  ;;  %v2185_v29 = vmul.f32 %v4190_v61, %v2177_v49 }
0x28b3   : > { %3157 = vrot.lane.b32.xlu0 %v3155_v13, %s4265_s9  ;;  %v2192_v38 = vmul.f32 %v3593_v23, %v2185_v29  ;;  %s751_s9 = sand.u32 1, %s4246_s26  }
0x28b4   : > { %s3477_s25 = sshll.u32 %s751_s9, 2  ;;  %s3361_s27 = scalar_lea.sflag [#allocation3], %s751_s9 }
0x28b5   : > { %v2199_v43 = vadd.f32 %v3594_v25, %v2192_v38  ;;  %s753_s3 = scalar_lea.vmem [#allocation2], %s3477_s25 }
0x28b6   : > { %s3377_s24 = sshll.u32 %s753_s3, 4  ;;  %s5226_s24 = int_to_ptr.vmem [resolvable:$true] %s3377_s24 }
0x28b7   : > { %s4194_s6 = scalar_lea.vmem %s5226_s24, 64 }
0x28b8   : > { %p4195_p11 = scmp.ne.s32.totalorder %s5226_s24, %s4194_s6 }
0x28ba   : > { %p4196_p12 = pnand %p4195_p11, %p4430_p5 }
0x28bc   : > { %p4197_p13 = pneg %p4196_p12 }
0x2925   : > { %v3158_v27 = vpop.permute.xlu0 %3157 }
0x2926   : > { %v3160_v7 = vsel %vm985_vm3, %v2199_v43, %v3158_v27 }
0x2927   : > { %v3169_v20 = vpack.c.bf16 %v3160_v7, %v3160_v7 }
0x2929   : > { %3619 = vmatmul.mubr.msk.bf16.vlgmr.msra.gmra.mxu1 %vm884_vm0, %v3169_v20 }
0x292a   : > { %4015 = vmatpush3.bf16.msra.mxu1 %v4127_v60  ;;  %4022 = vmatprep.mubr.msk.bf16.mxu1 %vm4258_vm2, %v4257_v30 }
0x292b   : > { %4016 = vmatprep.subr.bf16.mxu1 %v4257_v30 }
0x292e   : > { %4017 = vmatpush3.bf16.msra.mxu1 %v4128_v18 }
0x292f   : > { %4018 = vmatprep.subr.bf16.mxu1 %v4257_v30 }
0x2932   : > { %4019 = vmatpush3.bf16.msra.mxu1 %v4129_v31 }
0x2933   : > { %4020 = vmatprep.subr.bf16.mxu1 %v4257_v30 }
0x2936   : > { %4021 = vmatpush3.bf16.msra.mxu1 %v4130_v22 }
0x2939   : > { %4023 = vmatmul.mubr.msk.bf16.vlgmr.msra.gmra.mxu1 %vm884_vm0, %v3169_v20 }
0x29e9   : > { %v3259_v33 = vpop.f32.mrf.mxu1 }
0x29ea   : > { %v3260_v24 = vadd.f32 %v3259_v33, %v3175_v32 }
0x29eb   : > { %v3261_v30 = vpop.f32.mrf.mxu1 }
0x29ec   : > { %v3262_v34 = vadd.f32 %v3261_v30, %v3179_v21 }
0x29ed   : > { %v3263_v37 = vpop.f32.mrf.mxu1 }
0x29ee   : > { %v3268_v15 = vcombine.low %v3260_v24, %v3262_v34 }
0x29ef   : > { %v3264_v1 = vpop.f32.mrf.mxu1 }
0x29f0   : > { %3273 = vst.msk [vmem:[%s768_s8] sm:$0xff] %vm3272_vm10, %v3268_v15  ;;  %s4198_s8 = sshll.u32 %s4266_s4, 4  ;;  %s4199_s8 = int_to_ptr.vmem [resolvable:$false] %s4198_s8 }
0x29f1   : > { %s4200_s25 = scalar_lea.vmem %s4199_s8, 128  ;;  %p4201_p0 = scmp.lt.s32.totalorder %s5226_s24, %s4199_s8 }
0x29f2   : > { %p4202_p1 = scmp.lt.s32.totalorder %s4200_s25, %s4194_s6 }
0x29f4   : > { %p4203_p2 = por %p4202_p1, %p4201_p0 }
0x29f6   : > { %p4204_p3 = pnand %p4203_p2, %p4197_p13 }
0x29f9   : > { %v3347_v39 = vpop.f32.mrf.mxu1 }
0x29fa   : > { %v3348_v53 = vadd.f32 %v3620_v14, %v3347_v39 }
0x29fb   : > { %v4024_v42 = vpop.f32.mrf.mxu1 }
0x29fc   : > { %3354 = vst.msk [vmem:[%s753_s3] sm:$0xf] %vm3353_vm11, %v3348_v53 }
0x29fd   : > { %v3350_v47 = vpop.f32.mrf.mxu1 }
0x29fe   : > { %4207 = shalt.err (!%p4204_p3)
}
0x29ff   : > { %s4208_s10 = scalar_lea.hbm %s5224_s28, 64  ;;  %s4212_s13 = scalar_lea.hbm %s5364_s2, 128 }
0x2a00   : > { %p4209_p4 = scmp.ne.s32.totalorder %s5224_s28, %s4208_s10  ;;  %p4213_p9 = scmp.lt.s32.totalorder %s5224_s28, %s5364_s2 }
0x2a01   : > { %p4214_p10 = scmp.lt.s32.totalorder %s4212_s13, %s4208_s10 }
0x2a02   : > { %p4210_p7 = pnand %p4209_p4, %p4430_p5 }
0x2a03   : > { %p4215_p11 = por %p4214_p10, %p4213_p9 }
0x2a04   : > { %p4211_p8 = pneg %p4210_p7 }
0x2a06   : > { %p4216_p12 = pnand %p4215_p11, %p4211_p8 }
0x2a08   : > { %4219 = shalt.err (!%p4216_p12)
}
0x2a09   : > { %4026 = dma.vmem_to_hbm [thread:$0]  (%p4430_p5), %s5226_s24, 64, %s5224_s28, %s3361_s27   ;;  %v4025_v35 = vpop.f32.mrf.mxu1 }
0x2a0a PF: > { %s5365_s0 = sld [smem:[#allocation7_spill]] }
0x2a0b   : > { %s5366_s5 = sld [smem:[#allocation5_spill]] }
0x2a10   : > { %p4032_p13 = scmp.ge.s32.totalorder %s5365_s0, 2 }
0x2a11   : > { %s3397_s4 = sand.u32 1, %s5366_s5  }
0x2a12   : > { %p4029_p0 = pnand %p4032_p13, %p4434_p6  ;;  %s3398_s8 = scalar_lea.sflag [#allocation3], %s3397_s4 }
0x2a14   : > { %p4030_p1 = pneg %p4029_p0 }
0x2a16   : > { %4237 = dma.done.wait (%p4030_p1), %s3398_s8, 64  }
0x2a17   : > { %4239 = vsyncadd (%p4030_p1), %s3398_s8, 4294967232  ;;  %s5368_s28 = sld [smem:[#allocation8_spill]]  ;;  %s5371_s5 = smov %s4246_s26 }
0x2a18   : > { %s5369_s25 = sld [smem:[#allocation6_spill]] }
0x2a19   : > { %s5370_s27 = sld [smem:[#allocation9_spill]] }
0x2a1d   : > { %p35_p2 = scmp.ge.s32.totalorder %s5368_s28, 4  }
0x2a1e   : > { %s5372_s26 = smov %s5369_s25 }
0x2a1f   :  { %37 = sbr.rel (!%p35_p2) target bundleno = 17 (0x11), region = 174 }
0x2a24   :  { %3403 = vsyncpa [#allocation3], 1 }
0x2a25   :  { %3405 = vsyncpa [#allocation3 + $0x1], 1 }

</bundles_post_ra>
